<compile_context>
chip_gen: v7x
topology: tpu7x:2x2x1
jax: 0.10.0
libtpu: 0.0.40
codegen_flags: <defaults>
</compile_context>

<pallas_src>
import functools

import jax
import jax.numpy as jnp
import numpy as np
from jax.experimental import pallas as pl
from jax.experimental.pallas import tpu as pltpu


# -----------------------------------------------------------------------------
# Fused kernel: the whole DiscriminatorHead forward for one batch element.
# -----------------------------------------------------------------------------
def _head_kernel(x_ref, *args, num_layers, neg_slope):
    """
    x_ref : (1, Cin, H*W)              input; channels on sublanes, H*W on lanes
    then per layer l (3 refs each):
      d_ref: (9, HWin_l, HWout_l)      0/1 shift matrices (one per 3x3 tap)
      w_ref: (9, Cout_l, Cin_l)        per-tap weight slices
      b_ref: (Cout_l, 1)               bias
    o_ref : (1, Cout_last, HWout_last) output
    """
    o_ref = args[-1]
    prm = args[:-1]

    x = x_ref[0].astype(jnp.float32)                        # (Cin, HWin)
    for l in range(num_layers):
        d_ref, w_ref, b_ref = prm[3 * l], prm[3 * l + 1], prm[3 * l + 2]
        cout = w_ref.shape[1]
        hwo = d_ref.shape[2]
        # Bias hoisted into the accumulator init (lane-broadcast).
        acc = jnp.broadcast_to(b_ref[...], (cout, hwo)).astype(jnp.float32)
        for t in range(9):                                   # 3x3 taps, unrolled
            s = jnp.dot(x, d_ref[t], preferred_element_type=jnp.float32)
            acc = acc + jnp.dot(w_ref[t], s, preferred_element_type=jnp.float32)
        if l < num_layers - 1:                               # LeakyReLU(0.2)
            acc = jnp.where(acc >= 0, acc, neg_slope * acc)
        x = acc
    o_ref[0] = x.astype(o_ref.dtype)


# -----------------------------------------------------------------------------
# Host-side constants: 0/1 shift matrices encoding shift + zero-pad + stride
# of a 3x3, padding=1 convolution on an (h, w) grid.
# -----------------------------------------------------------------------------
def _shift_mats(h, w, stride):
    ho = (h - 1) // stride + 1
    wo = (w - 1) // stride + 1
    d = np.zeros((9, h * w, ho * wo), np.float32)
    for kh in range(3):
        for kw in range(3):
            t = kh * 3 + kw
            for i in range(ho):
                hi = stride * i - 1 + kh
                if hi < 0 or hi >= h:
                    continue
                for j in range(wo):
                    wi = stride * j - 1 + kw
                    if wi < 0 or wi >= w:
                        continue
                    d[t, hi * w + wi, i * wo + j] = 1.0
    return jnp.asarray(d)


# -----------------------------------------------------------------------------
# Parameter construction (PyTorch-style OIHW weights, matches module shapes)
# -----------------------------------------------------------------------------
def init_params(key, out_ch, channel_dict, input_res, num_depth):
    def conv_init(k, cin, cout):
        kw_, kb_ = jax.random.split(k)
        fan_in = float(3 * 3 * cin)
        w = jax.random.normal(kw_, (cout, cin, 3, 3), jnp.float32) / (fan_in ** 0.5)
        b = jax.random.normal(kb_, (cout,), jnp.float32) * 0.01
        return w, b

    params = {"blocks": []}
    res = input_res
    for _ in range(num_depth):
        in_ch, o_ch = channel_dict[res], channel_dict[res // 2]
        key, k1, k2 = jax.random.split(key, 3)
        w1, b1 = conv_init(k1, in_ch, o_ch)   # stride-1 conv
        w2, b2 = conv_init(k2, o_ch, o_ch)    # stride-2 conv
        params["blocks"].append((w1, b1, w2, b2))
        res //= 2
    feat_res = input_res // 2 ** num_depth
    key, kl = jax.random.split(key)
    params["last"] = conv_init(kl, channel_dict[feat_res], out_ch)
    return params


# -----------------------------------------------------------------------------
# DiscriminatorHead.forward — one fused pallas_call, NCHW in / NCHW out.
# -----------------------------------------------------------------------------
def discriminator_head_forward(params, x_nchw):
    n, c_in, hh, ww = x_nchw.shape

    layer_defs = []
    for (w1, b1, w2, b2) in params["blocks"]:
        layer_defs.append((w1, b1, 1))       # conv_norm_lrelu stride 1
        layer_defs.append((w2, b2, 2))       # conv_norm_lrelu stride 2
    wl, bl = params["last"]
    layer_defs.append((wl, bl, 1))           # last_conv (no activation)

    inputs = [x_nchw.reshape(n, c_in, hh * ww)]
    in_specs = [pl.BlockSpec((1, c_in, hh * ww), lambda i: (i, 0, 0))]

    h, w = hh, ww
    for (wt, b, stride) in layer_defs:
        cout, cin = int(wt.shape[0]), int(wt.shape[1])
        ho = (h - 1) // stride + 1
        wo = (w - 1) // stride + 1
        d = _shift_mats(h, w, stride)                                    # (9, h*w, ho*wo)
        w_taps = jnp.transpose(wt, (2, 3, 0, 1)).reshape(9, cout, cin)   # tap-major
        b_col = b.reshape(cout, 1)
        inputs += [d, w_taps, b_col]
        in_specs += [
            pl.BlockSpec((9, h * w, ho * wo), lambda i: (0, 0, 0)),
            pl.BlockSpec((9, cout, cin), lambda i: (0, 0, 0)),
            pl.BlockSpec((cout, 1), lambda i: (0, 0)),
        ]
        h, w = ho, wo

    out_ch = int(layer_defs[-1][0].shape[0])
    kernel = functools.partial(_head_kernel,
                               num_layers=len(layer_defs), neg_slope=0.2)
    y = pl.pallas_call(
        kernel,
        out_shape=jax.ShapeDtypeStruct((n, out_ch, h * w), x_nchw.dtype),
        grid=(n,),
        in_specs=in_specs,
        out_specs=pl.BlockSpec((1, out_ch, h * w), lambda i: (i, 0, 0)),
        compiler_params=pltpu.CompilerParams(
            dimension_semantics=("parallel",),
            vmem_limit_bytes=32 * 1024 * 1024),
    )(*inputs)
    return y.reshape(n, out_ch, h, w)


# -----------------------------------------------------------------------------
# Pure-JAX reference (mirrors PyTorch Conv2d semantics) for a sanity check
# -----------------------------------------------------------------------------
def _ref_conv(x, w, b, *, stride, neg_slope=None):
    y = jax.lax.conv_general_dilated(
        x, w, window_strides=(stride, stride), padding=((1, 1), (1, 1)),
        dimension_numbers=("NCHW", "OIHW", "NCHW"))
    y = y + b.reshape(1, -1, 1, 1)
    if neg_slope is not None:
        y = jnp.where(y >= 0, y, neg_slope * y)
    return y


def _ref_forward(params, x):
    for (w1, b1, w2, b2) in params["blocks"]:
        x = _ref_conv(x, w1, b1, stride=1, neg_slope=0.2)
        x = _ref_conv(x, w2, b2, stride=2, neg_slope=0.2)
    wl, bl = params["last"]
    return _ref_conv(x, wl, bl, stride=1, neg_slope=None)


if __name__ == "__main__":
    key = jax.random.PRNGKey(0)

    # Small config: input_res=16, num_depth=2 -> feat_res=4
    channel_dict = {16: 4, 8: 8, 4: 16}
    input_res, num_depth, out_ch = 16, 2, 1

    kx, kp = jax.random.split(key)
    x = jax.random.normal(kx, (2, channel_dict[input_res], input_res, input_res),
                          jnp.float32)                      # NCHW, like PyTorch
    params = init_params(kp, out_ch, channel_dict, input_res, num_depth)

    y = discriminator_head_forward(params, x)
    y = jax.block_until_ready(y)

    feat = input_res // 2 ** num_depth
    assert y.shape == (2, out_ch, feat, feat), y.shape

    y_ref = _ref_forward(params, x)
    assert jnp.allclose(y, y_ref, atol=1e-2, rtol=1e-2), float(
        jnp.max(jnp.abs(y - y_ref)))

    print("KERNEL_OK")
</pallas_src>

<mosaic_0001>
module attributes {stable_mosaic.version = 11 : i64} {
  func.func @_head_kernel(%arg0: i32, %arg1: memref<1x4x256xf32, #tpu.memory_space<vmem>>, %arg2: memref<9x256x256xf32, #tpu.memory_space<vmem>>, %arg3: memref<9x8x4xf32, #tpu.memory_space<vmem>>, %arg4: memref<8x1xf32, #tpu.memory_space<vmem>>, %arg5: memref<9x256x64xf32, #tpu.memory_space<vmem>>, %arg6: memref<9x8x8xf32, #tpu.memory_space<vmem>>, %arg7: memref<8x1xf32, #tpu.memory_space<vmem>>, %arg8: memref<9x64x64xf32, #tpu.memory_space<vmem>>, %arg9: memref<9x16x8xf32, #tpu.memory_space<vmem>>, %arg10: memref<16x1xf32, #tpu.memory_space<vmem>>, %arg11: memref<9x64x16xf32, #tpu.memory_space<vmem>>, %arg12: memref<9x16x16xf32, #tpu.memory_space<vmem>>, %arg13: memref<16x1xf32, #tpu.memory_space<vmem>>, %arg14: memref<9x16x16xf32, #tpu.memory_space<vmem>>, %arg15: memref<9x1x16xf32, #tpu.memory_space<vmem>>, %arg16: memref<1x1xf32, #tpu.memory_space<vmem>>, %arg17: memref<1x1x16xf32, #tpu.memory_space<vmem>>) attributes {dimension_semantics = [#tpu.dimension_semantics<parallel>], iteration_bounds = array<i64: 2>, scalar_prefetch = 0 : i64, scratch_operands = 0 : i64, tpu.core_type = #tpu.core_type<tc>, window_params = [{transform_indices = @transform_0, window_bounds = array<i64: 1, 4, 256>}, {pipeline_mode = #tpu.pipeline_mode<synchronous>, transform_indices = @transform_1, window_bounds = array<i64: 9, 256, 256>}, {pipeline_mode = #tpu.pipeline_mode<synchronous>, transform_indices = @transform_2, window_bounds = array<i64: 9, 8, 4>}, {pipeline_mode = #tpu.pipeline_mode<synchronous>, transform_indices = @transform_3, window_bounds = array<i64: 8, 1>}, {pipeline_mode = #tpu.pipeline_mode<synchronous>, transform_indices = @transform_4, window_bounds = array<i64: 9, 256, 64>}, {pipeline_mode = #tpu.pipeline_mode<synchronous>, transform_indices = @transform_5, window_bounds = array<i64: 9, 8, 8>}, {pipeline_mode = #tpu.pipeline_mode<synchronous>, transform_indices = @transform_6, window_bounds = array<i64: 8, 1>}, {pipeline_mode = #tpu.pipeline_mode<synchronous>, transform_indices = @transform_7, window_bounds = array<i64: 9, 64, 64>}, {pipeline_mode = #tpu.pipeline_mode<synchronous>, transform_indices = @transform_8, window_bounds = array<i64: 9, 16, 8>}, {pipeline_mode = #tpu.pipeline_mode<synchronous>, transform_indices = @transform_9, window_bounds = array<i64: 16, 1>}, {pipeline_mode = #tpu.pipeline_mode<synchronous>, transform_indices = @transform_10, window_bounds = array<i64: 9, 64, 16>}, {pipeline_mode = #tpu.pipeline_mode<synchronous>, transform_indices = @transform_11, window_bounds = array<i64: 9, 16, 16>}, {pipeline_mode = #tpu.pipeline_mode<synchronous>, transform_indices = @transform_12, window_bounds = array<i64: 16, 1>}, {pipeline_mode = #tpu.pipeline_mode<synchronous>, transform_indices = @transform_13, window_bounds = array<i64: 9, 16, 16>}, {pipeline_mode = #tpu.pipeline_mode<synchronous>, transform_indices = @transform_14, window_bounds = array<i64: 9, 1, 16>}, {pipeline_mode = #tpu.pipeline_mode<synchronous>, transform_indices = @transform_15, window_bounds = array<i64: 1, 1>}, {transform_indices = @transform_16, window_bounds = array<i64: 1, 1, 16>}]} {
    %c0 = arith.constant 0 : index
    %c0_0 = arith.constant 0 : index
    %c0_1 = arith.constant 0 : index
    %0 = vector.load %arg1[%c0, %c0_0, %c0_1] : memref<1x4x256xf32, #tpu.memory_space<vmem>>, vector<1x4x256xf32>
    %1 = vector.shape_cast %0 : vector<1x4x256xf32> to vector<4x256xf32>
    %c0_2 = arith.constant 0 : index
    %c0_3 = arith.constant 0 : index
    %2 = vector.load %arg4[%c0_2, %c0_3] : memref<8x1xf32, #tpu.memory_space<vmem>>, vector<8x1xf32>
    %3 = vector.shape_cast %2 : vector<8x1xf32> to vector<8x1xf32>
    %4 = vector.broadcast %3 : vector<8x1xf32> to vector<8x256xf32>
    %c0_4 = arith.constant 0 : index
    %c0_5 = arith.constant 0 : index
    %c0_6 = arith.constant 0 : index
    %5 = vector.load %arg2[%c0_4, %c0_5, %c0_6] : memref<9x256x256xf32, #tpu.memory_space<vmem>>, vector<1x256x256xf32>
    %6 = vector.shape_cast %5 : vector<1x256x256xf32> to vector<256x256xf32>
    %cst = arith.constant dense<0.000000e+00> : vector<4x256xf32>
    %7 = tpu.matmul %1, %6, %cst {dimension_numbers = #tpu.dot_dimension_numbers<[1], [0], [0], [1], [0, 0, 1, 1], [], []>} : vector<4x256xf32>, vector<256x256xf32>, vector<4x256xf32> -> vector<4x256xf32>
    %c0_7 = arith.constant 0 : index
    %c0_8 = arith.constant 0 : index
    %c0_9 = arith.constant 0 : index
    %8 = vector.load %arg3[%c0_7, %c0_8, %c0_9] : memref<9x8x4xf32, #tpu.memory_space<vmem>>, vector<1x8x4xf32>
    %9 = vector.shape_cast %8 : vector<1x8x4xf32> to vector<8x4xf32>
    %cst_10 = arith.constant dense<0.000000e+00> : vector<8x256xf32>
    %10 = tpu.matmul %9, %7, %cst_10 {dimension_numbers = #tpu.dot_dimension_numbers<[1], [0], [0], [1], [0, 0, 1, 1], [], []>} : vector<8x4xf32>, vector<4x256xf32>, vector<8x256xf32> -> vector<8x256xf32>
    %11 = arith.addf %4, %10 : vector<8x256xf32>
    %c1 = arith.constant 1 : index
    %c0_11 = arith.constant 0 : index
    %c0_12 = arith.constant 0 : index
    %12 = vector.load %arg2[%c1, %c0_11, %c0_12] : memref<9x256x256xf32, #tpu.memory_space<vmem>>, vector<1x256x256xf32>
    %13 = vector.shape_cast %12 : vector<1x256x256xf32> to vector<256x256xf32>
    %cst_13 = arith.constant dense<0.000000e+00> : vector<4x256xf32>
    %14 = tpu.matmul %1, %13, %cst_13 {dimension_numbers = #tpu.dot_dimension_numbers<[1], [0], [0], [1], [0, 0, 1, 1], [], []>} : vector<4x256xf32>, vector<256x256xf32>, vector<4x256xf32> -> vector<4x256xf32>
    %c1_14 = arith.constant 1 : index
    %c0_15 = arith.constant 0 : index
    %c0_16 = arith.constant 0 : index
    %15 = vector.load %arg3[%c1_14, %c0_15, %c0_16] : memref<9x8x4xf32, #tpu.memory_space<vmem>>, vector<1x8x4xf32>
    %16 = vector.shape_cast %15 : vector<1x8x4xf32> to vector<8x4xf32>
    %cst_17 = arith.constant dense<0.000000e+00> : vector<8x256xf32>
    %17 = tpu.matmul %16, %14, %cst_17 {dimension_numbers = #tpu.dot_dimension_numbers<[1], [0], [0], [1], [0, 0, 1, 1], [], []>} : vector<8x4xf32>, vector<4x256xf32>, vector<8x256xf32> -> vector<8x256xf32>
    %18 = arith.addf %11, %17 : vector<8x256xf32>
    %c2 = arith.constant 2 : index
    %c0_18 = arith.constant 0 : index
    %c0_19 = arith.constant 0 : index
    %19 = vector.load %arg2[%c2, %c0_18, %c0_19] : memref<9x256x256xf32, #tpu.memory_space<vmem>>, vector<1x256x256xf32>
    %20 = vector.shape_cast %19 : vector<1x256x256xf32> to vector<256x256xf32>
    %cst_20 = arith.constant dense<0.000000e+00> : vector<4x256xf32>
    %21 = tpu.matmul %1, %20, %cst_20 {dimension_numbers = #tpu.dot_dimension_numbers<[1], [0], [0], [1], [0, 0, 1, 1], [], []>} : vector<4x256xf32>, vector<256x256xf32>, vector<4x256xf32> -> vector<4x256xf32>
    %c2_21 = arith.constant 2 : index
    %c0_22 = arith.constant 0 : index
    %c0_23 = arith.constant 0 : index
    %22 = vector.load %arg3[%c2_21, %c0_22, %c0_23] : memref<9x8x4xf32, #tpu.memory_space<vmem>>, vector<1x8x4xf32>
    %23 = vector.shape_cast %22 : vector<1x8x4xf32> to vector<8x4xf32>
    %cst_24 = arith.constant dense<0.000000e+00> : vector<8x256xf32>
    %24 = tpu.matmul %23, %21, %cst_24 {dimension_numbers = #tpu.dot_dimension_numbers<[1], [0], [0], [1], [0, 0, 1, 1], [], []>} : vector<8x4xf32>, vector<4x256xf32>, vector<8x256xf32> -> vector<8x256xf32>
    %25 = arith.addf %18, %24 : vector<8x256xf32>
    %c3 = arith.constant 3 : index
    %c0_25 = arith.constant 0 : index
    %c0_26 = arith.constant 0 : index
    %26 = vector.load %arg2[%c3, %c0_25, %c0_26] : memref<9x256x256xf32, #tpu.memory_space<vmem>>, vector<1x256x256xf32>
    %27 = vector.shape_cast %26 : vector<1x256x256xf32> to vector<256x256xf32>
    %cst_27 = arith.constant dense<0.000000e+00> : vector<4x256xf32>
    %28 = tpu.matmul %1, %27, %cst_27 {dimension_numbers = #tpu.dot_dimension_numbers<[1], [0], [0], [1], [0, 0, 1, 1], [], []>} : vector<4x256xf32>, vector<256x256xf32>, vector<4x256xf32> -> vector<4x256xf32>
    %c3_28 = arith.constant 3 : index
    %c0_29 = arith.constant 0 : index
    %c0_30 = arith.constant 0 : index
    %29 = vector.load %arg3[%c3_28, %c0_29, %c0_30] : memref<9x8x4xf32, #tpu.memory_space<vmem>>, vector<1x8x4xf32>
    %30 = vector.shape_cast %29 : vector<1x8x4xf32> to vector<8x4xf32>
    %cst_31 = arith.constant dense<0.000000e+00> : vector<8x256xf32>
    %31 = tpu.matmul %30, %28, %cst_31 {dimension_numbers = #tpu.dot_dimension_numbers<[1], [0], [0], [1], [0, 0, 1, 1], [], []>} : vector<8x4xf32>, vector<4x256xf32>, vector<8x256xf32> -> vector<8x256xf32>
    %32 = arith.addf %25, %31 : vector<8x256xf32>
    %c4 = arith.constant 4 : index
    %c0_32 = arith.constant 0 : index
    %c0_33 = arith.constant 0 : index
    %33 = vector.load %arg2[%c4, %c0_32, %c0_33] : memref<9x256x256xf32, #tpu.memory_space<vmem>>, vector<1x256x256xf32>
    %34 = vector.shape_cast %33 : vector<1x256x256xf32> to vector<256x256xf32>
    %cst_34 = arith.constant dense<0.000000e+00> : vector<4x256xf32>
    %35 = tpu.matmul %1, %34, %cst_34 {dimension_numbers = #tpu.dot_dimension_numbers<[1], [0], [0], [1], [0, 0, 1, 1], [], []>} : vector<4x256xf32>, vector<256x256xf32>, vector<4x256xf32> -> vector<4x256xf32>
    %c4_35 = arith.constant 4 : index
    %c0_36 = arith.constant 0 : index
    %c0_37 = arith.constant 0 : index
    %36 = vector.load %arg3[%c4_35, %c0_36, %c0_37] : memref<9x8x4xf32, #tpu.memory_space<vmem>>, vector<1x8x4xf32>
    %37 = vector.shape_cast %36 : vector<1x8x4xf32> to vector<8x4xf32>
    %cst_38 = arith.constant dense<0.000000e+00> : vector<8x256xf32>
    %38 = tpu.matmul %37, %35, %cst_38 {dimension_numbers = #tpu.dot_dimension_numbers<[1], [0], [0], [1], [0, 0, 1, 1], [], []>} : vector<8x4xf32>, vector<4x256xf32>, vector<8x256xf32> -> vector<8x256xf32>
    %39 = arith.addf %32, %38 : vector<8x256xf32>
    %c5 = arith.constant 5 : index
    %c0_39 = arith.constant 0 : index
    %c0_40 = arith.constant 0 : index
    %40 = vector.load %arg2[%c5, %c0_39, %c0_40] : memref<9x256x256xf32, #tpu.memory_space<vmem>>, vector<1x256x256xf32>
    %41 = vector.shape_cast %40 : vector<1x256x256xf32> to vector<256x256xf32>
    %cst_41 = arith.constant dense<0.000000e+00> : vector<4x256xf32>
    %42 = tpu.matmul %1, %41, %cst_41 {dimension_numbers = #tpu.dot_dimension_numbers<[1], [0], [0], [1], [0, 0, 1, 1], [], []>} : vector<4x256xf32>, vector<256x256xf32>, vector<4x256xf32> -> vector<4x256xf32>
    %c5_42 = arith.constant 5 : index
    %c0_43 = arith.constant 0 : index
    %c0_44 = arith.constant 0 : index
    %43 = vector.load %arg3[%c5_42, %c0_43, %c0_44] : memref<9x8x4xf32, #tpu.memory_space<vmem>>, vector<1x8x4xf32>
    %44 = vector.shape_cast %43 : vector<1x8x4xf32> to vector<8x4xf32>
    %cst_45 = arith.constant dense<0.000000e+00> : vector<8x256xf32>
    %45 = tpu.matmul %44, %42, %cst_45 {dimension_numbers = #tpu.dot_dimension_numbers<[1], [0], [0], [1], [0, 0, 1, 1], [], []>} : vector<8x4xf32>, vector<4x256xf32>, vector<8x256xf32> -> vector<8x256xf32>
    %46 = arith.addf %39, %45 : vector<8x256xf32>
    %c6 = arith.constant 6 : index
    %c0_46 = arith.constant 0 : index
    %c0_47 = arith.constant 0 : index
    %47 = vector.load %arg2[%c6, %c0_46, %c0_47] : memref<9x256x256xf32, #tpu.memory_space<vmem>>, vector<1x256x256xf32>
    %48 = vector.shape_cast %47 : vector<1x256x256xf32> to vector<256x256xf32>
    %cst_48 = arith.constant dense<0.000000e+00> : vector<4x256xf32>
    %49 = tpu.matmul %1, %48, %cst_48 {dimension_numbers = #tpu.dot_dimension_numbers<[1], [0], [0], [1], [0, 0, 1, 1], [], []>} : vector<4x256xf32>, vector<256x256xf32>, vector<4x256xf32> -> vector<4x256xf32>
    %c6_49 = arith.constant 6 : index
    %c0_50 = arith.constant 0 : index
    %c0_51 = arith.constant 0 : index
    %50 = vector.load %arg3[%c6_49, %c0_50, %c0_51] : memref<9x8x4xf32, #tpu.memory_space<vmem>>, vector<1x8x4xf32>
    %51 = vector.shape_cast %50 : vector<1x8x4xf32> to vector<8x4xf32>
    %cst_52 = arith.constant dense<0.000000e+00> : vector<8x256xf32>
    %52 = tpu.matmul %51, %49, %cst_52 {dimension_numbers = #tpu.dot_dimension_numbers<[1], [0], [0], [1], [0, 0, 1, 1], [], []>} : vector<8x4xf32>, vector<4x256xf32>, vector<8x256xf32> -> vector<8x256xf32>
    %53 = arith.addf %46, %52 : vector<8x256xf32>
    %c7 = arith.constant 7 : index
    %c0_53 = arith.constant 0 : index
    %c0_54 = arith.constant 0 : index
    %54 = vector.load %arg2[%c7, %c0_53, %c0_54] : memref<9x256x256xf32, #tpu.memory_space<vmem>>, vector<1x256x256xf32>
    %55 = vector.shape_cast %54 : vector<1x256x256xf32> to vector<256x256xf32>
    %cst_55 = arith.constant dense<0.000000e+00> : vector<4x256xf32>
    %56 = tpu.matmul %1, %55, %cst_55 {dimension_numbers = #tpu.dot_dimension_numbers<[1], [0], [0], [1], [0, 0, 1, 1], [], []>} : vector<4x256xf32>, vector<256x256xf32>, vector<4x256xf32> -> vector<4x256xf32>
    %c7_56 = arith.constant 7 : index
    %c0_57 = arith.constant 0 : index
    %c0_58 = arith.constant 0 : index
    %57 = vector.load %arg3[%c7_56, %c0_57, %c0_58] : memref<9x8x4xf32, #tpu.memory_space<vmem>>, vector<1x8x4xf32>
    %58 = vector.shape_cast %57 : vector<1x8x4xf32> to vector<8x4xf32>
    %cst_59 = arith.constant dense<0.000000e+00> : vector<8x256xf32>
    %59 = tpu.matmul %58, %56, %cst_59 {dimension_numbers = #tpu.dot_dimension_numbers<[1], [0], [0], [1], [0, 0, 1, 1], [], []>} : vector<8x4xf32>, vector<4x256xf32>, vector<8x256xf32> -> vector<8x256xf32>
    %60 = arith.addf %53, %59 : vector<8x256xf32>
    %c8 = arith.constant 8 : index
    %c0_60 = arith.constant 0 : index
    %c0_61 = arith.constant 0 : index
    %61 = vector.load %arg2[%c8, %c0_60, %c0_61] : memref<9x256x256xf32, #tpu.memory_space<vmem>>, vector<1x256x256xf32>
    %62 = vector.shape_cast %61 : vector<1x256x256xf32> to vector<256x256xf32>
    %cst_62 = arith.constant dense<0.000000e+00> : vector<4x256xf32>
    %63 = tpu.matmul %1, %62, %cst_62 {dimension_numbers = #tpu.dot_dimension_numbers<[1], [0], [0], [1], [0, 0, 1, 1], [], []>} : vector<4x256xf32>, vector<256x256xf32>, vector<4x256xf32> -> vector<4x256xf32>
    %c8_63 = arith.constant 8 : index
    %c0_64 = arith.constant 0 : index
    %c0_65 = arith.constant 0 : index
    %64 = vector.load %arg3[%c8_63, %c0_64, %c0_65] : memref<9x8x4xf32, #tpu.memory_space<vmem>>, vector<1x8x4xf32>
    %65 = vector.shape_cast %64 : vector<1x8x4xf32> to vector<8x4xf32>
    %cst_66 = arith.constant dense<0.000000e+00> : vector<8x256xf32>
    %66 = tpu.matmul %65, %63, %cst_66 {dimension_numbers = #tpu.dot_dimension_numbers<[1], [0], [0], [1], [0, 0, 1, 1], [], []>} : vector<8x4xf32>, vector<4x256xf32>, vector<8x256xf32> -> vector<8x256xf32>
    %67 = arith.addf %60, %66 : vector<8x256xf32>
    %cst_67 = arith.constant 0.000000e+00 : f32
    %68 = vector.broadcast %cst_67 : f32 to vector<8x256xf32>
    %69 = arith.cmpf oge, %67, %68 : vector<8x256xf32>
    %cst_68 = arith.constant 2.000000e-01 : f32
    %70 = vector.broadcast %cst_68 : f32 to vector<8x256xf32>
    %71 = arith.mulf %70, %67 : vector<8x256xf32>
    %72 = arith.select %69, %67, %71 : vector<8x256xi1>, vector<8x256xf32>
    %c0_69 = arith.constant 0 : index
    %c0_70 = arith.constant 0 : index
    %73 = vector.load %arg7[%c0_69, %c0_70] : memref<8x1xf32, #tpu.memory_space<vmem>>, vector<8x1xf32>
    %74 = vector.shape_cast %73 : vector<8x1xf32> to vector<8x1xf32>
    %75 = vector.broadcast %74 : vector<8x1xf32> to vector<8x64xf32>
    %c0_71 = arith.constant 0 : index
    %c0_72 = arith.constant 0 : index
    %c0_73 = arith.constant 0 : index
    %76 = vector.load %arg5[%c0_71, %c0_72, %c0_73] : memref<9x256x64xf32, #tpu.memory_space<vmem>>, vector<1x256x64xf32>
    %77 = vector.shape_cast %76 : vector<1x256x64xf32> to vector<256x64xf32>
    %cst_74 = arith.constant dense<0.000000e+00> : vector<8x64xf32>
    %78 = tpu.matmul %72, %77, %cst_74 {dimension_numbers = #tpu.dot_dimension_numbers<[1], [0], [0], [1], [0, 0, 1, 1], [], []>} : vector<8x256xf32>, vector<256x64xf32>, vector<8x64xf32> -> vector<8x64xf32>
    %c0_75 = arith.constant 0 : index
    %c0_76 = arith.constant 0 : index
    %c0_77 = arith.constant 0 : index
    %79 = vector.load %arg6[%c0_75, %c0_76, %c0_77] : memref<9x8x8xf32, #tpu.memory_space<vmem>>, vector<1x8x8xf32>
    %80 = vector.shape_cast %79 : vector<1x8x8xf32> to vector<8x8xf32>
    %cst_78 = arith.constant dense<0.000000e+00> : vector<8x64xf32>
    %81 = tpu.matmul %80, %78, %cst_78 {dimension_numbers = #tpu.dot_dimension_numbers<[1], [0], [0], [1], [0, 0, 1, 1], [], []>} : vector<8x8xf32>, vector<8x64xf32>, vector<8x64xf32> -> vector<8x64xf32>
    %82 = arith.addf %75, %81 : vector<8x64xf32>
    %c1_79 = arith.constant 1 : index
    %c0_80 = arith.constant 0 : index
    %c0_81 = arith.constant 0 : index
    %83 = vector.load %arg5[%c1_79, %c0_80, %c0_81] : memref<9x256x64xf32, #tpu.memory_space<vmem>>, vector<1x256x64xf32>
    %84 = vector.shape_cast %83 : vector<1x256x64xf32> to vector<256x64xf32>
    %cst_82 = arith.constant dense<0.000000e+00> : vector<8x64xf32>
    %85 = tpu.matmul %72, %84, %cst_82 {dimension_numbers = #tpu.dot_dimension_numbers<[1], [0], [0], [1], [0, 0, 1, 1], [], []>} : vector<8x256xf32>, vector<256x64xf32>, vector<8x64xf32> -> vector<8x64xf32>
    %c1_83 = arith.constant 1 : index
    %c0_84 = arith.constant 0 : index
    %c0_85 = arith.constant 0 : index
    %86 = vector.load %arg6[%c1_83, %c0_84, %c0_85] : memref<9x8x8xf32, #tpu.memory_space<vmem>>, vector<1x8x8xf32>
    %87 = vector.shape_cast %86 : vector<1x8x8xf32> to vector<8x8xf32>
    %cst_86 = arith.constant dense<0.000000e+00> : vector<8x64xf32>
    %88 = tpu.matmul %87, %85, %cst_86 {dimension_numbers = #tpu.dot_dimension_numbers<[1], [0], [0], [1], [0, 0, 1, 1], [], []>} : vector<8x8xf32>, vector<8x64xf32>, vector<8x64xf32> -> vector<8x64xf32>
    %89 = arith.addf %82, %88 : vector<8x64xf32>
    %c2_87 = arith.constant 2 : index
    %c0_88 = arith.constant 0 : index
    %c0_89 = arith.constant 0 : index
    %90 = vector.load %arg5[%c2_87, %c0_88, %c0_89] : memref<9x256x64xf32, #tpu.memory_space<vmem>>, vector<1x256x64xf32>
    %91 = vector.shape_cast %90 : vector<1x256x64xf32> to vector<256x64xf32>
    %cst_90 = arith.constant dense<0.000000e+00> : vector<8x64xf32>
    %92 = tpu.matmul %72, %91, %cst_90 {dimension_numbers = #tpu.dot_dimension_numbers<[1], [0], [0], [1], [0, 0, 1, 1], [], []>} : vector<8x256xf32>, vector<256x64xf32>, vector<8x64xf32> -> vector<8x64xf32>
    %c2_91 = arith.constant 2 : index
    %c0_92 = arith.constant 0 : index
    %c0_93 = arith.constant 0 : index
    %93 = vector.load %arg6[%c2_91, %c0_92, %c0_93] : memref<9x8x8xf32, #tpu.memory_space<vmem>>, vector<1x8x8xf32>
    %94 = vector.shape_cast %93 : vector<1x8x8xf32> to vector<8x8xf32>
    %cst_94 = arith.constant dense<0.000000e+00> : vector<8x64xf32>
    %95 = tpu.matmul %94, %92, %cst_94 {dimension_numbers = #tpu.dot_dimension_numbers<[1], [0], [0], [1], [0, 0, 1, 1], [], []>} : vector<8x8xf32>, vector<8x64xf32>, vector<8x64xf32> -> vector<8x64xf32>
    %96 = arith.addf %89, %95 : vector<8x64xf32>
    %c3_95 = arith.constant 3 : index
    %c0_96 = arith.constant 0 : index
    %c0_97 = arith.constant 0 : index
    %97 = vector.load %arg5[%c3_95, %c0_96, %c0_97] : memref<9x256x64xf32, #tpu.memory_space<vmem>>, vector<1x256x64xf32>
    %98 = vector.shape_cast %97 : vector<1x256x64xf32> to vector<256x64xf32>
    %cst_98 = arith.constant dense<0.000000e+00> : vector<8x64xf32>
    %99 = tpu.matmul %72, %98, %cst_98 {dimension_numbers = #tpu.dot_dimension_numbers<[1], [0], [0], [1], [0, 0, 1, 1], [], []>} : vector<8x256xf32>, vector<256x64xf32>, vector<8x64xf32> -> vector<8x64xf32>
    %c3_99 = arith.constant 3 : index
    %c0_100 = arith.constant 0 : index
    %c0_101 = arith.constant 0 : index
    %100 = vector.load %arg6[%c3_99, %c0_100, %c0_101] : memref<9x8x8xf32, #tpu.memory_space<vmem>>, vector<1x8x8xf32>
    %101 = vector.shape_cast %100 : vector<1x8x8xf32> to vector<8x8xf32>
    %cst_102 = arith.constant dense<0.000000e+00> : vector<8x64xf32>
    %102 = tpu.matmul %101, %99, %cst_102 {dimension_numbers = #tpu.dot_dimension_numbers<[1], [0], [0], [1], [0, 0, 1, 1], [], []>} : vector<8x8xf32>, vector<8x64xf32>, vector<8x64xf32> -> vector<8x64xf32>
    %103 = arith.addf %96, %102 : vector<8x64xf32>
    %c4_103 = arith.constant 4 : index
    %c0_104 = arith.constant 0 : index
    %c0_105 = arith.constant 0 : index
    %104 = vector.load %arg5[%c4_103, %c0_104, %c0_105] : memref<9x256x64xf32, #tpu.memory_space<vmem>>, vector<1x256x64xf32>
    %105 = vector.shape_cast %104 : vector<1x256x64xf32> to vector<256x64xf32>
    %cst_106 = arith.constant dense<0.000000e+00> : vector<8x64xf32>
    %106 = tpu.matmul %72, %105, %cst_106 {dimension_numbers = #tpu.dot_dimension_numbers<[1], [0], [0], [1], [0, 0, 1, 1], [], []>} : vector<8x256xf32>, vector<256x64xf32>, vector<8x64xf32> -> vector<8x64xf32>
    %c4_107 = arith.constant 4 : index
    %c0_108 = arith.constant 0 : index
    %c0_109 = arith.constant 0 : index
    %107 = vector.load %arg6[%c4_107, %c0_108, %c0_109] : memref<9x8x8xf32, #tpu.memory_space<vmem>>, vector<1x8x8xf32>
    %108 = vector.shape_cast %107 : vector<1x8x8xf32> to vector<8x8xf32>
    %cst_110 = arith.constant dense<0.000000e+00> : vector<8x64xf32>
    %109 = tpu.matmul %108, %106, %cst_110 {dimension_numbers = #tpu.dot_dimension_numbers<[1], [0], [0], [1], [0, 0, 1, 1], [], []>} : vector<8x8xf32>, vector<8x64xf32>, vector<8x64xf32> -> vector<8x64xf32>
    %110 = arith.addf %103, %109 : vector<8x64xf32>
    %c5_111 = arith.constant 5 : index
    %c0_112 = arith.constant 0 : index
    %c0_113 = arith.constant 0 : index
    %111 = vector.load %arg5[%c5_111, %c0_112, %c0_113] : memref<9x256x64xf32, #tpu.memory_space<vmem>>, vector<1x256x64xf32>
    %112 = vector.shape_cast %111 : vector<1x256x64xf32> to vector<256x64xf32>
    %cst_114 = arith.constant dense<0.000000e+00> : vector<8x64xf32>
    %113 = tpu.matmul %72, %112, %cst_114 {dimension_numbers = #tpu.dot_dimension_numbers<[1], [0], [0], [1], [0, 0, 1, 1], [], []>} : vector<8x256xf32>, vector<256x64xf32>, vector<8x64xf32> -> vector<8x64xf32>
    %c5_115 = arith.constant 5 : index
    %c0_116 = arith.constant 0 : index
    %c0_117 = arith.constant 0 : index
    %114 = vector.load %arg6[%c5_115, %c0_116, %c0_117] : memref<9x8x8xf32, #tpu.memory_space<vmem>>, vector<1x8x8xf32>
    %115 = vector.shape_cast %114 : vector<1x8x8xf32> to vector<8x8xf32>
    %cst_118 = arith.constant dense<0.000000e+00> : vector<8x64xf32>
    %116 = tpu.matmul %115, %113, %cst_118 {dimension_numbers = #tpu.dot_dimension_numbers<[1], [0], [0], [1], [0, 0, 1, 1], [], []>} : vector<8x8xf32>, vector<8x64xf32>, vector<8x64xf32> -> vector<8x64xf32>
    %117 = arith.addf %110, %116 : vector<8x64xf32>
    %c6_119 = arith.constant 6 : index
    %c0_120 = arith.constant 0 : index
    %c0_121 = arith.constant 0 : index
    %118 = vector.load %arg5[%c6_119, %c0_120, %c0_121] : memref<9x256x64xf32, #tpu.memory_space<vmem>>, vector<1x256x64xf32>
    %119 = vector.shape_cast %118 : vector<1x256x64xf32> to vector<256x64xf32>
    %cst_122 = arith.constant dense<0.000000e+00> : vector<8x64xf32>
    %120 = tpu.matmul %72, %119, %cst_122 {dimension_numbers = #tpu.dot_dimension_numbers<[1], [0], [0], [1], [0, 0, 1, 1], [], []>} : vector<8x256xf32>, vector<256x64xf32>, vector<8x64xf32> -> vector<8x64xf32>
    %c6_123 = arith.constant 6 : index
    %c0_124 = arith.constant 0 : index
    %c0_125 = arith.constant 0 : index
    %121 = vector.load %arg6[%c6_123, %c0_124, %c0_125] : memref<9x8x8xf32, #tpu.memory_space<vmem>>, vector<1x8x8xf32>
    %122 = vector.shape_cast %121 : vector<1x8x8xf32> to vector<8x8xf32>
    %cst_126 = arith.constant dense<0.000000e+00> : vector<8x64xf32>
    %123 = tpu.matmul %122, %120, %cst_126 {dimension_numbers = #tpu.dot_dimension_numbers<[1], [0], [0], [1], [0, 0, 1, 1], [], []>} : vector<8x8xf32>, vector<8x64xf32>, vector<8x64xf32> -> vector<8x64xf32>
    %124 = arith.addf %117, %123 : vector<8x64xf32>
    %c7_127 = arith.constant 7 : index
    %c0_128 = arith.constant 0 : index
    %c0_129 = arith.constant 0 : index
    %125 = vector.load %arg5[%c7_127, %c0_128, %c0_129] : memref<9x256x64xf32, #tpu.memory_space<vmem>>, vector<1x256x64xf32>
    %126 = vector.shape_cast %125 : vector<1x256x64xf32> to vector<256x64xf32>
    %cst_130 = arith.constant dense<0.000000e+00> : vector<8x64xf32>
    %127 = tpu.matmul %72, %126, %cst_130 {dimension_numbers = #tpu.dot_dimension_numbers<[1], [0], [0], [1], [0, 0, 1, 1], [], []>} : vector<8x256xf32>, vector<256x64xf32>, vector<8x64xf32> -> vector<8x64xf32>
    %c7_131 = arith.constant 7 : index
    %c0_132 = arith.constant 0 : index
    %c0_133 = arith.constant 0 : index
    %128 = vector.load %arg6[%c7_131, %c0_132, %c0_133] : memref<9x8x8xf32, #tpu.memory_space<vmem>>, vector<1x8x8xf32>
    %129 = vector.shape_cast %128 : vector<1x8x8xf32> to vector<8x8xf32>
    %cst_134 = arith.constant dense<0.000000e+00> : vector<8x64xf32>
    %130 = tpu.matmul %129, %127, %cst_134 {dimension_numbers = #tpu.dot_dimension_numbers<[1], [0], [0], [1], [0, 0, 1, 1], [], []>} : vector<8x8xf32>, vector<8x64xf32>, vector<8x64xf32> -> vector<8x64xf32>
    %131 = arith.addf %124, %130 : vector<8x64xf32>
    %c8_135 = arith.constant 8 : index
    %c0_136 = arith.constant 0 : index
    %c0_137 = arith.constant 0 : index
    %132 = vector.load %arg5[%c8_135, %c0_136, %c0_137] : memref<9x256x64xf32, #tpu.memory_space<vmem>>, vector<1x256x64xf32>
    %133 = vector.shape_cast %132 : vector<1x256x64xf32> to vector<256x64xf32>
    %cst_138 = arith.constant dense<0.000000e+00> : vector<8x64xf32>
    %134 = tpu.matmul %72, %133, %cst_138 {dimension_numbers = #tpu.dot_dimension_numbers<[1], [0], [0], [1], [0, 0, 1, 1], [], []>} : vector<8x256xf32>, vector<256x64xf32>, vector<8x64xf32> -> vector<8x64xf32>
    %c8_139 = arith.constant 8 : index
    %c0_140 = arith.constant 0 : index
    %c0_141 = arith.constant 0 : index
    %135 = vector.load %arg6[%c8_139, %c0_140, %c0_141] : memref<9x8x8xf32, #tpu.memory_space<vmem>>, vector<1x8x8xf32>
    %136 = vector.shape_cast %135 : vector<1x8x8xf32> to vector<8x8xf32>
    %cst_142 = arith.constant dense<0.000000e+00> : vector<8x64xf32>
    %137 = tpu.matmul %136, %134, %cst_142 {dimension_numbers = #tpu.dot_dimension_numbers<[1], [0], [0], [1], [0, 0, 1, 1], [], []>} : vector<8x8xf32>, vector<8x64xf32>, vector<8x64xf32> -> vector<8x64xf32>
    %138 = arith.addf %131, %137 : vector<8x64xf32>
    %cst_143 = arith.constant 0.000000e+00 : f32
    %139 = vector.broadcast %cst_143 : f32 to vector<8x64xf32>
    %140 = arith.cmpf oge, %138, %139 : vector<8x64xf32>
    %cst_144 = arith.constant 2.000000e-01 : f32
    %141 = vector.broadcast %cst_144 : f32 to vector<8x64xf32>
    %142 = arith.mulf %141, %138 : vector<8x64xf32>
    %143 = arith.select %140, %138, %142 : vector<8x64xi1>, vector<8x64xf32>
    %c0_145 = arith.constant 0 : index
    %c0_146 = arith.constant 0 : index
    %144 = vector.load %arg10[%c0_145, %c0_146] : memref<16x1xf32, #tpu.memory_space<vmem>>, vector<16x1xf32>
    %145 = vector.shape_cast %144 : vector<16x1xf32> to vector<16x1xf32>
    %146 = vector.broadcast %145 : vector<16x1xf32> to vector<16x64xf32>
    %c0_147 = arith.constant 0 : index
    %c0_148 = arith.constant 0 : index
    %c0_149 = arith.constant 0 : index
    %147 = vector.load %arg8[%c0_147, %c0_148, %c0_149] : memref<9x64x64xf32, #tpu.memory_space<vmem>>, vector<1x64x64xf32>
    %148 = vector.shape_cast %147 : vector<1x64x64xf32> to vector<64x64xf32>
    %cst_150 = arith.constant dense<0.000000e+00> : vector<8x64xf32>
    %149 = tpu.matmul %143, %148, %cst_150 {dimension_numbers = #tpu.dot_dimension_numbers<[1], [0], [0], [1], [0, 0, 1, 1], [], []>} : vector<8x64xf32>, vector<64x64xf32>, vector<8x64xf32> -> vector<8x64xf32>
    %c0_151 = arith.constant 0 : index
    %c0_152 = arith.constant 0 : index
    %c0_153 = arith.constant 0 : index
    %150 = vector.load %arg9[%c0_151, %c0_152, %c0_153] : memref<9x16x8xf32, #tpu.memory_space<vmem>>, vector<1x16x8xf32>
    %151 = vector.shape_cast %150 : vector<1x16x8xf32> to vector<16x8xf32>
    %cst_154 = arith.constant dense<0.000000e+00> : vector<16x64xf32>
    %152 = tpu.matmul %151, %149, %cst_154 {dimension_numbers = #tpu.dot_dimension_numbers<[1], [0], [0], [1], [0, 0, 1, 1], [], []>} : vector<16x8xf32>, vector<8x64xf32>, vector<16x64xf32> -> vector<16x64xf32>
    %153 = arith.addf %146, %152 : vector<16x64xf32>
    %c1_155 = arith.constant 1 : index
    %c0_156 = arith.constant 0 : index
    %c0_157 = arith.constant 0 : index
    %154 = vector.load %arg8[%c1_155, %c0_156, %c0_157] : memref<9x64x64xf32, #tpu.memory_space<vmem>>, vector<1x64x64xf32>
    %155 = vector.shape_cast %154 : vector<1x64x64xf32> to vector<64x64xf32>
    %cst_158 = arith.constant dense<0.000000e+00> : vector<8x64xf32>
    %156 = tpu.matmul %143, %155, %cst_158 {dimension_numbers = #tpu.dot_dimension_numbers<[1], [0], [0], [1], [0, 0, 1, 1], [], []>} : vector<8x64xf32>, vector<64x64xf32>, vector<8x64xf32> -> vector<8x64xf32>
    %c1_159 = arith.constant 1 : index
    %c0_160 = arith.constant 0 : index
    %c0_161 = arith.constant 0 : index
    %157 = vector.load %arg9[%c1_159, %c0_160, %c0_161] : memref<9x16x8xf32, #tpu.memory_space<vmem>>, vector<1x16x8xf32>
    %158 = vector.shape_cast %157 : vector<1x16x8xf32> to vector<16x8xf32>
    %cst_162 = arith.constant dense<0.000000e+00> : vector<16x64xf32>
    %159 = tpu.matmul %158, %156, %cst_162 {dimension_numbers = #tpu.dot_dimension_numbers<[1], [0], [0], [1], [0, 0, 1, 1], [], []>} : vector<16x8xf32>, vector<8x64xf32>, vector<16x64xf32> -> vector<16x64xf32>
    %160 = arith.addf %153, %159 : vector<16x64xf32>
    %c2_163 = arith.constant 2 : index
    %c0_164 = arith.constant 0 : index
    %c0_165 = arith.constant 0 : index
    %161 = vector.load %arg8[%c2_163, %c0_164, %c0_165] : memref<9x64x64xf32, #tpu.memory_space<vmem>>, vector<1x64x64xf32>
    %162 = vector.shape_cast %161 : vector<1x64x64xf32> to vector<64x64xf32>
    %cst_166 = arith.constant dense<0.000000e+00> : vector<8x64xf32>
    %163 = tpu.matmul %143, %162, %cst_166 {dimension_numbers = #tpu.dot_dimension_numbers<[1], [0], [0], [1], [0, 0, 1, 1], [], []>} : vector<8x64xf32>, vector<64x64xf32>, vector<8x64xf32> -> vector<8x64xf32>
    %c2_167 = arith.constant 2 : index
    %c0_168 = arith.constant 0 : index
    %c0_169 = arith.constant 0 : index
    %164 = vector.load %arg9[%c2_167, %c0_168, %c0_169] : memref<9x16x8xf32, #tpu.memory_space<vmem>>, vector<1x16x8xf32>
    %165 = vector.shape_cast %164 : vector<1x16x8xf32> to vector<16x8xf32>
    %cst_170 = arith.constant dense<0.000000e+00> : vector<16x64xf32>
    %166 = tpu.matmul %165, %163, %cst_170 {dimension_numbers = #tpu.dot_dimension_numbers<[1], [0], [0], [1], [0, 0, 1, 1], [], []>} : vector<16x8xf32>, vector<8x64xf32>, vector<16x64xf32> -> vector<16x64xf32>
    %167 = arith.addf %160, %166 : vector<16x64xf32>
    %c3_171 = arith.constant 3 : index
    %c0_172 = arith.constant 0 : index
    %c0_173 = arith.constant 0 : index
    %168 = vector.load %arg8[%c3_171, %c0_172, %c0_173] : memref<9x64x64xf32, #tpu.memory_space<vmem>>, vector<1x64x64xf32>
    %169 = vector.shape_cast %168 : vector<1x64x64xf32> to vector<64x64xf32>
    %cst_174 = arith.constant dense<0.000000e+00> : vector<8x64xf32>
    %170 = tpu.matmul %143, %169, %cst_174 {dimension_numbers = #tpu.dot_dimension_numbers<[1], [0], [0], [1], [0, 0, 1, 1], [], []>} : vector<8x64xf32>, vector<64x64xf32>, vector<8x64xf32> -> vector<8x64xf32>
    %c3_175 = arith.constant 3 : index
    %c0_176 = arith.constant 0 : index
    %c0_177 = arith.constant 0 : index
    %171 = vector.load %arg9[%c3_175, %c0_176, %c0_177] : memref<9x16x8xf32, #tpu.memory_space<vmem>>, vector<1x16x8xf32>
    %172 = vector.shape_cast %171 : vector<1x16x8xf32> to vector<16x8xf32>
    %cst_178 = arith.constant dense<0.000000e+00> : vector<16x64xf32>
    %173 = tpu.matmul %172, %170, %cst_178 {dimension_numbers = #tpu.dot_dimension_numbers<[1], [0], [0], [1], [0, 0, 1, 1], [], []>} : vector<16x8xf32>, vector<8x64xf32>, vector<16x64xf32> -> vector<16x64xf32>
    %174 = arith.addf %167, %173 : vector<16x64xf32>
    %c4_179 = arith.constant 4 : index
    %c0_180 = arith.constant 0 : index
    %c0_181 = arith.constant 0 : index
    %175 = vector.load %arg8[%c4_179, %c0_180, %c0_181] : memref<9x64x64xf32, #tpu.memory_space<vmem>>, vector<1x64x64xf32>
    %176 = vector.shape_cast %175 : vector<1x64x64xf32> to vector<64x64xf32>
    %cst_182 = arith.constant dense<0.000000e+00> : vector<8x64xf32>
    %177 = tpu.matmul %143, %176, %cst_182 {dimension_numbers = #tpu.dot_dimension_numbers<[1], [0], [0], [1], [0, 0, 1, 1], [], []>} : vector<8x64xf32>, vector<64x64xf32>, vector<8x64xf32> -> vector<8x64xf32>
    %c4_183 = arith.constant 4 : index
    %c0_184 = arith.constant 0 : index
    %c0_185 = arith.constant 0 : index
    %178 = vector.load %arg9[%c4_183, %c0_184, %c0_185] : memref<9x16x8xf32, #tpu.memory_space<vmem>>, vector<1x16x8xf32>
    %179 = vector.shape_cast %178 : vector<1x16x8xf32> to vector<16x8xf32>
    %cst_186 = arith.constant dense<0.000000e+00> : vector<16x64xf32>
    %180 = tpu.matmul %179, %177, %cst_186 {dimension_numbers = #tpu.dot_dimension_numbers<[1], [0], [0], [1], [0, 0, 1, 1], [], []>} : vector<16x8xf32>, vector<8x64xf32>, vector<16x64xf32> -> vector<16x64xf32>
    %181 = arith.addf %174, %180 : vector<16x64xf32>
    %c5_187 = arith.constant 5 : index
    %c0_188 = arith.constant 0 : index
    %c0_189 = arith.constant 0 : index
    %182 = vector.load %arg8[%c5_187, %c0_188, %c0_189] : memref<9x64x64xf32, #tpu.memory_space<vmem>>, vector<1x64x64xf32>
    %183 = vector.shape_cast %182 : vector<1x64x64xf32> to vector<64x64xf32>
    %cst_190 = arith.constant dense<0.000000e+00> : vector<8x64xf32>
    %184 = tpu.matmul %143, %183, %cst_190 {dimension_numbers = #tpu.dot_dimension_numbers<[1], [0], [0], [1], [0, 0, 1, 1], [], []>} : vector<8x64xf32>, vector<64x64xf32>, vector<8x64xf32> -> vector<8x64xf32>
    %c5_191 = arith.constant 5 : index
    %c0_192 = arith.constant 0 : index
    %c0_193 = arith.constant 0 : index
    %185 = vector.load %arg9[%c5_191, %c0_192, %c0_193] : memref<9x16x8xf32, #tpu.memory_space<vmem>>, vector<1x16x8xf32>
    %186 = vector.shape_cast %185 : vector<1x16x8xf32> to vector<16x8xf32>
    %cst_194 = arith.constant dense<0.000000e+00> : vector<16x64xf32>
    %187 = tpu.matmul %186, %184, %cst_194 {dimension_numbers = #tpu.dot_dimension_numbers<[1], [0], [0], [1], [0, 0, 1, 1], [], []>} : vector<16x8xf32>, vector<8x64xf32>, vector<16x64xf32> -> vector<16x64xf32>
    %188 = arith.addf %181, %187 : vector<16x64xf32>
    %c6_195 = arith.constant 6 : index
    %c0_196 = arith.constant 0 : index
    %c0_197 = arith.constant 0 : index
    %189 = vector.load %arg8[%c6_195, %c0_196, %c0_197] : memref<9x64x64xf32, #tpu.memory_space<vmem>>, vector<1x64x64xf32>
    %190 = vector.shape_cast %189 : vector<1x64x64xf32> to vector<64x64xf32>
    %cst_198 = arith.constant dense<0.000000e+00> : vector<8x64xf32>
    %191 = tpu.matmul %143, %190, %cst_198 {dimension_numbers = #tpu.dot_dimension_numbers<[1], [0], [0], [1], [0, 0, 1, 1], [], []>} : vector<8x64xf32>, vector<64x64xf32>, vector<8x64xf32> -> vector<8x64xf32>
    %c6_199 = arith.constant 6 : index
    %c0_200 = arith.constant 0 : index
    %c0_201 = arith.constant 0 : index
    %192 = vector.load %arg9[%c6_199, %c0_200, %c0_201] : memref<9x16x8xf32, #tpu.memory_space<vmem>>, vector<1x16x8xf32>
    %193 = vector.shape_cast %192 : vector<1x16x8xf32> to vector<16x8xf32>
    %cst_202 = arith.constant dense<0.000000e+00> : vector<16x64xf32>
    %194 = tpu.matmul %193, %191, %cst_202 {dimension_numbers = #tpu.dot_dimension_numbers<[1], [0], [0], [1], [0, 0, 1, 1], [], []>} : vector<16x8xf32>, vector<8x64xf32>, vector<16x64xf32> -> vector<16x64xf32>
    %195 = arith.addf %188, %194 : vector<16x64xf32>
    %c7_203 = arith.constant 7 : index
    %c0_204 = arith.constant 0 : index
    %c0_205 = arith.constant 0 : index
    %196 = vector.load %arg8[%c7_203, %c0_204, %c0_205] : memref<9x64x64xf32, #tpu.memory_space<vmem>>, vector<1x64x64xf32>
    %197 = vector.shape_cast %196 : vector<1x64x64xf32> to vector<64x64xf32>
    %cst_206 = arith.constant dense<0.000000e+00> : vector<8x64xf32>
    %198 = tpu.matmul %143, %197, %cst_206 {dimension_numbers = #tpu.dot_dimension_numbers<[1], [0], [0], [1], [0, 0, 1, 1], [], []>} : vector<8x64xf32>, vector<64x64xf32>, vector<8x64xf32> -> vector<8x64xf32>
    %c7_207 = arith.constant 7 : index
    %c0_208 = arith.constant 0 : index
    %c0_209 = arith.constant 0 : index
    %199 = vector.load %arg9[%c7_207, %c0_208, %c0_209] : memref<9x16x8xf32, #tpu.memory_space<vmem>>, vector<1x16x8xf32>
    %200 = vector.shape_cast %199 : vector<1x16x8xf32> to vector<16x8xf32>
    %cst_210 = arith.constant dense<0.000000e+00> : vector<16x64xf32>
    %201 = tpu.matmul %200, %198, %cst_210 {dimension_numbers = #tpu.dot_dimension_numbers<[1], [0], [0], [1], [0, 0, 1, 1], [], []>} : vector<16x8xf32>, vector<8x64xf32>, vector<16x64xf32> -> vector<16x64xf32>
    %202 = arith.addf %195, %201 : vector<16x64xf32>
    %c8_211 = arith.constant 8 : index
    %c0_212 = arith.constant 0 : index
    %c0_213 = arith.constant 0 : index
    %203 = vector.load %arg8[%c8_211, %c0_212, %c0_213] : memref<9x64x64xf32, #tpu.memory_space<vmem>>, vector<1x64x64xf32>
    %204 = vector.shape_cast %203 : vector<1x64x64xf32> to vector<64x64xf32>
    %cst_214 = arith.constant dense<0.000000e+00> : vector<8x64xf32>
    %205 = tpu.matmul %143, %204, %cst_214 {dimension_numbers = #tpu.dot_dimension_numbers<[1], [0], [0], [1], [0, 0, 1, 1], [], []>} : vector<8x64xf32>, vector<64x64xf32>, vector<8x64xf32> -> vector<8x64xf32>
    %c8_215 = arith.constant 8 : index
    %c0_216 = arith.constant 0 : index
    %c0_217 = arith.constant 0 : index
    %206 = vector.load %arg9[%c8_215, %c0_216, %c0_217] : memref<9x16x8xf32, #tpu.memory_space<vmem>>, vector<1x16x8xf32>
    %207 = vector.shape_cast %206 : vector<1x16x8xf32> to vector<16x8xf32>
    %cst_218 = arith.constant dense<0.000000e+00> : vector<16x64xf32>
    %208 = tpu.matmul %207, %205, %cst_218 {dimension_numbers = #tpu.dot_dimension_numbers<[1], [0], [0], [1], [0, 0, 1, 1], [], []>} : vector<16x8xf32>, vector<8x64xf32>, vector<16x64xf32> -> vector<16x64xf32>
    %209 = arith.addf %202, %208 : vector<16x64xf32>
    %cst_219 = arith.constant 0.000000e+00 : f32
    %210 = vector.broadcast %cst_219 : f32 to vector<16x64xf32>
    %211 = arith.cmpf oge, %209, %210 : vector<16x64xf32>
    %cst_220 = arith.constant 2.000000e-01 : f32
    %212 = vector.broadcast %cst_220 : f32 to vector<16x64xf32>
    %213 = arith.mulf %212, %209 : vector<16x64xf32>
    %214 = arith.select %211, %209, %213 : vector<16x64xi1>, vector<16x64xf32>
    %c0_221 = arith.constant 0 : index
    %c0_222 = arith.constant 0 : index
    %215 = vector.load %arg13[%c0_221, %c0_222] : memref<16x1xf32, #tpu.memory_space<vmem>>, vector<16x1xf32>
    %216 = vector.shape_cast %215 : vector<16x1xf32> to vector<16x1xf32>
    %217 = vector.broadcast %216 : vector<16x1xf32> to vector<16x16xf32>
    %c0_223 = arith.constant 0 : index
    %c0_224 = arith.constant 0 : index
    %c0_225 = arith.constant 0 : index
    %218 = vector.load %arg11[%c0_223, %c0_224, %c0_225] : memref<9x64x16xf32, #tpu.memory_space<vmem>>, vector<1x64x16xf32>
    %219 = vector.shape_cast %218 : vector<1x64x16xf32> to vector<64x16xf32>
    %cst_226 = arith.constant dense<0.000000e+00> : vector<16x16xf32>
    %220 = tpu.matmul %214, %219, %cst_226 {dimension_numbers = #tpu.dot_dimension_numbers<[1], [0], [0], [1], [0, 0, 1, 1], [], []>} : vector<16x64xf32>, vector<64x16xf32>, vector<16x16xf32> -> vector<16x16xf32>
    %c0_227 = arith.constant 0 : index
    %c0_228 = arith.constant 0 : index
    %c0_229 = arith.constant 0 : index
    %221 = vector.load %arg12[%c0_227, %c0_228, %c0_229] : memref<9x16x16xf32, #tpu.memory_space<vmem>>, vector<1x16x16xf32>
    %222 = vector.shape_cast %221 : vector<1x16x16xf32> to vector<16x16xf32>
    %cst_230 = arith.constant dense<0.000000e+00> : vector<16x16xf32>
    %223 = tpu.matmul %222, %220, %cst_230 {dimension_numbers = #tpu.dot_dimension_numbers<[1], [0], [0], [1], [0, 0, 1, 1], [], []>} : vector<16x16xf32>, vector<16x16xf32>, vector<16x16xf32> -> vector<16x16xf32>
    %224 = arith.addf %217, %223 : vector<16x16xf32>
    %c1_231 = arith.constant 1 : index
    %c0_232 = arith.constant 0 : index
    %c0_233 = arith.constant 0 : index
    %225 = vector.load %arg11[%c1_231, %c0_232, %c0_233] : memref<9x64x16xf32, #tpu.memory_space<vmem>>, vector<1x64x16xf32>
    %226 = vector.shape_cast %225 : vector<1x64x16xf32> to vector<64x16xf32>
    %cst_234 = arith.constant dense<0.000000e+00> : vector<16x16xf32>
    %227 = tpu.matmul %214, %226, %cst_234 {dimension_numbers = #tpu.dot_dimension_numbers<[1], [0], [0], [1], [0, 0, 1, 1], [], []>} : vector<16x64xf32>, vector<64x16xf32>, vector<16x16xf32> -> vector<16x16xf32>
    %c1_235 = arith.constant 1 : index
    %c0_236 = arith.constant 0 : index
    %c0_237 = arith.constant 0 : index
    %228 = vector.load %arg12[%c1_235, %c0_236, %c0_237] : memref<9x16x16xf32, #tpu.memory_space<vmem>>, vector<1x16x16xf32>
    %229 = vector.shape_cast %228 : vector<1x16x16xf32> to vector<16x16xf32>
    %cst_238 = arith.constant dense<0.000000e+00> : vector<16x16xf32>
    %230 = tpu.matmul %229, %227, %cst_238 {dimension_numbers = #tpu.dot_dimension_numbers<[1], [0], [0], [1], [0, 0, 1, 1], [], []>} : vector<16x16xf32>, vector<16x16xf32>, vector<16x16xf32> -> vector<16x16xf32>
    %231 = arith.addf %224, %230 : vector<16x16xf32>
    %c2_239 = arith.constant 2 : index
    %c0_240 = arith.constant 0 : index
    %c0_241 = arith.constant 0 : index
    %232 = vector.load %arg11[%c2_239, %c0_240, %c0_241] : memref<9x64x16xf32, #tpu.memory_space<vmem>>, vector<1x64x16xf32>
    %233 = vector.shape_cast %232 : vector<1x64x16xf32> to vector<64x16xf32>
    %cst_242 = arith.constant dense<0.000000e+00> : vector<16x16xf32>
    %234 = tpu.matmul %214, %233, %cst_242 {dimension_numbers = #tpu.dot_dimension_numbers<[1], [0], [0], [1], [0, 0, 1, 1], [], []>} : vector<16x64xf32>, vector<64x16xf32>, vector<16x16xf32> -> vector<16x16xf32>
    %c2_243 = arith.constant 2 : index
    %c0_244 = arith.constant 0 : index
    %c0_245 = arith.constant 0 : index
    %235 = vector.load %arg12[%c2_243, %c0_244, %c0_245] : memref<9x16x16xf32, #tpu.memory_space<vmem>>, vector<1x16x16xf32>
    %236 = vector.shape_cast %235 : vector<1x16x16xf32> to vector<16x16xf32>
    %cst_246 = arith.constant dense<0.000000e+00> : vector<16x16xf32>
    %237 = tpu.matmul %236, %234, %cst_246 {dimension_numbers = #tpu.dot_dimension_numbers<[1], [0], [0], [1], [0, 0, 1, 1], [], []>} : vector<16x16xf32>, vector<16x16xf32>, vector<16x16xf32> -> vector<16x16xf32>
    %238 = arith.addf %231, %237 : vector<16x16xf32>
    %c3_247 = arith.constant 3 : index
    %c0_248 = arith.constant 0 : index
    %c0_249 = arith.constant 0 : index
    %239 = vector.load %arg11[%c3_247, %c0_248, %c0_249] : memref<9x64x16xf32, #tpu.memory_space<vmem>>, vector<1x64x16xf32>
    %240 = vector.shape_cast %239 : vector<1x64x16xf32> to vector<64x16xf32>
    %cst_250 = arith.constant dense<0.000000e+00> : vector<16x16xf32>
    %241 = tpu.matmul %214, %240, %cst_250 {dimension_numbers = #tpu.dot_dimension_numbers<[1], [0], [0], [1], [0, 0, 1, 1], [], []>} : vector<16x64xf32>, vector<64x16xf32>, vector<16x16xf32> -> vector<16x16xf32>
    %c3_251 = arith.constant 3 : index
    %c0_252 = arith.constant 0 : index
    %c0_253 = arith.constant 0 : index
    %242 = vector.load %arg12[%c3_251, %c0_252, %c0_253] : memref<9x16x16xf32, #tpu.memory_space<vmem>>, vector<1x16x16xf32>
    %243 = vector.shape_cast %242 : vector<1x16x16xf32> to vector<16x16xf32>
    %cst_254 = arith.constant dense<0.000000e+00> : vector<16x16xf32>
    %244 = tpu.matmul %243, %241, %cst_254 {dimension_numbers = #tpu.dot_dimension_numbers<[1], [0], [0], [1], [0, 0, 1, 1], [], []>} : vector<16x16xf32>, vector<16x16xf32>, vector<16x16xf32> -> vector<16x16xf32>
    %245 = arith.addf %238, %244 : vector<16x16xf32>
    %c4_255 = arith.constant 4 : index
    %c0_256 = arith.constant 0 : index
    %c0_257 = arith.constant 0 : index
    %246 = vector.load %arg11[%c4_255, %c0_256, %c0_257] : memref<9x64x16xf32, #tpu.memory_space<vmem>>, vector<1x64x16xf32>
    %247 = vector.shape_cast %246 : vector<1x64x16xf32> to vector<64x16xf32>
    %cst_258 = arith.constant dense<0.000000e+00> : vector<16x16xf32>
    %248 = tpu.matmul %214, %247, %cst_258 {dimension_numbers = #tpu.dot_dimension_numbers<[1], [0], [0], [1], [0, 0, 1, 1], [], []>} : vector<16x64xf32>, vector<64x16xf32>, vector<16x16xf32> -> vector<16x16xf32>
    %c4_259 = arith.constant 4 : index
    %c0_260 = arith.constant 0 : index
    %c0_261 = arith.constant 0 : index
    %249 = vector.load %arg12[%c4_259, %c0_260, %c0_261] : memref<9x16x16xf32, #tpu.memory_space<vmem>>, vector<1x16x16xf32>
    %250 = vector.shape_cast %249 : vector<1x16x16xf32> to vector<16x16xf32>
    %cst_262 = arith.constant dense<0.000000e+00> : vector<16x16xf32>
    %251 = tpu.matmul %250, %248, %cst_262 {dimension_numbers = #tpu.dot_dimension_numbers<[1], [0], [0], [1], [0, 0, 1, 1], [], []>} : vector<16x16xf32>, vector<16x16xf32>, vector<16x16xf32> -> vector<16x16xf32>
    %252 = arith.addf %245, %251 : vector<16x16xf32>
    %c5_263 = arith.constant 5 : index
    %c0_264 = arith.constant 0 : index
    %c0_265 = arith.constant 0 : index
    %253 = vector.load %arg11[%c5_263, %c0_264, %c0_265] : memref<9x64x16xf32, #tpu.memory_space<vmem>>, vector<1x64x16xf32>
    %254 = vector.shape_cast %253 : vector<1x64x16xf32> to vector<64x16xf32>
    %cst_266 = arith.constant dense<0.000000e+00> : vector<16x16xf32>
    %255 = tpu.matmul %214, %254, %cst_266 {dimension_numbers = #tpu.dot_dimension_numbers<[1], [0], [0], [1], [0, 0, 1, 1], [], []>} : vector<16x64xf32>, vector<64x16xf32>, vector<16x16xf32> -> vector<16x16xf32>
    %c5_267 = arith.constant 5 : index
    %c0_268 = arith.constant 0 : index
    %c0_269 = arith.constant 0 : index
    %256 = vector.load %arg12[%c5_267, %c0_268, %c0_269] : memref<9x16x16xf32, #tpu.memory_space<vmem>>, vector<1x16x16xf32>
    %257 = vector.shape_cast %256 : vector<1x16x16xf32> to vector<16x16xf32>
    %cst_270 = arith.constant dense<0.000000e+00> : vector<16x16xf32>
    %258 = tpu.matmul %257, %255, %cst_270 {dimension_numbers = #tpu.dot_dimension_numbers<[1], [0], [0], [1], [0, 0, 1, 1], [], []>} : vector<16x16xf32>, vector<16x16xf32>, vector<16x16xf32> -> vector<16x16xf32>
    %259 = arith.addf %252, %258 : vector<16x16xf32>
    %c6_271 = arith.constant 6 : index
    %c0_272 = arith.constant 0 : index
    %c0_273 = arith.constant 0 : index
    %260 = vector.load %arg11[%c6_271, %c0_272, %c0_273] : memref<9x64x16xf32, #tpu.memory_space<vmem>>, vector<1x64x16xf32>
    %261 = vector.shape_cast %260 : vector<1x64x16xf32> to vector<64x16xf32>
    %cst_274 = arith.constant dense<0.000000e+00> : vector<16x16xf32>
    %262 = tpu.matmul %214, %261, %cst_274 {dimension_numbers = #tpu.dot_dimension_numbers<[1], [0], [0], [1], [0, 0, 1, 1], [], []>} : vector<16x64xf32>, vector<64x16xf32>, vector<16x16xf32> -> vector<16x16xf32>
    %c6_275 = arith.constant 6 : index
    %c0_276 = arith.constant 0 : index
    %c0_277 = arith.constant 0 : index
    %263 = vector.load %arg12[%c6_275, %c0_276, %c0_277] : memref<9x16x16xf32, #tpu.memory_space<vmem>>, vector<1x16x16xf32>
    %264 = vector.shape_cast %263 : vector<1x16x16xf32> to vector<16x16xf32>
    %cst_278 = arith.constant dense<0.000000e+00> : vector<16x16xf32>
    %265 = tpu.matmul %264, %262, %cst_278 {dimension_numbers = #tpu.dot_dimension_numbers<[1], [0], [0], [1], [0, 0, 1, 1], [], []>} : vector<16x16xf32>, vector<16x16xf32>, vector<16x16xf32> -> vector<16x16xf32>
    %266 = arith.addf %259, %265 : vector<16x16xf32>
    %c7_279 = arith.constant 7 : index
    %c0_280 = arith.constant 0 : index
    %c0_281 = arith.constant 0 : index
    %267 = vector.load %arg11[%c7_279, %c0_280, %c0_281] : memref<9x64x16xf32, #tpu.memory_space<vmem>>, vector<1x64x16xf32>
    %268 = vector.shape_cast %267 : vector<1x64x16xf32> to vector<64x16xf32>
    %cst_282 = arith.constant dense<0.000000e+00> : vector<16x16xf32>
    %269 = tpu.matmul %214, %268, %cst_282 {dimension_numbers = #tpu.dot_dimension_numbers<[1], [0], [0], [1], [0, 0, 1, 1], [], []>} : vector<16x64xf32>, vector<64x16xf32>, vector<16x16xf32> -> vector<16x16xf32>
    %c7_283 = arith.constant 7 : index
    %c0_284 = arith.constant 0 : index
    %c0_285 = arith.constant 0 : index
    %270 = vector.load %arg12[%c7_283, %c0_284, %c0_285] : memref<9x16x16xf32, #tpu.memory_space<vmem>>, vector<1x16x16xf32>
    %271 = vector.shape_cast %270 : vector<1x16x16xf32> to vector<16x16xf32>
    %cst_286 = arith.constant dense<0.000000e+00> : vector<16x16xf32>
    %272 = tpu.matmul %271, %269, %cst_286 {dimension_numbers = #tpu.dot_dimension_numbers<[1], [0], [0], [1], [0, 0, 1, 1], [], []>} : vector<16x16xf32>, vector<16x16xf32>, vector<16x16xf32> -> vector<16x16xf32>
    %273 = arith.addf %266, %272 : vector<16x16xf32>
    %c8_287 = arith.constant 8 : index
    %c0_288 = arith.constant 0 : index
    %c0_289 = arith.constant 0 : index
    %274 = vector.load %arg11[%c8_287, %c0_288, %c0_289] : memref<9x64x16xf32, #tpu.memory_space<vmem>>, vector<1x64x16xf32>
    %275 = vector.shape_cast %274 : vector<1x64x16xf32> to vector<64x16xf32>
    %cst_290 = arith.constant dense<0.000000e+00> : vector<16x16xf32>
    %276 = tpu.matmul %214, %275, %cst_290 {dimension_numbers = #tpu.dot_dimension_numbers<[1], [0], [0], [1], [0, 0, 1, 1], [], []>} : vector<16x64xf32>, vector<64x16xf32>, vector<16x16xf32> -> vector<16x16xf32>
    %c8_291 = arith.constant 8 : index
    %c0_292 = arith.constant 0 : index
    %c0_293 = arith.constant 0 : index
    %277 = vector.load %arg12[%c8_291, %c0_292, %c0_293] : memref<9x16x16xf32, #tpu.memory_space<vmem>>, vector<1x16x16xf32>
    %278 = vector.shape_cast %277 : vector<1x16x16xf32> to vector<16x16xf32>
    %cst_294 = arith.constant dense<0.000000e+00> : vector<16x16xf32>
    %279 = tpu.matmul %278, %276, %cst_294 {dimension_numbers = #tpu.dot_dimension_numbers<[1], [0], [0], [1], [0, 0, 1, 1], [], []>} : vector<16x16xf32>, vector<16x16xf32>, vector<16x16xf32> -> vector<16x16xf32>
    %280 = arith.addf %273, %279 : vector<16x16xf32>
    %cst_295 = arith.constant 0.000000e+00 : f32
    %281 = vector.broadcast %cst_295 : f32 to vector<16x16xf32>
    %282 = arith.cmpf oge, %280, %281 : vector<16x16xf32>
    %cst_296 = arith.constant 2.000000e-01 : f32
    %283 = vector.broadcast %cst_296 : f32 to vector<16x16xf32>
    %284 = arith.mulf %283, %280 : vector<16x16xf32>
    %285 = arith.select %282, %280, %284 : vector<16x16xi1>, vector<16x16xf32>
    %c0_297 = arith.constant 0 : index
    %c0_298 = arith.constant 0 : index
    %286 = vector.load %arg16[%c0_297, %c0_298] : memref<1x1xf32, #tpu.memory_space<vmem>>, vector<1x1xf32>
    %287 = vector.shape_cast %286 : vector<1x1xf32> to vector<1x1xf32>
    %288 = vector.broadcast %287 : vector<1x1xf32> to vector<1x16xf32>
    %c0_299 = arith.constant 0 : index
    %c0_300 = arith.constant 0 : index
    %c0_301 = arith.constant 0 : index
    %289 = vector.load %arg14[%c0_299, %c0_300, %c0_301] : memref<9x16x16xf32, #tpu.memory_space<vmem>>, vector<1x16x16xf32>
    %290 = vector.shape_cast %289 : vector<1x16x16xf32> to vector<16x16xf32>
    %cst_302 = arith.constant dense<0.000000e+00> : vector<16x16xf32>
    %291 = tpu.matmul %285, %290, %cst_302 {dimension_numbers = #tpu.dot_dimension_numbers<[1], [0], [0], [1], [0, 0, 1, 1], [], []>} : vector<16x16xf32>, vector<16x16xf32>, vector<16x16xf32> -> vector<16x16xf32>
    %c0_303 = arith.constant 0 : index
    %c0_304 = arith.constant 0 : index
    %c0_305 = arith.constant 0 : index
    %292 = vector.load %arg15[%c0_303, %c0_304, %c0_305] : memref<9x1x16xf32, #tpu.memory_space<vmem>>, vector<1x1x16xf32>
    %293 = vector.shape_cast %292 : vector<1x1x16xf32> to vector<1x16xf32>
    %cst_306 = arith.constant dense<0.000000e+00> : vector<1x16xf32>
    %294 = tpu.matmul %293, %291, %cst_306 {dimension_numbers = #tpu.dot_dimension_numbers<[1], [0], [0], [1], [0, 0, 1, 1], [], []>} : vector<1x16xf32>, vector<16x16xf32>, vector<1x16xf32> -> vector<1x16xf32>
    %295 = arith.addf %288, %294 : vector<1x16xf32>
    %c1_307 = arith.constant 1 : index
    %c0_308 = arith.constant 0 : index
    %c0_309 = arith.constant 0 : index
    %296 = vector.load %arg14[%c1_307, %c0_308, %c0_309] : memref<9x16x16xf32, #tpu.memory_space<vmem>>, vector<1x16x16xf32>
    %297 = vector.shape_cast %296 : vector<1x16x16xf32> to vector<16x16xf32>
    %cst_310 = arith.constant dense<0.000000e+00> : vector<16x16xf32>
    %298 = tpu.matmul %285, %297, %cst_310 {dimension_numbers = #tpu.dot_dimension_numbers<[1], [0], [0], [1], [0, 0, 1, 1], [], []>} : vector<16x16xf32>, vector<16x16xf32>, vector<16x16xf32> -> vector<16x16xf32>
    %c1_311 = arith.constant 1 : index
    %c0_312 = arith.constant 0 : index
    %c0_313 = arith.constant 0 : index
    %299 = vector.load %arg15[%c1_311, %c0_312, %c0_313] : memref<9x1x16xf32, #tpu.memory_space<vmem>>, vector<1x1x16xf32>
    %300 = vector.shape_cast %299 : vector<1x1x16xf32> to vector<1x16xf32>
    %cst_314 = arith.constant dense<0.000000e+00> : vector<1x16xf32>
    %301 = tpu.matmul %300, %298, %cst_314 {dimension_numbers = #tpu.dot_dimension_numbers<[1], [0], [0], [1], [0, 0, 1, 1], [], []>} : vector<1x16xf32>, vector<16x16xf32>, vector<1x16xf32> -> vector<1x16xf32>
    %302 = arith.addf %295, %301 : vector<1x16xf32>
    %c2_315 = arith.constant 2 : index
    %c0_316 = arith.constant 0 : index
    %c0_317 = arith.constant 0 : index
    %303 = vector.load %arg14[%c2_315, %c0_316, %c0_317] : memref<9x16x16xf32, #tpu.memory_space<vmem>>, vector<1x16x16xf32>
    %304 = vector.shape_cast %303 : vector<1x16x16xf32> to vector<16x16xf32>
    %cst_318 = arith.constant dense<0.000000e+00> : vector<16x16xf32>
    %305 = tpu.matmul %285, %304, %cst_318 {dimension_numbers = #tpu.dot_dimension_numbers<[1], [0], [0], [1], [0, 0, 1, 1], [], []>} : vector<16x16xf32>, vector<16x16xf32>, vector<16x16xf32> -> vector<16x16xf32>
    %c2_319 = arith.constant 2 : index
    %c0_320 = arith.constant 0 : index
    %c0_321 = arith.constant 0 : index
    %306 = vector.load %arg15[%c2_319, %c0_320, %c0_321] : memref<9x1x16xf32, #tpu.memory_space<vmem>>, vector<1x1x16xf32>
    %307 = vector.shape_cast %306 : vector<1x1x16xf32> to vector<1x16xf32>
    %cst_322 = arith.constant dense<0.000000e+00> : vector<1x16xf32>
    %308 = tpu.matmul %307, %305, %cst_322 {dimension_numbers = #tpu.dot_dimension_numbers<[1], [0], [0], [1], [0, 0, 1, 1], [], []>} : vector<1x16xf32>, vector<16x16xf32>, vector<1x16xf32> -> vector<1x16xf32>
    %309 = arith.addf %302, %308 : vector<1x16xf32>
    %c3_323 = arith.constant 3 : index
    %c0_324 = arith.constant 0 : index
    %c0_325 = arith.constant 0 : index
    %310 = vector.load %arg14[%c3_323, %c0_324, %c0_325] : memref<9x16x16xf32, #tpu.memory_space<vmem>>, vector<1x16x16xf32>
    %311 = vector.shape_cast %310 : vector<1x16x16xf32> to vector<16x16xf32>
    %cst_326 = arith.constant dense<0.000000e+00> : vector<16x16xf32>
    %312 = tpu.matmul %285, %311, %cst_326 {dimension_numbers = #tpu.dot_dimension_numbers<[1], [0], [0], [1], [0, 0, 1, 1], [], []>} : vector<16x16xf32>, vector<16x16xf32>, vector<16x16xf32> -> vector<16x16xf32>
    %c3_327 = arith.constant 3 : index
    %c0_328 = arith.constant 0 : index
    %c0_329 = arith.constant 0 : index
    %313 = vector.load %arg15[%c3_327, %c0_328, %c0_329] : memref<9x1x16xf32, #tpu.memory_space<vmem>>, vector<1x1x16xf32>
    %314 = vector.shape_cast %313 : vector<1x1x16xf32> to vector<1x16xf32>
    %cst_330 = arith.constant dense<0.000000e+00> : vector<1x16xf32>
    %315 = tpu.matmul %314, %312, %cst_330 {dimension_numbers = #tpu.dot_dimension_numbers<[1], [0], [0], [1], [0, 0, 1, 1], [], []>} : vector<1x16xf32>, vector<16x16xf32>, vector<1x16xf32> -> vector<1x16xf32>
    %316 = arith.addf %309, %315 : vector<1x16xf32>
    %c4_331 = arith.constant 4 : index
    %c0_332 = arith.constant 0 : index
    %c0_333 = arith.constant 0 : index
    %317 = vector.load %arg14[%c4_331, %c0_332, %c0_333] : memref<9x16x16xf32, #tpu.memory_space<vmem>>, vector<1x16x16xf32>
    %318 = vector.shape_cast %317 : vector<1x16x16xf32> to vector<16x16xf32>
    %cst_334 = arith.constant dense<0.000000e+00> : vector<16x16xf32>
    %319 = tpu.matmul %285, %318, %cst_334 {dimension_numbers = #tpu.dot_dimension_numbers<[1], [0], [0], [1], [0, 0, 1, 1], [], []>} : vector<16x16xf32>, vector<16x16xf32>, vector<16x16xf32> -> vector<16x16xf32>
    %c4_335 = arith.constant 4 : index
    %c0_336 = arith.constant 0 : index
    %c0_337 = arith.constant 0 : index
    %320 = vector.load %arg15[%c4_335, %c0_336, %c0_337] : memref<9x1x16xf32, #tpu.memory_space<vmem>>, vector<1x1x16xf32>
    %321 = vector.shape_cast %320 : vector<1x1x16xf32> to vector<1x16xf32>
    %cst_338 = arith.constant dense<0.000000e+00> : vector<1x16xf32>
    %322 = tpu.matmul %321, %319, %cst_338 {dimension_numbers = #tpu.dot_dimension_numbers<[1], [0], [0], [1], [0, 0, 1, 1], [], []>} : vector<1x16xf32>, vector<16x16xf32>, vector<1x16xf32> -> vector<1x16xf32>
    %323 = arith.addf %316, %322 : vector<1x16xf32>
    %c5_339 = arith.constant 5 : index
    %c0_340 = arith.constant 0 : index
    %c0_341 = arith.constant 0 : index
    %324 = vector.load %arg14[%c5_339, %c0_340, %c0_341] : memref<9x16x16xf32, #tpu.memory_space<vmem>>, vector<1x16x16xf32>
    %325 = vector.shape_cast %324 : vector<1x16x16xf32> to vector<16x16xf32>
    %cst_342 = arith.constant dense<0.000000e+00> : vector<16x16xf32>
    %326 = tpu.matmul %285, %325, %cst_342 {dimension_numbers = #tpu.dot_dimension_numbers<[1], [0], [0], [1], [0, 0, 1, 1], [], []>} : vector<16x16xf32>, vector<16x16xf32>, vector<16x16xf32> -> vector<16x16xf32>
    %c5_343 = arith.constant 5 : index
    %c0_344 = arith.constant 0 : index
    %c0_345 = arith.constant 0 : index
    %327 = vector.load %arg15[%c5_343, %c0_344, %c0_345] : memref<9x1x16xf32, #tpu.memory_space<vmem>>, vector<1x1x16xf32>
    %328 = vector.shape_cast %327 : vector<1x1x16xf32> to vector<1x16xf32>
    %cst_346 = arith.constant dense<0.000000e+00> : vector<1x16xf32>
    %329 = tpu.matmul %328, %326, %cst_346 {dimension_numbers = #tpu.dot_dimension_numbers<[1], [0], [0], [1], [0, 0, 1, 1], [], []>} : vector<1x16xf32>, vector<16x16xf32>, vector<1x16xf32> -> vector<1x16xf32>
    %330 = arith.addf %323, %329 : vector<1x16xf32>
    %c6_347 = arith.constant 6 : index
    %c0_348 = arith.constant 0 : index
    %c0_349 = arith.constant 0 : index
    %331 = vector.load %arg14[%c6_347, %c0_348, %c0_349] : memref<9x16x16xf32, #tpu.memory_space<vmem>>, vector<1x16x16xf32>
    %332 = vector.shape_cast %331 : vector<1x16x16xf32> to vector<16x16xf32>
    %cst_350 = arith.constant dense<0.000000e+00> : vector<16x16xf32>
    %333 = tpu.matmul %285, %332, %cst_350 {dimension_numbers = #tpu.dot_dimension_numbers<[1], [0], [0], [1], [0, 0, 1, 1], [], []>} : vector<16x16xf32>, vector<16x16xf32>, vector<16x16xf32> -> vector<16x16xf32>
    %c6_351 = arith.constant 6 : index
    %c0_352 = arith.constant 0 : index
    %c0_353 = arith.constant 0 : index
    %334 = vector.load %arg15[%c6_351, %c0_352, %c0_353] : memref<9x1x16xf32, #tpu.memory_space<vmem>>, vector<1x1x16xf32>
    %335 = vector.shape_cast %334 : vector<1x1x16xf32> to vector<1x16xf32>
    %cst_354 = arith.constant dense<0.000000e+00> : vector<1x16xf32>
    %336 = tpu.matmul %335, %333, %cst_354 {dimension_numbers = #tpu.dot_dimension_numbers<[1], [0], [0], [1], [0, 0, 1, 1], [], []>} : vector<1x16xf32>, vector<16x16xf32>, vector<1x16xf32> -> vector<1x16xf32>
    %337 = arith.addf %330, %336 : vector<1x16xf32>
    %c7_355 = arith.constant 7 : index
    %c0_356 = arith.constant 0 : index
    %c0_357 = arith.constant 0 : index
    %338 = vector.load %arg14[%c7_355, %c0_356, %c0_357] : memref<9x16x16xf32, #tpu.memory_space<vmem>>, vector<1x16x16xf32>
    %339 = vector.shape_cast %338 : vector<1x16x16xf32> to vector<16x16xf32>
    %cst_358 = arith.constant dense<0.000000e+00> : vector<16x16xf32>
    %340 = tpu.matmul %285, %339, %cst_358 {dimension_numbers = #tpu.dot_dimension_numbers<[1], [0], [0], [1], [0, 0, 1, 1], [], []>} : vector<16x16xf32>, vector<16x16xf32>, vector<16x16xf32> -> vector<16x16xf32>
    %c7_359 = arith.constant 7 : index
    %c0_360 = arith.constant 0 : index
    %c0_361 = arith.constant 0 : index
    %341 = vector.load %arg15[%c7_359, %c0_360, %c0_361] : memref<9x1x16xf32, #tpu.memory_space<vmem>>, vector<1x1x16xf32>
    %342 = vector.shape_cast %341 : vector<1x1x16xf32> to vector<1x16xf32>
    %cst_362 = arith.constant dense<0.000000e+00> : vector<1x16xf32>
    %343 = tpu.matmul %342, %340, %cst_362 {dimension_numbers = #tpu.dot_dimension_numbers<[1], [0], [0], [1], [0, 0, 1, 1], [], []>} : vector<1x16xf32>, vector<16x16xf32>, vector<1x16xf32> -> vector<1x16xf32>
    %344 = arith.addf %337, %343 : vector<1x16xf32>
    %c8_363 = arith.constant 8 : index
    %c0_364 = arith.constant 0 : index
    %c0_365 = arith.constant 0 : index
    %345 = vector.load %arg14[%c8_363, %c0_364, %c0_365] : memref<9x16x16xf32, #tpu.memory_space<vmem>>, vector<1x16x16xf32>
    %346 = vector.shape_cast %345 : vector<1x16x16xf32> to vector<16x16xf32>
    %cst_366 = arith.constant dense<0.000000e+00> : vector<16x16xf32>
    %347 = tpu.matmul %285, %346, %cst_366 {dimension_numbers = #tpu.dot_dimension_numbers<[1], [0], [0], [1], [0, 0, 1, 1], [], []>} : vector<16x16xf32>, vector<16x16xf32>, vector<16x16xf32> -> vector<16x16xf32>
    %c8_367 = arith.constant 8 : index
    %c0_368 = arith.constant 0 : index
    %c0_369 = arith.constant 0 : index
    %348 = vector.load %arg15[%c8_367, %c0_368, %c0_369] : memref<9x1x16xf32, #tpu.memory_space<vmem>>, vector<1x1x16xf32>
    %349 = vector.shape_cast %348 : vector<1x1x16xf32> to vector<1x16xf32>
    %cst_370 = arith.constant dense<0.000000e+00> : vector<1x16xf32>
    %350 = tpu.matmul %349, %347, %cst_370 {dimension_numbers = #tpu.dot_dimension_numbers<[1], [0], [0], [1], [0, 0, 1, 1], [], []>} : vector<1x16xf32>, vector<16x16xf32>, vector<1x16xf32> -> vector<1x16xf32>
    %351 = arith.addf %344, %350 : vector<1x16xf32>
    %c0_371 = arith.constant 0 : index
    %c0_372 = arith.constant 0 : index
    %c0_373 = arith.constant 0 : index
    %352 = vector.load %arg17[%c0_371, %c0_372, %c0_373] : memref<1x1x16xf32, #tpu.memory_space<vmem>>, vector<1x1x16xf32>
    %353 = vector.shape_cast %352 : vector<1x1x16xf32> to vector<1x16xf32>
    %354 = vector.shape_cast %351 : vector<1x16xf32> to vector<1x1x16xf32>
    tpu.vector_store %arg17[%c0_371, %c0_372, %c0_373], %354 {strides = array<i32>} : memref<1x1x16xf32, #tpu.memory_space<vmem>>, vector<1x1x16xf32>,
    return
  }
  func.func @transform_0(%arg0: i32) -> (i32, i32, i32) {
    %c0_i32 = arith.constant 0 : i32
    %c0_i32_0 = arith.constant 0 : i32
    %c0_i32_1 = arith.constant 0 : i32
    return %arg0, %c0_i32, %c0_i32_0 : i32, i32, i32
  }
  func.func @transform_1(%arg0: i32) -> (i32, i32, i32) {
    %c0_i32 = arith.constant 0 : i32
    %c0_i32_0 = arith.constant 0 : i32
    %c0_i32_1 = arith.constant 0 : i32
    %c0_i32_2 = arith.constant 0 : i32
    return %c0_i32, %c0_i32_0, %c0_i32_1 : i32, i32, i32
  }
  func.func @transform_2(%arg0: i32) -> (i32, i32, i32) {
    %c0_i32 = arith.constant 0 : i32
    %c0_i32_0 = arith.constant 0 : i32
    %c0_i32_1 = arith.constant 0 : i32
    %c0_i32_2 = arith.constant 0 : i32
    return %c0_i32, %c0_i32_0, %c0_i32_1 : i32, i32, i32
  }
  func.func @transform_3(%arg0: i32) -> (i32, i32) {
    %c0_i32 = arith.constant 0 : i32
    %c0_i32_0 = arith.constant 0 : i32
    %c0_i32_1 = arith.constant 0 : i32
    return %c0_i32, %c0_i32_0 : i32, i32
  }
  func.func @transform_4(%arg0: i32) -> (i32, i32, i32) {
    %c0_i32 = arith.constant 0 : i32
    %c0_i32_0 = arith.constant 0 : i32
    %c0_i32_1 = arith.constant 0 : i32
    %c0_i32_2 = arith.constant 0 : i32
    return %c0_i32, %c0_i32_0, %c0_i32_1 : i32, i32, i32
  }
  func.func @transform_5(%arg0: i32) -> (i32, i32, i32) {
    %c0_i32 = arith.constant 0 : i32
    %c0_i32_0 = arith.constant 0 : i32
    %c0_i32_1 = arith.constant 0 : i32
    %c0_i32_2 = arith.constant 0 : i32
    return %c0_i32, %c0_i32_0, %c0_i32_1 : i32, i32, i32
  }
  func.func @transform_6(%arg0: i32) -> (i32, i32) {
    %c0_i32 = arith.constant 0 : i32
    %c0_i32_0 = arith.constant 0 : i32
    %c0_i32_1 = arith.constant 0 : i32
    return %c0_i32, %c0_i32_0 : i32, i32
  }
  func.func @transform_7(%arg0: i32) -> (i32, i32, i32) {
    %c0_i32 = arith.constant 0 : i32
    %c0_i32_0 = arith.constant 0 : i32
    %c0_i32_1 = arith.constant 0 : i32
    %c0_i32_2 = arith.constant 0 : i32
    return %c0_i32, %c0_i32_0, %c0_i32_1 : i32, i32, i32
  }
  func.func @transform_8(%arg0: i32) -> (i32, i32, i32) {
    %c0_i32 = arith.constant 0 : i32
    %c0_i32_0 = arith.constant 0 : i32
    %c0_i32_1 = arith.constant 0 : i32
    %c0_i32_2 = arith.constant 0 : i32
    return %c0_i32, %c0_i32_0, %c0_i32_1 : i32, i32, i32
  }
  func.func @transform_9(%arg0: i32) -> (i32, i32) {
    %c0_i32 = arith.constant 0 : i32
    %c0_i32_0 = arith.constant 0 : i32
    %c0_i32_1 = arith.constant 0 : i32
    return %c0_i32, %c0_i32_0 : i32, i32
  }
  func.func @transform_10(%arg0: i32) -> (i32, i32, i32) {
    %c0_i32 = arith.constant 0 : i32
    %c0_i32_0 = arith.constant 0 : i32
    %c0_i32_1 = arith.constant 0 : i32
    %c0_i32_2 = arith.constant 0 : i32
    return %c0_i32, %c0_i32_0, %c0_i32_1 : i32, i32, i32
  }
  func.func @transform_11(%arg0: i32) -> (i32, i32, i32) {
    %c0_i32 = arith.constant 0 : i32
    %c0_i32_0 = arith.constant 0 : i32
    %c0_i32_1 = arith.constant 0 : i32
    %c0_i32_2 = arith.constant 0 : i32
    return %c0_i32, %c0_i32_0, %c0_i32_1 : i32, i32, i32
  }
  func.func @transform_12(%arg0: i32) -> (i32, i32) {
    %c0_i32 = arith.constant 0 : i32
    %c0_i32_0 = arith.constant 0 : i32
    %c0_i32_1 = arith.constant 0 : i32
    return %c0_i32, %c0_i32_0 : i32, i32
  }
  func.func @transform_13(%arg0: i32) -> (i32, i32, i32) {
    %c0_i32 = arith.constant 0 : i32
    %c0_i32_0 = arith.constant 0 : i32
    %c0_i32_1 = arith.constant 0 : i32
    %c0_i32_2 = arith.constant 0 : i32
    return %c0_i32, %c0_i32_0, %c0_i32_1 : i32, i32, i32
  }
  func.func @transform_14(%arg0: i32) -> (i32, i32, i32) {
    %c0_i32 = arith.constant 0 : i32
    %c0_i32_0 = arith.constant 0 : i32
    %c0_i32_1 = arith.constant 0 : i32
    %c0_i32_2 = arith.constant 0 : i32
    return %c0_i32, %c0_i32_0, %c0_i32_1 : i32, i32, i32
  }
  func.func @transform_15(%arg0: i32) -> (i32, i32) {
    %c0_i32 = arith.constant 0 : i32
    %c0_i32_0 = arith.constant 0 : i32
    %c0_i32_1 = arith.constant 0 : i32
    return %c0_i32, %c0_i32_0 : i32, i32
  }
  func.func @transform_16(%arg0: i32) -> (i32, i32, i32) {
    %c0_i32 = arith.constant 0 : i32
    %c0_i32_0 = arith.constant 0 : i32
    %c0_i32_1 = arith.constant 0 : i32
    return %arg0, %c0_i32, %c0_i32_0 : i32, i32, i32
  }
}

</mosaic_0001>

<bundles_post_ra>
// kernel: tpu_custom_call.1
= control target key start
LH: loop header
LB: loop body
LE: loop exit
PB: predicated region body
PF: predicated region fallthrough
CT: control target
= control target key end

     0   :  { %s16172_s0 = inlined_call_operand.vmem [shape: f32[2,4,256], index: 0, kind: input, shape index: {}]   ;;  %s16173_s1 = inlined_call_operand.vmem [shape: f32[9,256,256], index: 1, kind: input, shape index: {}]   ;;  %s16174_s2 = inlined_call_operand.vmem [shape: f32[9,8,4], index: 2, kind: input, shape index: {}]   ;;  %s16175_s3 = inlined_call_operand.vmem [shape: f32[8,1], index: 3, kind: input, shape index: {}]   ;;  %s16176_s4 = inlined_call_operand.vmem [shape: f32[9,256,64], index: 4, kind: input, shape index: {}]   ;;  %s16177_s5 = inlined_call_operand.vmem [shape: f32[9,8,8], index: 5, kind: input, shape index: {}]   ;;  %s16178_s6 = inlined_call_operand.vmem [shape: f32[8,1], index: 6, kind: input, shape index: {}]   ;;  %s16179_s7 = inlined_call_operand.hbm [shape: f32[9,64,64], index: 7, kind: input, shape index: {}]   ;;  %s16180_s8 = inlined_call_operand.vmem [shape: f32[9,16,8], index: 8, kind: input, shape index: {}]   ;;  %s16181_s9 = inlined_call_operand.vmem [shape: f32[16,1], index: 9, kind: input, shape index: {}]   ;;  %s16182_s10 = inlined_call_operand.vmem [shape: f32[9,64,16], index: 10, kind: input, shape index: {}]   ;;  %s16183_s11 = inlined_call_operand.hbm [shape: f32[9,16,16], index: 11, kind: input, shape index: {}]   ;;  %s16184_s12 = inlined_call_operand.vmem [shape: f32[16,1], index: 12, kind: input, shape index: {}]   ;;  %s16185_s13 = inlined_call_operand.hbm [shape: f32[9,16,16], index: 13, kind: input, shape index: {}]   ;;  %s16186_s14 = inlined_call_operand.vmem [shape: f32[9,1,16], index: 14, kind: input, shape index: {}]   ;;  %s16187_s15 = inlined_call_operand.<no memory space> [shape: f32[1,1], index: 15, kind: input, shape index: {}]   ;;  %s16188_s16 = inlined_call_operand.hbm [shape: f32[2,1,16], index: 16, kind: output, shape index: {}]  }
   0x1   :  { %16203 = sst [smem:[#allocation21_spill]] %s16172_s0  ;;  %v21_v0 = vstv %s16187_s15 }
   0x2   :  { %16204 = sst [smem:[#allocation22_spill]] %s16186_s14  ;;  %22 = vst [vmem:[#allocation2] sm:$0x1] %v21_v0 }
   0x3   :  { %16205 = sst [smem:[#allocation23_spill]] %s16188_s16 }
   0x4   :  { %23 = vsyncpa [#allocation4], 0 }
   0x5   :  { %24 = vsyncpa [#allocation7], 0 }
   0x6   :  { %25 = vsyncpa [#allocation5], 0 }
   0x7   :  { %27 = vsyncpa [#allocation5 + $0x1], 0  ;;  %s12642_s23 = smov 0   ;;  %s12644_s24 = smov 0  }
   0x8   :  { %s12646_s25 = smov 0   ;;  %s12648_s26 = smov 0  }
   0x9 LB: > { %16206 = sst [smem:[#allocation13_spill]] %s12530_s23  ;;  %s12663_s15 = sadd.s32 4294967295, %s12542_s26   ;;  %s12542_s26 = sphi %s12648_s26, %s16235_s26   ;;  %s12538_s25 = sphi %s12646_s25, %s16238_s25   ;;  %s12534_s24 = sphi %s12644_s24, %s16237_s24   ;;  %s12530_s23 = sphi %s12642_s23, %s16236_s23  }
   0xa   : > { %16207 = sst [smem:[#allocation14_spill]] %s12534_s24  ;;  %s8739_s27 = sadd.s32 4294967294, %s12542_s26  }
   0xb   : > { %16208 = sst [smem:[#allocation15_spill]] %s12538_s25  ;;  %s12667_s28 = sadd.s32 1, %s12542_s26  }
   0xc   : > { %16209 = sst [smem:[#allocation16_spill]] %s12542_s26  ;;  %s381_s29 = sadd.s32 1, %s12538_s25 }
   0xd   : > { %16210 = sst [smem:[#allocation17_spill]] %s12667_s28  ;;  %s378_s30 = ssub.s32 %s12542_s26, %s12667_s28 }
   0xe   : > { %p391_p0 = scmp.ne.s32.totalorder %s12538_s25, %s12534_s24  ;;  %p379_p1 = scmp.eq.s32.totalorder %s378_s30, 0 }
   0xf   : > { %p392_p2 = scmp.eq.s32.totalorder %s12663_s15, 1  ;;  %p397_p3 = scmp.ne.s32.totalorder %s12534_s24, %s12530_s23 }
  0x10   : > { %p398_p4 = scmp.eq.s32.totalorder %s8739_s27, 1  ;;  %p8740_p7 = scmp.ge.s32.totalorder %s12542_s26, 1 }
  0x11   : > { %s12678_s0 = scalar_select %p379_p1, %s12538_s25, %s381_s29  }
  0x12   : > { %p12680_p5 = por %p392_p2, %p391_p0  ;;  %p12684_p6 = por %p398_p4, %p397_p3 }
  0x13   : > { %16211 = sst [smem:[#allocation18_spill]] %s12678_s0  ;;  %p405_p8 = scmp.lt.s32.totalorder %s12542_s26, 3 }
  0x14   : > { %s16212_s17 = scalar_select %p12680_p5, 1, 0 }
  0x15   : > { %s16214_s18 = scalar_select %p12684_p6, 1, 0 }
  0x16   : > { %16213 = sst [smem:[#allocation19_spill]] %s16212_s17  ;;  %p16195_p9 = scmp.eq.s32.totalorder %s12663_s15, 0 }
  0x17   : > { %16215 = sst [smem:[#allocation20_spill]] %s16214_s18  ;;  %p12691_p10 = pnand %p8740_p7, %p405_p8 }
  0x18   : > { %s12544_s20 = smov [#allocation6]   ;;  %s12545_s27 = smov [#allocation3]  }
  0x19   : > { %s16216_s19 = scalar_select %p12691_p10, 1, 0 }
  0x1a   : > { %p12321_p11 = pneg %p12691_p10  ;;  %s457_s21 = sshll.u32 %s12544_s20, 4  ;;  %s12697_s21 = int_to_ptr.vmem [resolvable:$true] %s457_s21 }
  0x1b   : > { %s435_s29 = sshll.u32 %s12545_s27, 4  ;;  %s12546_s30 = smov [#allocation8]   ;;  %s12705_s29 = int_to_ptr.vmem [resolvable:$true] %s435_s29 }
  0x1c   : > { %p12701_p12 = pnand %p16195_p9, %p12321_p11  ;;  %s12707_s0 = sshll.u32 %s12546_s30, 4  ;;  %s474_s0 = int_to_ptr.vmem [resolvable:$true] %s12707_s0 }
  0x1d   : > { %s12388_s18 = scalar_lea.hbm %s16183_s11, 2304 }
  0x1e   : > { %p12389_p13 = scmp.ne.s32.totalorder %s16183_s11, %s12388_s18  ;;  %p12717_p0 = pneg %p12701_p12 }
  0x1f   : > { %p12395_p3 = scmp.lt.u32.totalorder %s12388_s18, %s16183_s11 }
  0x20   : > { %p12391_p1 = pnand %p12717_p0, %p12389_p13 }
  0x22   : > { %p12392_p2 = pneg %p12391_p1 }
  0x24   : > { %p12397_p4 = pnand %p12395_p3, %p12392_p2 }
  0x26   : > { %12400 = shalt.err (!%p12397_p4)
}
  0x27   : > { %s12401_s23 = scalar_lea.vmem %s12697_s21, 2304  ;;  %p12409_p9 = scmp.lt.s32.totalorder %s12697_s21, %s12697_s21 }
  0x28   : > { %p12402_p7 = scmp.ne.s32.totalorder %s12697_s21, %s12401_s23  ;;  %p12410_p6 = scmp.lt.s32.totalorder %s12401_s23, %s12401_s23 }
  0x2a   : > { %p12404_p8 = pnand %p12402_p7, %p12717_p0  ;;  %p12411_p13 = por %p12410_p6, %p12409_p9 }
  0x2c   : > { %p12405_p11 = pneg %p12404_p8 }
  0x2e   : > { %p12412_p1 = pnand %p12411_p13, %p12405_p11 }
  0x30   : > { %12415 = shalt.err (!%p12412_p1)
}
  0x31   : > { %s12547_s25 = smov 128   ;;  %s12548_s28 = smov 8  }
  0x32   : > { %12327 = dma.hbm_to_vmem [thread:$0]  (!%p12701_p12), %s16183_s11, 2304, %s12697_s21, [#allocation7], %s12547_s25, %s12547_s25, %s12548_s28  }
  0x33   : > { %s12416_s23 = scalar_lea.hbm %s16179_s7, 9216 }
  0x34   : > { %p12417_p6 = scmp.ne.s32.totalorder %s16179_s7, %s12416_s23  ;;  %p12423_p3 = scmp.lt.u32.totalorder %s12416_s23, %s16179_s7 }
  0x36   : > { %p12419_p9 = pnand %p12417_p6, %p12717_p0 }
  0x38   : > { %p12420_p2 = pneg %p12419_p9 }
  0x3a   : > { %p12425_p4 = pnand %p12423_p3, %p12420_p2 }
  0x3c   : > { %12428 = shalt.err (!%p12425_p4)
}
  0x3d   : > { %s12429_s21 = scalar_lea.vmem %s12705_s29, 9216  ;;  %p12437_p13 = scmp.lt.s32.totalorder %s12705_s29, %s12705_s29 }
  0x3e   : > { %p12430_p7 = scmp.ne.s32.totalorder %s12705_s29, %s12429_s21  ;;  %p12438_p1 = scmp.lt.s32.totalorder %s12429_s21, %s12429_s21 }
  0x40   : > { %p12432_p8 = pnand %p12430_p7, %p12717_p0  ;;  %p12439_p6 = por %p12438_p1, %p12437_p13 }
  0x42   : > { %p12433_p11 = pneg %p12432_p8 }
  0x44   : > { %p12440_p9 = pnand %p12439_p6, %p12433_p11 }
  0x46   : > { %12443 = shalt.err (!%p12440_p9)
}
  0x47   : > { %12324 = dma.hbm_to_vmem [thread:$0]  (!%p12701_p12), %s16179_s7, 9216, %s12705_s29, [#allocation4], %s12547_s25, %s12547_s25, %s12548_s28  }
  0x48   : > { %s12444_s18 = scalar_lea.hbm %s16185_s13, 2304 }
  0x49   : > { %p12445_p2 = scmp.ne.s32.totalorder %s16185_s13, %s12444_s18  ;;  %p12451_p7 = scmp.lt.u32.totalorder %s12444_s18, %s16185_s13 }
  0x4b   : > { %p12447_p3 = pnand %p12445_p2, %p12717_p0 }
  0x4d   : > { %p12448_p4 = pneg %p12447_p3 }
  0x4f   : > { %p12453_p8 = pnand %p12451_p7, %p12448_p4 }
  0x51   : > { %12456 = shalt.err (!%p12453_p8)
}
  0x52   : > { %s12457_s21 = scalar_lea.vmem %s474_s0, 2304  ;;  %p12465_p6 = scmp.lt.s32.totalorder %s474_s0, %s474_s0 }
  0x53   : > { %p12458_p11 = scmp.ne.s32.totalorder %s474_s0, %s12457_s21  ;;  %p12466_p9 = scmp.lt.s32.totalorder %s12457_s21, %s12457_s21 }
  0x55   : > { %p12460_p13 = pnand %p12458_p11, %p12717_p0  ;;  %p12467_p5 = por %p12466_p9, %p12465_p6 }
  0x57   : > { %p12461_p1 = pneg %p12460_p13 }
  0x59   : > { %p12468_p10 = pnand %p12467_p5, %p12461_p1 }
  0x5b   : > { %12471 = shalt.err (!%p12468_p10)
}
  0x5c   : > { %12330 = dma.hbm_to_vmem [thread:$0]  (!%p12701_p12), %s16185_s13, 2304, %s474_s0, [#allocation7], %s12547_s25, %s12547_s25, %s12548_s28  }
  0x5d   : > { %p16219_p2 = scmp.ne.s32.totalorder %s16216_s19, 0 }
  0x5e   : > { %p16220_p0 = scmp.eq.s32.totalorder (!%p16219_p2), %s12663_s15, 0 }
  0x5f   : > { %503 = sbr.rel (%p16219_p2) target bundleno = 6314 (0x18aa), region = 84 }
  0x66   : > { %12517 = dma.done.wait (%p16220_p0), [#allocation4], 9216   ;;  %p16221_p3 = pmov %p16220_p0 }
  0x67   : > { %p16222_p5 = pmov %p16220_p0 }
  0x68   : > { %12519 = vsyncadd (%p16221_p3), [#allocation4], 4294958080 }
  0x69   : > { %12521 = dma.done.wait (%p16222_p5), [#allocation7], 4608   ;;  %p16223_p10 = pmov %p16220_p0 }
  0x6a   : > { %v573_v1 = vld [vmem:[%s16173_s1 + $0x8] sm:$0xff]  ;;  %v575_v2 = vld [vmem:[%s16173_s1 + $0x18] sm:$0xff]  ;;  %v572_v3 = vld [vmem:[%s16173_s1] sm:$0xff]  ;;  %p560_p12 = scmp.lt.s32.totalorder %s12663_s15, 1  ;;  %s16224_s28 = sld [smem:[#allocation21_spill]]  ;;  %vm715_vm0 = vcmask 1043456  }
  0x6b   : > { %12523 = vsyncadd (%p16223_p10), [#allocation7], 4294962688  ;;  %v11004_v4 = vpack.c.bf16 %v575_v2, %v573_v1  ;;  %v574_v5 = vld [vmem:[%s16173_s1 + $0x10] sm:$0xff]  ;;  %v577_v6 = vld [vmem:[%s16173_s1 + $0x28] sm:$0xff]  ;;  %vm711_vm1 = vcmask 31744   ;;  %vm12551_vm4 = vmmov 0  }
  0x6c   : > { %v579_v7 = vld [vmem:[%s16173_s1 + $0x38] sm:$0xff]  ;;  %v11006_v8 = vpack.c.bf16 %v574_v5, %v572_v3  ;;  %v576_v10 = vld [vmem:[%s16173_s1 + $0x20] sm:$0xff]  ;;  %v578_v11 = vld [vmem:[%s16173_s1 + $0x30] sm:$0xff]  ;;  %s561_s0 = scalar_select %p560_p12, %s12663_s15, 1  ;;  %vm2670_vm5 = vcmask 64512   ;;  %vm4200_vm7 = vcmask 523264  }
  0x6d   : > { %v11008_v9 = vpack.c.bf16 %v579_v7, %v577_v6  ;;  %v581_v12 = vld [vmem:[%s16173_s1 + $0x48] sm:$0xff]  ;;  %11005 = vmatprep.subr.bf16.mxu0 %v11004_v4  ;;  %v583_v13 = vld [vmem:[%s16173_s1 + $0x58] sm:$0xff]  ;;  %v11010_v14 = vpack.c.bf16 %v578_v11, %v576_v10  ;;  %v580_v16 = vld [vmem:[%s16173_s1 + $0x40] sm:$0xff]  ;;  %vm5788_vm10 = vcmask 130048   ;;  %s16225_s20 = sld [smem:[#allocation22_spill]]  ;;  %s16226_s19 = sld [smem:[#allocation14_spill]] }
  0x6e   : > { %11007 = vmatpush1.bf16.msra.mxu0 %v11006_v8  ;;  %v11012_v15 = vpack.c.bf16 %v583_v13, %v581_v12  ;;  %v582_v17 = vld [vmem:[%s16173_s1 + $0x50] sm:$0xff]  ;;  %v585_v18 = vld [vmem:[%s16173_s1 + $0x68] sm:$0xff]  ;;  %v587_v19 = vld [vmem:[%s16173_s1 + $0x78] sm:$0xff]  ;;  %s9752_s27 = sshll.u32 %s561_s0, 3  ;;  %s9749_s21 = sshll.u32 %s12663_s15, 4  ;;  %vm8638_vm13 = vcmask 122880  }
  0x6f   : > { %11009 = vmatprep.subr.bf16.mxu0 %v11008_v9  ;;  %v11014_v20 = vpack.c.bf16 %v582_v17, %v580_v16  ;;  %v11016_v21 = vpack.c.bf16 %v587_v19, %v585_v18  ;;  %v584_v22 = vld [vmem:[%s16173_s1 + $0x60] sm:$0xff]  ;;  %v586_v23 = vld [vmem:[%s16173_s1 + $0x70] sm:$0xff]  ;;  %v589_v24 = vld [vmem:[%s16173_s1 + $0x88] sm:$0xff]  ;;  %s16228_s25 = sld [smem:[#allocation23_spill]] }
  0x70   : > { %v591_v25 = vld [vmem:[%s16173_s1 + $0x98] sm:$0xff]  ;;  %v11018_v26 = vpack.c.bf16 %v586_v23, %v584_v22  ;;  %v588_v28 = vld [vmem:[%s16173_s1 + $0x80] sm:$0xff]  ;;  %v590_v29 = vld [vmem:[%s16173_s1 + $0x90] sm:$0xff]  ;;  %s12882_s16 = scalar_lea.vmem %s16224_s28, %s9752_s27  ;;  %s16227_s27 = sld [smem:[#allocation19_spill]] }
  0x71   : > { %v11020_v27 = vpack.c.bf16 %v591_v25, %v589_v24  ;;  %v593_v30 = vld [vmem:[%s16173_s1 + $0xa8] sm:$0xff]  ;;  %v595_v31 = vld [vmem:[%s16173_s1 + $0xb8] sm:$0xff]  ;;  %v11022_v32 = vpack.c.bf16 %v590_v29, %v588_v28  ;;  %v592_v34 = vld [vmem:[%s16173_s1 + $0xa0] sm:$0xff]  ;;  %s12553_s28 = smov [#allocation9]  }
  0x72   : > { %11011 = vmatpush1.bf16.msra.mxu0 %v11010_v14  ;;  %v11024_v33 = vpack.c.bf16 %v595_v31, %v593_v30  ;;  %v594_v35 = vld [vmem:[%s16173_s1 + $0xb0] sm:$0xff]  ;;  %v597_v36 = vld [vmem:[%s16173_s1 + $0xc8] sm:$0xff]  ;;  %v599_v37 = vld [vmem:[%s16173_s1 + $0xd8] sm:$0xff]  ;;  %s12476_s24 = sshll.u32 %s12553_s28, 4  ;;  %s12477_s24 = int_to_ptr.vmem [resolvable:$false] %s12476_s24 }
  0x73   : > { %11013 = vmatprep.subr.bf16.mxu0 %v11012_v15  ;;  %v11026_v38 = vpack.c.bf16 %v594_v35, %v592_v34  ;;  %v11028_v39 = vpack.c.bf16 %v599_v37, %v597_v36  ;;  %v596_v40 = vld [vmem:[%s16173_s1 + $0xc0] sm:$0xff]  ;;  %v598_v41 = vld [vmem:[%s16173_s1 + $0xd0] sm:$0xff]  ;;  %v601_v43 = vld [vmem:[%s16173_s1 + $0xe8] sm:$0xff]  ;;  %v12549_v35 = vmov 0.0   ;;  %s558_s23 = sand.u32 1, %s16226_s19   ;;  %s12478_s17 = scalar_lea.vmem %s12477_s24, 32 }
  0x74   : > { %v12891_v42 = vld [vmem:[%s12882_s16] sm:$0xff]  ;;  %v603_v44 = vld [vmem:[%s16173_s1 + $0xf8] sm:$0xff]  ;;  %v11030_v46 = vpack.c.bf16 %v598_v41, %v596_v40  ;;  %v602_v49 = vld [vmem:[%s16173_s1 + $0xf0] sm:$0xff]  ;;  %786 = vmatprep.mubr.f32.mxu1 %v12549_v35  ;;  %s559_s29 = scalar_lea.vmem [#allocation9], %s558_s23  ;;  %s8641_s19 = scalar_lea.sflag [#allocation5], %s558_s23 }
  0x75   : > { %v12901_v45 = vcombine.high %v12891_v42, %v12891_v42  ;;  %v11032_v47 = vpack.c.bf16 %v603_v44, %v601_v43  ;;  %v600_v48 = vld [vmem:[%s16173_s1 + $0xe0] sm:$0xff]  ;;  %v605_v50 = vld [vmem:[%s16173_s1 + $0x108] sm:$0xff]  ;;  %v607_v51 = vld [vmem:[%s16173_s1 + $0x118] sm:$0xff]  ;;  %s8653_s14 = sshll.u32 %s559_s29, 4  ;;  %s16229_s0 = smov %s16228_s25  ;;  %s16132_s14 = int_to_ptr.vmem [resolvable:$true] %s8653_s14 }
  0x76   : > { %11015 = vmatpush1.bf16.msra.mxu0 %v11014_v20  ;;  %v11034_v52 = vpack.c.bf16 %v602_v49, %v600_v48  ;;  %v11036_v53 = vpack.c.bf16 %v607_v51, %v605_v50  ;;  %v604_v54 = vld [vmem:[%s16173_s1 + $0x100] sm:$0xff]  ;;  %v606_v55 = vld [vmem:[%s16173_s1 + $0x110] sm:$0xff]  ;;  %v609_v56 = vld [vmem:[%s16173_s1 + $0x128] sm:$0xff]  ;;  %s12472_s15 = scalar_lea.vmem %s16132_s14, 16  ;;  %p16230_p7 = scmp.ne.s32.totalorder %s16227_s27, 0 }
  0x77   : > { %11017 = vmatprep.subr.bf16.mxu0 %v11016_v21  ;;  %703 = vmatprep.mubr.f32.mxu0 %v12901_v45  ;;  %v611_v57 = vld [vmem:[%s16173_s1 + $0x138] sm:$0xff]  ;;  %v11038_v58 = vpack.c.bf16 %v606_v55, %v604_v54  ;;  %v608_v60 = vld [vmem:[%s16173_s1 + $0x120] sm:$0xff]  ;;  %v610_v61 = vld [vmem:[%s16173_s1 + $0x130] sm:$0xff]  ;;  %p12473_p4 = scmp.ne.s32.totalorder %s16132_s14, %s12472_s15  ;;  %p12479_p13 = scmp.lt.s32.totalorder %s16132_s14, %s12477_s24 }
  0x78   : > { %v11040_v59 = vpack.c.bf16 %v611_v57, %v609_v56  ;;  %v613_v62 = vld [vmem:[%s16173_s1 + $0x148] sm:$0xff]  ;;  %v615_v63 = vld [vmem:[%s16173_s1 + $0x158] sm:$0xff]  ;;  %v11042_v0 = vpack.c.bf16 %v610_v61, %v608_v60  ;;  %v612_v2 = vld [vmem:[%s16173_s1 + $0x140] sm:$0xff]  ;;  %p12480_p1 = scmp.lt.s32.totalorder %s12478_s17, %s12472_s15 }
  0x79   : > { %v11044_v1 = vpack.c.bf16 %v615_v63, %v613_v62  ;;  %v614_v3 = vld [vmem:[%s16173_s1 + $0x150] sm:$0xff]  ;;  %v617_v4 = vld [vmem:[%s16173_s1 + $0x168] sm:$0xff]  ;;  %v619_v5 = vld [vmem:[%s16173_s1 + $0x178] sm:$0xff]  ;;  %p12474_p8 = pnand %p12473_p4, %p16230_p7 }
  0x7a   : > { %11019 = vmatpush1.bf16.msra.mxu0 %v11018_v26  ;;  %v11046_v6 = vpack.c.bf16 %v614_v3, %v612_v2  ;;  %v11048_v7 = vpack.c.bf16 %v619_v5, %v617_v4  ;;  %v616_v8 = vld [vmem:[%s16173_s1 + $0x160] sm:$0xff]  ;;  %v618_v9 = vld [vmem:[%s16173_s1 + $0x170] sm:$0xff]  ;;  %v621_v10 = vld [vmem:[%s16173_s1 + $0x188] sm:$0xff]  ;;  %p12481_p6 = por %p12480_p1, %p12479_p13 }
  0x7b   : > { %11021 = vmatprep.subr.bf16.mxu0 %v11020_v27  ;;  %v623_v11 = vld [vmem:[%s16173_s1 + $0x198] sm:$0xff]  ;;  %v11050_v12 = vpack.c.bf16 %v618_v9, %v616_v8  ;;  %v620_v14 = vld [vmem:[%s16173_s1 + $0x180] sm:$0xff]  ;;  %v622_v15 = vld [vmem:[%s16173_s1 + $0x190] sm:$0xff]  ;;  %p12475_p11 = pneg %p12474_p8 }
  0x7c   : > { %v11052_v13 = vpack.c.bf16 %v623_v11, %v621_v10  ;;  %v625_v16 = vld [vmem:[%s16173_s1 + $0x1a8] sm:$0xff]  ;;  %v627_v17 = vld [vmem:[%s16173_s1 + $0x1b8] sm:$0xff]  ;;  %v11054_v18 = vpack.c.bf16 %v622_v15, %v620_v14  ;;  %v624_v20 = vld [vmem:[%s16173_s1 + $0x1a0] sm:$0xff] }
  0x7d   : > { %v11056_v19 = vpack.c.bf16 %v627_v17, %v625_v16  ;;  %v626_v21 = vld [vmem:[%s16173_s1 + $0x1b0] sm:$0xff]  ;;  %v629_v22 = vld [vmem:[%s16173_s1 + $0x1c8] sm:$0xff]  ;;  %v631_v23 = vld [vmem:[%s16173_s1 + $0x1d8] sm:$0xff]  ;;  %p12482_p9 = pnand %p12481_p6, %p12475_p11 }
  0x7e   : > { %11023 = vmatpush1.bf16.msra.mxu0 %v11022_v32  ;;  %v11058_v24 = vpack.c.bf16 %v626_v21, %v624_v20  ;;  %v11060_v25 = vpack.c.bf16 %v631_v23, %v629_v22  ;;  %v628_v26 = vld [vmem:[%s16173_s1 + $0x1c0] sm:$0xff]  ;;  %v630_v27 = vld [vmem:[%s16173_s1 + $0x1d0] sm:$0xff]  ;;  %v633_v28 = vld [vmem:[%s16173_s1 + $0x1e8] sm:$0xff] }
  0x7f   : > { %11025 = vmatprep.subr.bf16.mxu0 %v11024_v33  ;;  %v635_v29 = vld [vmem:[%s16173_s1 + $0x1f8] sm:$0xff]  ;;  %v11062_v30 = vpack.c.bf16 %v630_v27, %v628_v26  ;;  %v632_v32 = vld [vmem:[%s16173_s1 + $0x1e0] sm:$0xff]  ;;  %v634_v33 = vld [vmem:[%s16173_s1 + $0x1f0] sm:$0xff] }
  0x80   : > { %v11064_v31 = vpack.c.bf16 %v635_v29, %v633_v28  ;;  %v11066_v34 = vpack.c.bf16 %v634_v33, %v632_v32  ;;  %v8823_v36 = vld [vmem:[%s16173_s1 + $0x408] sm:$0xff]  ;;  %v8825_v37 = vld [vmem:[%s16173_s1 + $0x418] sm:$0xff] }
  0x81   : > { %v11132_v40 = vpack.c.bf16 %v8825_v37, %v8823_v36  ;;  %v8827_v43 = vld [vmem:[%s16173_s1 + $0x428] sm:$0xff]  ;;  %v8829_v44 = vld [vmem:[%s16173_s1 + $0x438] sm:$0xff]  ;;  %v8862_v37 = vld [vmem:[%s16173_s1 + $0x540] sm:$0xff] }
  0x82   : > { %11027 = vmatpush1.bf16.msra.mxu0 %v11026_v38  ;;  %v8822_v38 = vld [vmem:[%s16173_s1 + $0x400] sm:$0xff]  ;;  %v11136_v48 = vpack.c.bf16 %v8829_v44, %v8827_v43  ;;  %v8831_v50 = vld [vmem:[%s16173_s1 + $0x448] sm:$0xff]  ;;  %v8833_v51 = vld [vmem:[%s16173_s1 + $0x458] sm:$0xff] }
  0x83   : > { %11029 = vmatprep.subr.bf16.mxu0 %v11028_v39  ;;  %v8824_v39 = vld [vmem:[%s16173_s1 + $0x410] sm:$0xff]  ;;  %v11140_v54 = vpack.c.bf16 %v8833_v51, %v8831_v50  ;;  %v8835_v56 = vld [vmem:[%s16173_s1 + $0x468] sm:$0xff]  ;;  %v8837_v57 = vld [vmem:[%s16173_s1 + $0x478] sm:$0xff] }
  0x84   : > { %v11134_v41 = vpack.c.bf16 %v8824_v39, %v8822_v38  ;;  %v11144_v60 = vpack.c.bf16 %v8837_v57, %v8835_v56  ;;  %v8839_v62 = vld [vmem:[%s16173_s1 + $0x488] sm:$0xff]  ;;  %v8841_v63 = vld [vmem:[%s16173_s1 + $0x498] sm:$0xff]  ;;  %v8864_v38 = vld [vmem:[%s16173_s1 + $0x550] sm:$0xff] }
  0x85   : > { %v11148_v2 = vpack.c.bf16 %v8841_v63, %v8839_v62  ;;  %v8843_v4 = vld [vmem:[%s16173_s1 + $0x4a8] sm:$0xff]  ;;  %v8845_v5 = vld [vmem:[%s16173_s1 + $0x4b8] sm:$0xff]  ;;  %v8866_v44 = vld [vmem:[%s16173_s1 + $0x560] sm:$0xff] }
  0x86   : > { %11031 = vmatpush1.bf16.msra.mxu0 %v11030_v46  ;;  %v8826_v46 = vld [vmem:[%s16173_s1 + $0x420] sm:$0xff]  ;;  %v11152_v8 = vpack.c.bf16 %v8845_v5, %v8843_v4  ;;  %v8847_v10 = vld [vmem:[%s16173_s1 + $0x4c8] sm:$0xff]  ;;  %v8849_v11 = vld [vmem:[%s16173_s1 + $0x4d8] sm:$0xff] }
  0x87   : > { %11033 = vmatprep.subr.bf16.mxu0 %v11032_v47  ;;  %v8828_v47 = vld [vmem:[%s16173_s1 + $0x430] sm:$0xff]  ;;  %v11156_v14 = vpack.c.bf16 %v8849_v11, %v8847_v10  ;;  %v8851_v16 = vld [vmem:[%s16173_s1 + $0x4e8] sm:$0xff]  ;;  %v8853_v17 = vld [vmem:[%s16173_s1 + $0x4f8] sm:$0xff] }
  0x88   : > { %v11138_v49 = vpack.c.bf16 %v8828_v47, %v8826_v46  ;;  %v11160_v20 = vpack.c.bf16 %v8853_v17, %v8851_v16  ;;  %v8855_v22 = vld [vmem:[%s16173_s1 + $0x508] sm:$0xff]  ;;  %v8857_v23 = vld [vmem:[%s16173_s1 + $0x518] sm:$0xff]  ;;  %v8868_v46 = vld [vmem:[%s16173_s1 + $0x570] sm:$0xff] }
  0x89   : > { %v11164_v26 = vpack.c.bf16 %v8857_v23, %v8855_v22  ;;  %v8859_v28 = vld [vmem:[%s16173_s1 + $0x528] sm:$0xff]  ;;  %v8861_v29 = vld [vmem:[%s16173_s1 + $0x538] sm:$0xff]  ;;  %v8870_v51 = vld [vmem:[%s16173_s1 + $0x580] sm:$0xff] }
  0x8a   : > { %11035 = vmatpush1.bf16.msra.mxu0 %v11034_v52  ;;  %v8830_v52 = vld [vmem:[%s16173_s1 + $0x440] sm:$0xff]  ;;  %v11168_v32 = vpack.c.bf16 %v8861_v29, %v8859_v28  ;;  %v8865_v36 = vld [vmem:[%s16173_s1 + $0x558] sm:$0xff]  ;;  %v8760_v22 = vld [vmem:[%s16173_s1 + $0x230] sm:$0xff] }
  0x8b   : > { %11037 = vmatprep.subr.bf16.mxu0 %v11036_v53  ;;  %v8832_v53 = vld [vmem:[%s16173_s1 + $0x450] sm:$0xff]  ;;  %v8869_v43 = vld [vmem:[%s16173_s1 + $0x578] sm:$0xff]  ;;  %v8874_v57 = vld [vmem:[%s16173_s1 + $0x5a0] sm:$0xff] }
  0x8c   : > { %v11142_v55 = vpack.c.bf16 %v8832_v53, %v8830_v52  ;;  %v8873_v50 = vld [vmem:[%s16173_s1 + $0x598] sm:$0xff]  ;;  %v8872_v52 = vld [vmem:[%s16173_s1 + $0x590] sm:$0xff]  ;;  %v8878_v63 = vld [vmem:[%s16173_s1 + $0x5c0] sm:$0xff] }
  0x8d   : > { %v8877_v56 = vld [vmem:[%s16173_s1 + $0x5b8] sm:$0xff]  ;;  %v8754_v11 = vld [vmem:[%s16173_s1 + $0x200] sm:$0xff]  ;;  %v8763_v23 = vld [vmem:[%s16173_s1 + $0x248] sm:$0xff] }
  0x8e   : > { %11039 = vmatpush1.bf16.msra.mxu0 %v11038_v58  ;;  %v8834_v58 = vld [vmem:[%s16173_s1 + $0x460] sm:$0xff]  ;;  %v8881_v62 = vld [vmem:[%s16173_s1 + $0x5d8] sm:$0xff]  ;;  %v8764_v28 = vld [vmem:[%s16173_s1 + $0x250] sm:$0xff] }
  0x8f   : > { %11041 = vmatprep.subr.bf16.mxu0 %v11040_v59  ;;  %v8836_v59 = vld [vmem:[%s16173_s1 + $0x470] sm:$0xff]  ;;  %v8885_v4 = vld [vmem:[%s16173_s1 + $0x5f8] sm:$0xff]  ;;  %v8767_v29 = vld [vmem:[%s16173_s1 + $0x268] sm:$0xff] }
  0x90   : > { %v11146_v61 = vpack.c.bf16 %v8836_v59, %v8834_v58  ;;  %v8876_v58 = vld [vmem:[%s16173_s1 + $0x5b0] sm:$0xff]  ;;  %v8757_v10 = vld [vmem:[%s16173_s1 + $0x218] sm:$0xff] }
  0x92   : > { %11043 = vmatpush1.bf16.msra.mxu0 %v11042_v0  ;;  %v8838_v0 = vld [vmem:[%s16173_s1 + $0x480] sm:$0xff] }
  0x93   : > { %11045 = vmatprep.subr.bf16.mxu0 %v11044_v1  ;;  %v8840_v1 = vld [vmem:[%s16173_s1 + $0x490] sm:$0xff] }
  0x94   : > { %v11150_v3 = vpack.c.bf16 %v8840_v1, %v8838_v0  ;;  %v8880_v0 = vld [vmem:[%s16173_s1 + $0x5d0] sm:$0xff] }
  0x96   : > { %11047 = vmatpush1.bf16.msra.mxu0 %v11046_v6  ;;  %v8842_v6 = vld [vmem:[%s16173_s1 + $0x4a0] sm:$0xff] }
  0x97   : > { %11049 = vmatprep.subr.bf16.mxu0 %v11048_v7  ;;  %v8844_v7 = vld [vmem:[%s16173_s1 + $0x4b0] sm:$0xff] }
  0x98   : > { %v11154_v9 = vpack.c.bf16 %v8844_v7, %v8842_v6  ;;  %v8882_v6 = vld [vmem:[%s16173_s1 + $0x5e0] sm:$0xff]  ;;  %v8884_v7 = vld [vmem:[%s16173_s1 + $0x5f0] sm:$0xff] }
  0x9a   : > { %11051 = vmatpush1.bf16.msra.mxu0 %v11050_v12  ;;  %v8846_v12 = vld [vmem:[%s16173_s1 + $0x4c0] sm:$0xff] }
  0x9b   : > { %11053 = vmatprep.subr.bf16.mxu0 %v11052_v13  ;;  %v8848_v13 = vld [vmem:[%s16173_s1 + $0x4d0] sm:$0xff] }
  0x9c   : > { %v11158_v15 = vpack.c.bf16 %v8848_v13, %v8846_v12  ;;  %v8756_v12 = vld [vmem:[%s16173_s1 + $0x210] sm:$0xff]  ;;  %v8759_v13 = vld [vmem:[%s16173_s1 + $0x228] sm:$0xff] }
  0x9e   : > { %11055 = vmatpush1.bf16.msra.mxu0 %v11054_v18  ;;  %v8850_v18 = vld [vmem:[%s16173_s1 + $0x4e0] sm:$0xff] }
  0x9f   : > { %11057 = vmatprep.subr.bf16.mxu0 %v11056_v19  ;;  %v8852_v19 = vld [vmem:[%s16173_s1 + $0x4f0] sm:$0xff] }
  0xa0   : > { %v11162_v21 = vpack.c.bf16 %v8852_v19, %v8850_v18  ;;  %v710_v18 = vld [vmem:[%s16174_s2] sm:$0xff]  ;;  %v11070_v19 = vpack.c.bf16 %v8756_v12, %v8754_v11  ;;  %v8797_v11 = vld [vmem:[%s16173_s1 + $0x358] sm:$0xff] }
  0xa2   : > { %11059 = vmatpush1.bf16.msra.mxu0 %v11058_v24  ;;  %v8854_v24 = vld [vmem:[%s16173_s1 + $0x500] sm:$0xff] }
  0xa3   : > { %11061 = vmatprep.subr.bf16.mxu0 %v11060_v25  ;;  %v8856_v25 = vld [vmem:[%s16173_s1 + $0x510] sm:$0xff] }
  0xa4   : > { %v11166_v27 = vpack.c.bf16 %v8856_v25, %v8854_v24  ;;  %v8765_v24 = vld [vmem:[%s16173_s1 + $0x258] sm:$0xff] }
  0xa6   : > { %11063 = vmatpush1.bf16.msra.mxu0 %v11062_v30  ;;  %v8858_v30 = vld [vmem:[%s16173_s1 + $0x520] sm:$0xff] }
  0xa7   : > { %11065 = vmatprep.subr.bf16.mxu0 %v11064_v31  ;;  %v8860_v31 = vld [vmem:[%s16173_s1 + $0x530] sm:$0xff] }
  0xa8   : > { %v11170_v33 = vpack.c.bf16 %v8860_v31, %v8858_v30  ;;  %v8769_v30 = vld [vmem:[%s16173_s1 + $0x278] sm:$0xff] }
  0xaa   : > { %11067 = vmatpush1.bf16.msra.mxu0 %v11066_v34  ;;  %v8863_v34 = vld [vmem:[%s16173_s1 + $0x548] sm:$0xff] }
  0xab   : > { %11133 = vmatprep.subr.bf16.mxu0 %v11132_v40  ;;  %v11172_v39 = vpack.c.bf16 %v8865_v36, %v8863_v34  ;;  %v11174_v40 = vpack.c.bf16 %v8864_v38, %v8862_v37  ;;  %v8768_v34 = vld [vmem:[%s16173_s1 + $0x270] sm:$0xff]  ;;  %v8771_v36 = vld [vmem:[%s16173_s1 + $0x288] sm:$0xff]  ;;  %v8773_v37 = vld [vmem:[%s16173_s1 + $0x298] sm:$0xff] }
  0xad   : > { %704 = vmatmul.mubr.f32.vlgmr.msra.gmra.mrb[0].mxu0 %v12891_v42 }
  0xae   : > { %1144 = vmatprep.mubr.f32.mxu0 %v12901_v45  ;;  %11135 = vmatpush1.bf16.msra.mxu0 %v11134_v41  ;;  %v8867_v41 = vld [vmem:[%s16173_s1 + $0x568] sm:$0xff] }
  0xaf   : > { %11137 = vmatprep.subr.bf16.mxu0 %v11136_v48  ;;  %v11176_v47 = vpack.c.bf16 %v8869_v43, %v8867_v41  ;;  %v11178_v48 = vpack.c.bf16 %v8868_v46, %v8866_v44  ;;  %v8772_v41 = vld [vmem:[%s16173_s1 + $0x290] sm:$0xff]  ;;  %v8775_v43 = vld [vmem:[%s16173_s1 + $0x2a8] sm:$0xff]  ;;  %v8777_v44 = vld [vmem:[%s16173_s1 + $0x2b8] sm:$0xff] }
  0xb2   : > { %11139 = vmatpush1.bf16.msra.mxu0 %v11138_v49  ;;  %v8871_v49 = vld [vmem:[%s16173_s1 + $0x588] sm:$0xff] }
  0xb3   : > { %11141 = vmatprep.subr.bf16.mxu0 %v11140_v54  ;;  %v11180_v53 = vpack.c.bf16 %v8873_v50, %v8871_v49  ;;  %v11182_v54 = vpack.c.bf16 %v8872_v52, %v8870_v51  ;;  %v8776_v49 = vld [vmem:[%s16173_s1 + $0x2b0] sm:$0xff]  ;;  %v8779_v50 = vld [vmem:[%s16173_s1 + $0x2c8] sm:$0xff]  ;;  %v8781_v51 = vld [vmem:[%s16173_s1 + $0x2d8] sm:$0xff] }
  0xb6   : > { %11143 = vmatpush1.bf16.msra.mxu0 %v11142_v55  ;;  %v8875_v55 = vld [vmem:[%s16173_s1 + $0x5a8] sm:$0xff] }
  0xb7   : > { %11145 = vmatprep.subr.bf16.mxu0 %v11144_v60  ;;  %v11184_v59 = vpack.c.bf16 %v8877_v56, %v8875_v55  ;;  %v11186_v60 = vpack.c.bf16 %v8876_v58, %v8874_v57  ;;  %v8780_v55 = vld [vmem:[%s16173_s1 + $0x2d0] sm:$0xff]  ;;  %v8783_v56 = vld [vmem:[%s16173_s1 + $0x2e8] sm:$0xff]  ;;  %v8785_v57 = vld [vmem:[%s16173_s1 + $0x2f8] sm:$0xff] }
  0xba   : > { %11147 = vmatpush1.bf16.msra.mxu0 %v11146_v61  ;;  %v8879_v61 = vld [vmem:[%s16173_s1 + $0x5c8] sm:$0xff] }
  0xbb   : > { %11149 = vmatprep.subr.bf16.mxu0 %v11148_v2  ;;  %v11188_v1 = vpack.c.bf16 %v8881_v62, %v8879_v61  ;;  %v11190_v2 = vpack.c.bf16 %v8880_v0, %v8878_v63  ;;  %v8784_v61 = vld [vmem:[%s16173_s1 + $0x2f0] sm:$0xff]  ;;  %v8787_v62 = vld [vmem:[%s16173_s1 + $0x308] sm:$0xff]  ;;  %v8789_v63 = vld [vmem:[%s16173_s1 + $0x318] sm:$0xff] }
  0xbe   : > { %11151 = vmatpush1.bf16.msra.mxu0 %v11150_v3  ;;  %v8883_v3 = vld [vmem:[%s16173_s1 + $0x5e8] sm:$0xff] }
  0xbf   : > { %11153 = vmatprep.subr.bf16.mxu0 %v11152_v8  ;;  %v11192_v5 = vpack.c.bf16 %v8885_v4, %v8883_v3  ;;  %v11194_v8 = vpack.c.bf16 %v8884_v7, %v8882_v6  ;;  %v8788_v3 = vld [vmem:[%s16173_s1 + $0x310] sm:$0xff]  ;;  %v8791_v4 = vld [vmem:[%s16173_s1 + $0x328] sm:$0xff] }
  0xc2   : > { %11155 = vmatpush1.bf16.msra.mxu0 %v11154_v9  ;;  %v8755_v9 = vld [vmem:[%s16173_s1 + $0x208] sm:$0xff] }
  0xc3   : > { %11157 = vmatprep.subr.bf16.mxu0 %v11156_v14  ;;  %v8761_v14 = vld [vmem:[%s16173_s1 + $0x238] sm:$0xff]  ;;  %v11068_v16 = vpack.c.bf16 %v8757_v10, %v8755_v9  ;;  %v8792_v9 = vld [vmem:[%s16173_s1 + $0x330] sm:$0xff]  ;;  %v8795_v10 = vld [vmem:[%s16173_s1 + $0x348] sm:$0xff] }
  0xc6   : > { %11159 = vmatpush1.bf16.msra.mxu0 %v11158_v15 }
  0xc7   : > { %11161 = vmatprep.subr.bf16.mxu0 %v11160_v20  ;;  %v11072_v20 = vpack.c.bf16 %v8761_v14, %v8759_v13  ;;  %v11108_v13 = vpack.c.bf16 %v8797_v11, %v8795_v10  ;;  %v8794_v14 = vld [vmem:[%s16173_s1 + $0x340] sm:$0xff] }
  0xca   : > { %11163 = vmatpush1.bf16.msra.mxu0 %v11162_v21  ;;  %v8758_v21 = vld [vmem:[%s16173_s1 + $0x220] sm:$0xff] }
  0xcb   : > { %11165 = vmatprep.subr.bf16.mxu0 %v11164_v26  ;;  %v11074_v25 = vpack.c.bf16 %v8760_v22, %v8758_v21  ;;  %v11076_v26 = vpack.c.bf16 %v8765_v24, %v8763_v23  ;;  %v8800_v21 = vld [vmem:[%s16173_s1 + $0x370] sm:$0xff]  ;;  %v8803_v22 = vld [vmem:[%s16173_s1 + $0x388] sm:$0xff]  ;;  %v8805_v23 = vld [vmem:[%s16173_s1 + $0x398] sm:$0xff] }
  0xce   : > { %11167 = vmatpush1.bf16.msra.mxu0 %v11166_v27  ;;  %v8762_v27 = vld [vmem:[%s16173_s1 + $0x240] sm:$0xff] }
  0xcf   : > { %11169 = vmatprep.subr.bf16.mxu0 %v11168_v32  ;;  %v11078_v31 = vpack.c.bf16 %v8764_v28, %v8762_v27  ;;  %v11080_v32 = vpack.c.bf16 %v8769_v30, %v8767_v29  ;;  %v8804_v27 = vld [vmem:[%s16173_s1 + $0x390] sm:$0xff]  ;;  %v8807_v28 = vld [vmem:[%s16173_s1 + $0x3a8] sm:$0xff]  ;;  %v8809_v29 = vld [vmem:[%s16173_s1 + $0x3b8] sm:$0xff] }
  0xd2   : > { %11171 = vmatpush1.bf16.msra.mxu0 %v11170_v33  ;;  %v8766_v33 = vld [vmem:[%s16173_s1 + $0x260] sm:$0xff] }
  0xd3   : > { %11173 = vmatprep.subr.bf16.mxu0 %v11172_v39  ;;  %v11082_v38 = vpack.c.bf16 %v8768_v34, %v8766_v33  ;;  %v11084_v39 = vpack.c.bf16 %v8773_v37, %v8771_v36  ;;  %v8808_v33 = vld [vmem:[%s16173_s1 + $0x3b0] sm:$0xff]  ;;  %v8811_v34 = vld [vmem:[%s16173_s1 + $0x3c8] sm:$0xff]  ;;  %v8813_v36 = vld [vmem:[%s16173_s1 + $0x3d8] sm:$0xff] }
  0xd6   : > { %11175 = vmatpush1.bf16.msra.mxu0 %v11174_v40  ;;  %v8770_v40 = vld [vmem:[%s16173_s1 + $0x280] sm:$0xff] }
  0xd7   : > { %11177 = vmatprep.subr.bf16.mxu0 %v11176_v47  ;;  %v11086_v46 = vpack.c.bf16 %v8772_v41, %v8770_v40  ;;  %v11088_v47 = vpack.c.bf16 %v8777_v44, %v8775_v43  ;;  %v8812_v40 = vld [vmem:[%s16173_s1 + $0x3d0] sm:$0xff]  ;;  %v8815_v41 = vld [vmem:[%s16173_s1 + $0x3e8] sm:$0xff]  ;;  %v8817_v43 = vld [vmem:[%s16173_s1 + $0x3f8] sm:$0xff] }
  0xda   : > { %11179 = vmatpush1.bf16.msra.mxu0 %v11178_v48  ;;  %v8774_v48 = vld [vmem:[%s16173_s1 + $0x2a0] sm:$0xff] }
  0xdb   : > { %11181 = vmatprep.subr.bf16.mxu0 %v11180_v53  ;;  %v11090_v52 = vpack.c.bf16 %v8776_v49, %v8774_v48  ;;  %v11092_v53 = vpack.c.bf16 %v8781_v51, %v8779_v50  ;;  %v8816_v48 = vld [vmem:[%s16173_s1 + $0x3f0] sm:$0xff] }
  0xde   : > { %11183 = vmatpush1.bf16.msra.mxu0 %v11182_v54  ;;  %v8778_v54 = vld [vmem:[%s16173_s1 + $0x2c0] sm:$0xff] }
  0xdf   : > { %11185 = vmatprep.subr.bf16.mxu0 %v11184_v59  ;;  %v11094_v58 = vpack.c.bf16 %v8780_v55, %v8778_v54  ;;  %v11096_v59 = vpack.c.bf16 %v8785_v57, %v8783_v56  ;;  %v8958_v54 = vld [vmem:[%s16173_s1 + $0x800] sm:$0xff]  ;;  %v8960_v55 = vld [vmem:[%s16173_s1 + $0x810] sm:$0xff] }
  0xe0   : > { %v11262_v57 = vpack.c.bf16 %v8960_v55, %v8958_v54  ;;  %v9001_v54 = vld [vmem:[%s16173_s1 + $0x958] sm:$0xff]  ;;  %v8998_v55 = vld [vmem:[%s16173_s1 + $0x940] sm:$0xff] }
  0xe2   : > { %11187 = vmatpush1.bf16.msra.mxu0 %v11186_v60  ;;  %v8782_v60 = vld [vmem:[%s16173_s1 + $0x2e0] sm:$0xff] }
  0xe3   : > { %11189 = vmatprep.subr.bf16.mxu0 %v11188_v1  ;;  %v11098_v0 = vpack.c.bf16 %v8784_v61, %v8782_v60  ;;  %v11100_v1 = vpack.c.bf16 %v8789_v63, %v8787_v62  ;;  %v8962_v60 = vld [vmem:[%s16173_s1 + $0x820] sm:$0xff]  ;;  %v8964_v61 = vld [vmem:[%s16173_s1 + $0x830] sm:$0xff] }
  0xe4   : > { %v11266_v63 = vpack.c.bf16 %v8964_v61, %v8962_v60  ;;  %v9005_v60 = vld [vmem:[%s16173_s1 + $0x978] sm:$0xff]  ;;  %v9002_v61 = vld [vmem:[%s16173_s1 + $0x960] sm:$0xff] }
  0xe6   : > { %11191 = vmatpush1.bf16.msra.mxu0 %v11190_v2  ;;  %v8786_v2 = vld [vmem:[%s16173_s1 + $0x300] sm:$0xff] }
  0xe7   : > { %11193 = vmatprep.subr.bf16.mxu0 %v11192_v5  ;;  %v8793_v5 = vld [vmem:[%s16173_s1 + $0x338] sm:$0xff]  ;;  %v11102_v6 = vpack.c.bf16 %v8788_v3, %v8786_v2  ;;  %v8966_v2 = vld [vmem:[%s16173_s1 + $0x840] sm:$0xff]  ;;  %v8968_v3 = vld [vmem:[%s16173_s1 + $0x850] sm:$0xff] }
  0xe8   : > { %v11104_v7 = vpack.c.bf16 %v8793_v5, %v8791_v4  ;;  %v11270_v5 = vpack.c.bf16 %v8968_v3, %v8966_v2  ;;  %v9009_v2 = vld [vmem:[%s16173_s1 + $0x998] sm:$0xff]  ;;  %v9006_v3 = vld [vmem:[%s16173_s1 + $0x980] sm:$0xff] }
  0xea   : > { %11195 = vmatpush1.bf16.msra.mxu0 %v11194_v8  ;;  %v8790_v8 = vld [vmem:[%s16173_s1 + $0x320] sm:$0xff] }
  0xeb   : > { %v11106_v12 = vpack.c.bf16 %v8792_v9, %v8790_v8  ;;  %v8970_v8 = vld [vmem:[%s16173_s1 + $0x860] sm:$0xff]  ;;  %v8972_v9 = vld [vmem:[%s16173_s1 + $0x870] sm:$0xff] }
  0xec   : > { %v11274_v11 = vpack.c.bf16 %v8972_v9, %v8970_v8  ;;  %v9013_v8 = vld [vmem:[%s16173_s1 + $0x9b8] sm:$0xff]  ;;  %v9010_v9 = vld [vmem:[%s16173_s1 + $0x9a0] sm:$0xff] }
  0xed   : > { %1145 = vmatmul.mubr.f32.vlgmr.msra.gmra.mrb[2].mxu0 %v12891_v42 }
  0xee   : > { %1584 = vmatprep.mubr.f32.mxu0 %v12901_v45 }
 0x180   : > { %v705_v15 = vpop.f32.mrb[0].mxu0 }
 0x181   : > { %v707_v17 = vpop.f32.mrb[1].mxu0 }
 0x182   : > { %8751 = vmatprep.subr.msk.mxu1 %vm715_vm0, %v707_v17  ;;  %v8801_v17 = vld [vmem:[%s16173_s1 + $0x378] sm:$0xff] }
 0x183   : > { %8752 = vmatpush1.msk.msra.mxu1 %vm715_vm0, %v705_v15  ;;  %v8796_v15 = vld [vmem:[%s16173_s1 + $0x350] sm:$0xff] }
 0x184   : > { %11069 = vmatprep.subr.bf16.mxu1 %v11068_v16  ;;  %8753 = vmatmul.mubr.msk.f32.vlgmr.msra.gmra.mrb[0].mxu1 %vm711_vm1, %v710_v18  ;;  %v8799_v16 = vld [vmem:[%s16173_s1 + $0x368] sm:$0xff]  ;;  %v11110_v18 = vpack.c.bf16 %v8796_v15, %v8794_v14  ;;  %v8974_v14 = vld [vmem:[%s16173_s1 + $0x880] sm:$0xff]  ;;  %v8976_v15 = vld [vmem:[%s16173_s1 + $0x890] sm:$0xff] }
 0x185   : > { %11071 = vmatpush1.bf16.msra.mxu1 %v11070_v19  ;;  %924 = vmatprep.mubr.f32.mxu1 %v12901_v45  ;;  %v11112_v19 = vpack.c.bf16 %v8801_v17, %v8799_v16  ;;  %v11278_v17 = vpack.c.bf16 %v8976_v15, %v8974_v14  ;;  %v9017_v14 = vld [vmem:[%s16173_s1 + $0x9d8] sm:$0xff]  ;;  %v9014_v15 = vld [vmem:[%s16173_s1 + $0x9c0] sm:$0xff] }
 0x186   : > { %11073 = vmatprep.subr.bf16.mxu1 %v11072_v20  ;;  %v8798_v20 = vld [vmem:[%s16173_s1 + $0x360] sm:$0xff] }
 0x187   : > { %v11114_v24 = vpack.c.bf16 %v8800_v21, %v8798_v20  ;;  %v8978_v20 = vld [vmem:[%s16173_s1 + $0x8a0] sm:$0xff]  ;;  %v8980_v21 = vld [vmem:[%s16173_s1 + $0x8b0] sm:$0xff] }
 0x189   : > { %11075 = vmatpush1.bf16.msra.mxu1 %v11074_v25  ;;  %v11116_v25 = vpack.c.bf16 %v8805_v23, %v8803_v22  ;;  %v11282_v23 = vpack.c.bf16 %v8980_v21, %v8978_v20  ;;  %v9021_v20 = vld [vmem:[%s16173_s1 + $0x9f8] sm:$0xff] }
 0x18a   : > { %11077 = vmatprep.subr.bf16.mxu1 %v11076_v26  ;;  %v8802_v26 = vld [vmem:[%s16173_s1 + $0x380] sm:$0xff] }
 0x18b   : > { %v11118_v30 = vpack.c.bf16 %v8804_v27, %v8802_v26  ;;  %v8982_v26 = vld [vmem:[%s16173_s1 + $0x8c0] sm:$0xff]  ;;  %v8984_v27 = vld [vmem:[%s16173_s1 + $0x8d0] sm:$0xff] }
 0x18d   : > { %11079 = vmatpush1.bf16.msra.mxu1 %v11078_v31  ;;  %v11120_v31 = vpack.c.bf16 %v8809_v29, %v8807_v28  ;;  %v11286_v29 = vpack.c.bf16 %v8984_v27, %v8982_v26  ;;  %v8893_v26 = vld [vmem:[%s16173_s1 + $0x618] sm:$0xff] }
 0x18e   : > { %11081 = vmatprep.subr.bf16.mxu1 %v11080_v32  ;;  %v8806_v32 = vld [vmem:[%s16173_s1 + $0x3a0] sm:$0xff] }
 0x18f   : > { %v11122_v37 = vpack.c.bf16 %v8808_v33, %v8806_v32  ;;  %v8986_v32 = vld [vmem:[%s16173_s1 + $0x8e0] sm:$0xff]  ;;  %v8988_v33 = vld [vmem:[%s16173_s1 + $0x8f0] sm:$0xff] }
 0x191   : > { %11083 = vmatpush1.bf16.msra.mxu1 %v11082_v38  ;;  %v11124_v38 = vpack.c.bf16 %v8813_v36, %v8811_v34  ;;  %v11290_v36 = vpack.c.bf16 %v8988_v33, %v8986_v32  ;;  %v8895_v32 = vld [vmem:[%s16173_s1 + $0x628] sm:$0xff] }
 0x192   : > { %11085 = vmatprep.subr.bf16.mxu1 %v11084_v39  ;;  %v8810_v39 = vld [vmem:[%s16173_s1 + $0x3c0] sm:$0xff] }
 0x193   : > { %v11126_v44 = vpack.c.bf16 %v8812_v40, %v8810_v39  ;;  %v8990_v39 = vld [vmem:[%s16173_s1 + $0x900] sm:$0xff]  ;;  %v8992_v40 = vld [vmem:[%s16173_s1 + $0x910] sm:$0xff] }
 0x195   : > { %11087 = vmatpush1.bf16.msra.mxu1 %v11086_v46  ;;  %v11128_v46 = vpack.c.bf16 %v8817_v43, %v8815_v41  ;;  %v11294_v43 = vpack.c.bf16 %v8992_v40, %v8990_v39  ;;  %v8901_v39 = vld [vmem:[%s16173_s1 + $0x658] sm:$0xff] }
 0x196   : > { %11089 = vmatprep.subr.bf16.mxu1 %v11088_v47  ;;  %v8814_v47 = vld [vmem:[%s16173_s1 + $0x3e0] sm:$0xff] }
 0x197   : > { %v11130_v49 = vpack.c.bf16 %v8816_v48, %v8814_v47  ;;  %v8994_v47 = vld [vmem:[%s16173_s1 + $0x920] sm:$0xff]  ;;  %v8996_v48 = vld [vmem:[%s16173_s1 + $0x930] sm:$0xff] }
 0x199   : > { %11091 = vmatpush1.bf16.msra.mxu1 %v11090_v52  ;;  %v8959_v52 = vld [vmem:[%s16173_s1 + $0x808] sm:$0xff] }
 0x19a   : > { %11093 = vmatprep.subr.bf16.mxu1 %v11092_v53  ;;  %v8961_v53 = vld [vmem:[%s16173_s1 + $0x818] sm:$0xff] }
 0x19b   : > { %v11260_v56 = vpack.c.bf16 %v8961_v53, %v8959_v52  ;;  %v11298_v52 = vpack.c.bf16 %v8996_v48, %v8994_v47  ;;  %v8999_v53 = vld [vmem:[%s16173_s1 + $0x948] sm:$0xff]  ;;  %v8905_v47 = vld [vmem:[%s16173_s1 + $0x678] sm:$0xff] }
 0x19d   : > { %11095 = vmatpush1.bf16.msra.mxu1 %v11094_v58  ;;  %11261 = vmatprep.subr.bf16.mxu0 %v11260_v56  ;;  %v8963_v58 = vld [vmem:[%s16173_s1 + $0x828] sm:$0xff]  ;;  %v9000_v56 = vld [vmem:[%s16173_s1 + $0x950] sm:$0xff] }
 0x19e   : > { %11097 = vmatprep.subr.bf16.mxu1 %v11096_v59  ;;  %11263 = vmatpush1.bf16.msra.mxu0 %v11262_v57  ;;  %v8965_v59 = vld [vmem:[%s16173_s1 + $0x838] sm:$0xff]  ;;  %v11300_v57 = vpack.c.bf16 %v9001_v54, %v8999_v53  ;;  %v8904_v53 = vld [vmem:[%s16173_s1 + $0x670] sm:$0xff]  ;;  %v8907_v54 = vld [vmem:[%s16173_s1 + $0x688] sm:$0xff] }
 0x19f   : > { %v11264_v62 = vpack.c.bf16 %v8965_v59, %v8963_v58  ;;  %v11302_v58 = vpack.c.bf16 %v9000_v56, %v8998_v55  ;;  %v9003_v59 = vld [vmem:[%s16173_s1 + $0x968] sm:$0xff]  ;;  %v8909_v55 = vld [vmem:[%s16173_s1 + $0x698] sm:$0xff] }
 0x1a1   : > { %11099 = vmatpush1.bf16.msra.mxu1 %v11098_v0  ;;  %11265 = vmatprep.subr.bf16.mxu0 %v11264_v62  ;;  %v8967_v0 = vld [vmem:[%s16173_s1 + $0x848] sm:$0xff]  ;;  %v9004_v62 = vld [vmem:[%s16173_s1 + $0x970] sm:$0xff] }
 0x1a2   : > { %11101 = vmatprep.subr.bf16.mxu1 %v11100_v1  ;;  %11267 = vmatpush1.bf16.msra.mxu0 %v11266_v63  ;;  %v8969_v1 = vld [vmem:[%s16173_s1 + $0x858] sm:$0xff]  ;;  %v11304_v63 = vpack.c.bf16 %v9005_v60, %v9003_v59  ;;  %v8908_v59 = vld [vmem:[%s16173_s1 + $0x690] sm:$0xff]  ;;  %v8911_v60 = vld [vmem:[%s16173_s1 + $0x6a8] sm:$0xff] }
 0x1a3   : > { %v11268_v4 = vpack.c.bf16 %v8969_v1, %v8967_v0  ;;  %v11306_v0 = vpack.c.bf16 %v9004_v62, %v9002_v61  ;;  %v9007_v1 = vld [vmem:[%s16173_s1 + $0x988] sm:$0xff]  ;;  %v8913_v61 = vld [vmem:[%s16173_s1 + $0x6b8] sm:$0xff] }
 0x1a5   : > { %11103 = vmatpush1.bf16.msra.mxu1 %v11102_v6  ;;  %11269 = vmatprep.subr.bf16.mxu0 %v11268_v4  ;;  %v8971_v6 = vld [vmem:[%s16173_s1 + $0x868] sm:$0xff]  ;;  %v9008_v4 = vld [vmem:[%s16173_s1 + $0x990] sm:$0xff] }
 0x1a6   : > { %11105 = vmatprep.subr.bf16.mxu1 %v11104_v7  ;;  %11271 = vmatpush1.bf16.msra.mxu0 %v11270_v5  ;;  %v8973_v7 = vld [vmem:[%s16173_s1 + $0x878] sm:$0xff]  ;;  %v11308_v5 = vpack.c.bf16 %v9009_v2, %v9007_v1  ;;  %v8912_v1 = vld [vmem:[%s16173_s1 + $0x6b0] sm:$0xff]  ;;  %v8915_v2 = vld [vmem:[%s16173_s1 + $0x6c8] sm:$0xff] }
 0x1a7   : > { %v11272_v10 = vpack.c.bf16 %v8973_v7, %v8971_v6  ;;  %v11310_v6 = vpack.c.bf16 %v9008_v4, %v9006_v3  ;;  %v9011_v7 = vld [vmem:[%s16173_s1 + $0x9a8] sm:$0xff]  ;;  %v8917_v3 = vld [vmem:[%s16173_s1 + $0x6d8] sm:$0xff] }
 0x1a9   : > { %11107 = vmatpush1.bf16.msra.mxu1 %v11106_v12  ;;  %11273 = vmatprep.subr.bf16.mxu0 %v11272_v10  ;;  %v8975_v12 = vld [vmem:[%s16173_s1 + $0x888] sm:$0xff]  ;;  %v9012_v10 = vld [vmem:[%s16173_s1 + $0x9b0] sm:$0xff] }
 0x1aa   : > { %11109 = vmatprep.subr.bf16.mxu1 %v11108_v13  ;;  %11275 = vmatpush1.bf16.msra.mxu0 %v11274_v11  ;;  %v8977_v13 = vld [vmem:[%s16173_s1 + $0x898] sm:$0xff]  ;;  %v11312_v11 = vpack.c.bf16 %v9013_v8, %v9011_v7  ;;  %v8916_v7 = vld [vmem:[%s16173_s1 + $0x6d0] sm:$0xff]  ;;  %v8919_v8 = vld [vmem:[%s16173_s1 + $0x6e8] sm:$0xff] }
 0x1ab   : > { %v11276_v16 = vpack.c.bf16 %v8977_v13, %v8975_v12  ;;  %v11314_v12 = vpack.c.bf16 %v9012_v10, %v9010_v9  ;;  %v9015_v13 = vld [vmem:[%s16173_s1 + $0x9c8] sm:$0xff]  ;;  %v8921_v9 = vld [vmem:[%s16173_s1 + $0x6f8] sm:$0xff] }
 0x1ad   : > { %11111 = vmatpush1.bf16.msra.mxu1 %v11110_v18  ;;  %11277 = vmatprep.subr.bf16.mxu0 %v11276_v16  ;;  %v8979_v18 = vld [vmem:[%s16173_s1 + $0x8a8] sm:$0xff]  ;;  %v9016_v16 = vld [vmem:[%s16173_s1 + $0x9d0] sm:$0xff] }
 0x1ae   : > { %11113 = vmatprep.subr.bf16.mxu1 %v11112_v19  ;;  %11279 = vmatpush1.bf16.msra.mxu0 %v11278_v17  ;;  %v8981_v19 = vld [vmem:[%s16173_s1 + $0x8b8] sm:$0xff]  ;;  %v11316_v17 = vpack.c.bf16 %v9017_v14, %v9015_v13  ;;  %v8920_v13 = vld [vmem:[%s16173_s1 + $0x6f0] sm:$0xff]  ;;  %v8923_v14 = vld [vmem:[%s16173_s1 + $0x708] sm:$0xff] }
 0x1af   : > { %v11280_v22 = vpack.c.bf16 %v8981_v19, %v8979_v18  ;;  %v11318_v18 = vpack.c.bf16 %v9016_v16, %v9014_v15  ;;  %v9019_v19 = vld [vmem:[%s16173_s1 + $0x9e8] sm:$0xff]  ;;  %v8925_v15 = vld [vmem:[%s16173_s1 + $0x718] sm:$0xff] }
 0x1b0   : > { %v11320_v21 = vpack.c.bf16 %v9021_v20, %v9019_v19  ;;  %v8924_v19 = vld [vmem:[%s16173_s1 + $0x710] sm:$0xff]  ;;  %v8927_v20 = vld [vmem:[%s16173_s1 + $0x728] sm:$0xff] }
 0x1b1   : > { %11115 = vmatpush1.bf16.msra.mxu1 %v11114_v24  ;;  %11281 = vmatprep.subr.bf16.mxu0 %v11280_v22  ;;  %v8983_v24 = vld [vmem:[%s16173_s1 + $0x8c8] sm:$0xff]  ;;  %v9018_v22 = vld [vmem:[%s16173_s1 + $0x9e0] sm:$0xff] }
 0x1b2   : > { %11117 = vmatprep.subr.bf16.mxu1 %v11116_v25  ;;  %11283 = vmatpush1.bf16.msra.mxu0 %v11282_v23  ;;  %v8985_v25 = vld [vmem:[%s16173_s1 + $0x8d8] sm:$0xff]  ;;  %v9020_v23 = vld [vmem:[%s16173_s1 + $0x9f0] sm:$0xff] }
 0x1b3   : > { %v11284_v28 = vpack.c.bf16 %v8985_v25, %v8983_v24  ;;  %v11322_v24 = vpack.c.bf16 %v9020_v23, %v9018_v22  ;;  %v8891_v25 = vld [vmem:[%s16173_s1 + $0x608] sm:$0xff] }
 0x1b5   : > { %11119 = vmatpush1.bf16.msra.mxu1 %v11118_v30  ;;  %11285 = vmatprep.subr.bf16.mxu0 %v11284_v28  ;;  %v8987_v30 = vld [vmem:[%s16173_s1 + $0x8e8] sm:$0xff] }
 0x1b6   : > { %11121 = vmatprep.subr.bf16.mxu1 %v11120_v31  ;;  %11287 = vmatpush1.bf16.msra.mxu0 %v11286_v29  ;;  %v8989_v31 = vld [vmem:[%s16173_s1 + $0x8f8] sm:$0xff]  ;;  %v8818_v29 = vld [vmem:[%s16174_s2 + $0x8] sm:$0xff] }
 0x1b7   : > { %v11288_v34 = vpack.c.bf16 %v8989_v31, %v8987_v30  ;;  %v11196_v30 = vpack.c.bf16 %v8893_v26, %v8891_v25  ;;  %v8892_v31 = vld [vmem:[%s16173_s1 + $0x610] sm:$0xff]  ;;  %v8931_v26 = vld [vmem:[%s16173_s1 + $0x748] sm:$0xff] }
 0x1b8   : > { %v8928_v25 = vld [vmem:[%s16173_s1 + $0x730] sm:$0xff] }
 0x1b9   : > { %11123 = vmatpush1.bf16.msra.mxu1 %v11122_v37  ;;  %11289 = vmatprep.subr.bf16.mxu0 %v11288_v34  ;;  %v8991_v37 = vld [vmem:[%s16173_s1 + $0x908] sm:$0xff] }
 0x1ba   : > { %11125 = vmatprep.subr.bf16.mxu1 %v11124_v38  ;;  %11291 = vmatpush1.bf16.msra.mxu0 %v11290_v36  ;;  %v8993_v38 = vld [vmem:[%s16173_s1 + $0x918] sm:$0xff]  ;;  %v8894_v36 = vld [vmem:[%s16173_s1 + $0x620] sm:$0xff] }
 0x1bb   : > { %v11292_v41 = vpack.c.bf16 %v8993_v38, %v8991_v37  ;;  %v8896_v37 = vld [vmem:[%s16173_s1 + $0x630] sm:$0xff]  ;;  %v8899_v38 = vld [vmem:[%s16173_s1 + $0x648] sm:$0xff] }
 0x1bc   : > { %v11202_v40 = vpack.c.bf16 %v8896_v37, %v8894_v36  ;;  %v8939_v36 = vld [vmem:[%s16173_s1 + $0x788] sm:$0xff]  ;;  %v8941_v37 = vld [vmem:[%s16173_s1 + $0x798] sm:$0xff] }
 0x1bd   : > { %11127 = vmatpush1.bf16.msra.mxu1 %v11126_v44  ;;  %11293 = vmatprep.subr.bf16.mxu0 %v11292_v41  ;;  %v8995_v44 = vld [vmem:[%s16173_s1 + $0x928] sm:$0xff]  ;;  %v11204_v41 = vpack.c.bf16 %v8901_v39, %v8899_v38  ;;  %v11244_v39 = vpack.c.bf16 %v8941_v37, %v8939_v36 }
 0x1be   : > { %11129 = vmatprep.subr.bf16.mxu1 %v11128_v46  ;;  %11295 = vmatpush1.bf16.msra.mxu0 %v11294_v43  ;;  %v8997_v46 = vld [vmem:[%s16173_s1 + $0x938] sm:$0xff]  ;;  %v8898_v43 = vld [vmem:[%s16173_s1 + $0x640] sm:$0xff] }
 0x1c0   : > { %v13404_v50 = vpop.f32.mrb[2].mxu0 }
 0x1c1   : > { %11131 = vmatpush1.bf16.msra.mxu1 %v11130_v49  ;;  %v13406_v51 = vpop.f32.mrb[3].mxu0  ;;  %v11296_v49 = vpack.c.bf16 %v8997_v46, %v8995_v44  ;;  %v8900_v44 = vld [vmem:[%s16173_s1 + $0x650] sm:$0xff]  ;;  %v8903_v46 = vld [vmem:[%s16173_s1 + $0x668] sm:$0xff] }
 0x1c2   : > { %v11206_v48 = vpack.c.bf16 %v8900_v44, %v8898_v43  ;;  %v8943_v43 = vld [vmem:[%s16173_s1 + $0x7a8] sm:$0xff]  ;;  %v8945_v44 = vld [vmem:[%s16173_s1 + $0x7b8] sm:$0xff] }
 0x1c3   : > { %11297 = vmatprep.subr.bf16.mxu0 %v11296_v49  ;;  %v11208_v49 = vpack.c.bf16 %v8905_v47, %v8903_v46  ;;  %v11248_v47 = vpack.c.bf16 %v8945_v44, %v8943_v43 }
 0x1c4   : > { %925 = vmatmul.mubr.f32.vlgmr.msra.gmra.mrb[2].mxu1 %v12891_v42  ;;  %11299 = vmatpush1.bf16.msra.mxu0 %v11298_v52  ;;  %v8902_v52 = vld [vmem:[%s16173_s1 + $0x660] sm:$0xff] }
 0x1c5   : > { %1006 = vmatprep.mubr.f32.mxu1 %v12549_v35  ;;  %11301 = vmatprep.subr.bf16.mxu0 %v11300_v57  ;;  %v11210_v56 = vpack.c.bf16 %v8904_v53, %v8902_v52  ;;  %v11212_v57 = vpack.c.bf16 %v8909_v55, %v8907_v54  ;;  %v8947_v52 = vld [vmem:[%s16173_s1 + $0x7c8] sm:$0xff]  ;;  %v8949_v53 = vld [vmem:[%s16173_s1 + $0x7d8] sm:$0xff] }
 0x1c6   : > { %v11252_v55 = vpack.c.bf16 %v8949_v53, %v8947_v52 }
 0x1c8   : > { %11303 = vmatpush1.bf16.msra.mxu0 %v11302_v58  ;;  %v8906_v58 = vld [vmem:[%s16173_s1 + $0x680] sm:$0xff] }
 0x1c9   : > { %11305 = vmatprep.subr.bf16.mxu0 %v11304_v63  ;;  %v11214_v62 = vpack.c.bf16 %v8908_v59, %v8906_v58  ;;  %v11216_v63 = vpack.c.bf16 %v8913_v61, %v8911_v60  ;;  %v8951_v58 = vld [vmem:[%s16173_s1 + $0x7e8] sm:$0xff]  ;;  %v8953_v59 = vld [vmem:[%s16173_s1 + $0x7f8] sm:$0xff] }
 0x1ca   : > { %v11256_v61 = vpack.c.bf16 %v8953_v59, %v8951_v58 }
 0x1cc   : > { %11307 = vmatpush1.bf16.msra.mxu0 %v11306_v0  ;;  %v8910_v0 = vld [vmem:[%s16173_s1 + $0x6a0] sm:$0xff] }
 0x1cd   : > { %11309 = vmatprep.subr.bf16.mxu0 %v11308_v5  ;;  %v11218_v4 = vpack.c.bf16 %v8912_v1, %v8910_v0  ;;  %v11220_v5 = vpack.c.bf16 %v8917_v3, %v8915_v2  ;;  %v13811_v1 = vld [vmem:[%s12882_s16] sm:$0xff] }
 0x1d0   : > { %11311 = vmatpush1.bf16.msra.mxu0 %v11310_v6  ;;  %v8914_v6 = vld [vmem:[%s16173_s1 + $0x6c0] sm:$0xff] }
 0x1d1   : > { %11313 = vmatprep.subr.bf16.mxu0 %v11312_v11  ;;  %v11222_v10 = vpack.c.bf16 %v8916_v7, %v8914_v6  ;;  %v11224_v11 = vpack.c.bf16 %v8921_v9, %v8919_v8  ;;  %v9094_v6 = vld [vmem:[%s16173_s1 + $0xc00] sm:$0xff]  ;;  %v9096_v7 = vld [vmem:[%s16173_s1 + $0xc10] sm:$0xff] }
 0x1d2   : > { %v11390_v9 = vpack.c.bf16 %v9096_v7, %v9094_v6  ;;  %v9137_v6 = vld [vmem:[%s16173_s1 + $0xd58] sm:$0xff]  ;;  %v9134_v7 = vld [vmem:[%s16173_s1 + $0xd40] sm:$0xff] }
 0x1d4   : > { %11315 = vmatpush1.bf16.msra.mxu0 %v11314_v12  ;;  %v8918_v12 = vld [vmem:[%s16173_s1 + $0x6e0] sm:$0xff] }
 0x1d5   : > { %11317 = vmatprep.subr.bf16.mxu0 %v11316_v17  ;;  %v11226_v16 = vpack.c.bf16 %v8920_v13, %v8918_v12  ;;  %v11228_v17 = vpack.c.bf16 %v8925_v15, %v8923_v14  ;;  %v9098_v12 = vld [vmem:[%s16173_s1 + $0xc20] sm:$0xff]  ;;  %v9100_v13 = vld [vmem:[%s16173_s1 + $0xc30] sm:$0xff] }
 0x1d6   : > { %v11394_v15 = vpack.c.bf16 %v9100_v13, %v9098_v12  ;;  %v9141_v12 = vld [vmem:[%s16173_s1 + $0xd78] sm:$0xff]  ;;  %v9138_v13 = vld [vmem:[%s16173_s1 + $0xd60] sm:$0xff] }
 0x1d8   : > { %11319 = vmatpush1.bf16.msra.mxu0 %v11318_v18  ;;  %v8922_v18 = vld [vmem:[%s16173_s1 + $0x700] sm:$0xff] }
 0x1d9   : > { %11321 = vmatprep.subr.bf16.mxu0 %v11320_v21  ;;  %v8929_v21 = vld [vmem:[%s16173_s1 + $0x738] sm:$0xff]  ;;  %v11230_v22 = vpack.c.bf16 %v8924_v19, %v8922_v18  ;;  %v9102_v18 = vld [vmem:[%s16173_s1 + $0xc40] sm:$0xff]  ;;  %v9104_v19 = vld [vmem:[%s16173_s1 + $0xc50] sm:$0xff] }
 0x1da   : > { %v11232_v23 = vpack.c.bf16 %v8929_v21, %v8927_v20  ;;  %v11398_v21 = vpack.c.bf16 %v9104_v19, %v9102_v18  ;;  %v9145_v18 = vld [vmem:[%s16173_s1 + $0xd98] sm:$0xff]  ;;  %v9142_v19 = vld [vmem:[%s16173_s1 + $0xd80] sm:$0xff] }
 0x1dc   : > { %11323 = vmatpush1.bf16.msra.mxu0 %v11322_v24  ;;  %v8926_v24 = vld [vmem:[%s16173_s1 + $0x720] sm:$0xff] }
 0x1df   : > { %1585 = vmatmul.mubr.f32.vlgmr.msra.gmra.mrb[4].mxu0 %v12891_v42  ;;  %v8890_v42 = vld [vmem:[%s16173_s1 + $0x600] sm:$0xff] }
 0x1e0   : > { %2024 = vmatprep.mubr.f32.mxu0 %v12901_v45  ;;  %v11198_v33 = vpack.c.bf16 %v8892_v31, %v8890_v42  ;;  %v8932_v42 = vld [vmem:[%s16173_s1 + $0x750] sm:$0xff]  ;;  %v8935_v31 = vld [vmem:[%s16173_s1 + $0x768] sm:$0xff] }
 0x297   : > { %v926_v27 = vpop.f32.mrb[2].mxu1 }
 0x298   : > { %v928_v28 = vpop.f32.mrb[3].mxu1 }
 0x299   : > { %8819 = vmatprep.subr.msk.mxu1 %vm715_vm0, %v928_v28  ;;  %v11234_v28 = vpack.c.bf16 %v8928_v25, %v8926_v24  ;;  %v9106_v24 = vld [vmem:[%s16173_s1 + $0xc60] sm:$0xff]  ;;  %v9108_v25 = vld [vmem:[%s16173_s1 + $0xc70] sm:$0xff] }
 0x29a   : > { %8820 = vmatpush1.msk.msra.mxu1 %vm715_vm0, %v926_v27  ;;  %v8933_v27 = vld [vmem:[%s16173_s1 + $0x758] sm:$0xff] }
 0x29b   : > { %8821 = vmatmul.mubr.msk.f32.vlgmr.msra.gmra.mrb[0].mxu1 %vm711_vm1, %v8818_v29  ;;  %8887 = vmatprep.subr.msk.mxu1 %vm715_vm0, %v13406_v51  ;;  %v8897_v51 = vld [vmem:[%s16173_s1 + $0x638] sm:$0xff]  ;;  %v11236_v29 = vpack.c.bf16 %v8933_v27, %v8931_v26  ;;  %v11402_v27 = vpack.c.bf16 %v9108_v25, %v9106_v24  ;;  %v9146_v25 = vld [vmem:[%s16173_s1 + $0xda0] sm:$0xff] }
 0x29c   : > { %8888 = vmatpush1.msk.msra.mxu1 %vm715_vm0, %v13404_v50  ;;  %1226 = vmatprep.mubr.f32.mxu1 %v12549_v35  ;;  %v8886_v50 = vld [vmem:[%s16174_s2 + $0x10] sm:$0xff]  ;;  %v11200_v34 = vpack.c.bf16 %v8897_v51, %v8895_v32  ;;  %v8937_v32 = vld [vmem:[%s16173_s1 + $0x778] sm:$0xff] }
 0x29d   : > { %11197 = vmatprep.subr.bf16.mxu1 %v11196_v30  ;;  %v8930_v30 = vld [vmem:[%s16173_s1 + $0x740] sm:$0xff]  ;;  %v9149_v24 = vld [vmem:[%s16173_s1 + $0xdb8] sm:$0xff] }
 0x29e   : > { %v11238_v51 = vpack.c.bf16 %v8932_v42, %v8930_v30  ;;  %v9110_v30 = vld [vmem:[%s16173_s1 + $0xc80] sm:$0xff]  ;;  %v9112_v42 = vld [vmem:[%s16173_s1 + $0xc90] sm:$0xff] }
 0x2a3   : > { %8889 = vmatmul.mubr.msk.f32.vlgmr.msra.gmra.mrb[0].mxu1 %vm711_vm1, %v8886_v50  ;;  %v11240_v50 = vpack.c.bf16 %v8937_v32, %v8935_v31  ;;  %v11406_v32 = vpack.c.bf16 %v9112_v42, %v9110_v30  ;;  %v9153_v30 = vld [vmem:[%s16173_s1 + $0xdd8] sm:$0xff]  ;;  %v9150_v42 = vld [vmem:[%s16173_s1 + $0xdc0] sm:$0xff] }
 0x2a4   : > { %11199 = vmatpush1.bf16.msra.mxu1 %v11198_v33  ;;  %1364 = vmatprep.mubr.f32.mxu1 %v12901_v45  ;;  %v8934_v33 = vld [vmem:[%s16173_s1 + $0x760] sm:$0xff] }
 0x2a5   : > { %11201 = vmatprep.subr.bf16.mxu1 %v11200_v34  ;;  %v8936_v34 = vld [vmem:[%s16173_s1 + $0x770] sm:$0xff] }
 0x2a6   : > { %v11242_v38 = vpack.c.bf16 %v8936_v34, %v8934_v33  ;;  %v9114_v33 = vld [vmem:[%s16173_s1 + $0xca0] sm:$0xff]  ;;  %v9116_v34 = vld [vmem:[%s16173_s1 + $0xcb0] sm:$0xff] }
 0x2a7   : > { %v11410_v37 = vpack.c.bf16 %v9116_v34, %v9114_v33  ;;  %v9157_v33 = vld [vmem:[%s16173_s1 + $0xdf8] sm:$0xff] }
 0x2a8   : > { %11203 = vmatpush1.bf16.msra.mxu1 %v11202_v40  ;;  %v8938_v40 = vld [vmem:[%s16173_s1 + $0x780] sm:$0xff] }
 0x2a9   : > { %11205 = vmatprep.subr.bf16.mxu1 %v11204_v41  ;;  %v8940_v41 = vld [vmem:[%s16173_s1 + $0x790] sm:$0xff] }
 0x2aa   : > { %v11246_v46 = vpack.c.bf16 %v8940_v41, %v8938_v40  ;;  %v9118_v40 = vld [vmem:[%s16173_s1 + $0xcc0] sm:$0xff]  ;;  %v9120_v41 = vld [vmem:[%s16173_s1 + $0xcd0] sm:$0xff] }
 0x2ab   : > { %v11414_v44 = vpack.c.bf16 %v9120_v41, %v9118_v40  ;;  %v9029_v40 = vld [vmem:[%s16173_s1 + $0xa18] sm:$0xff] }
 0x2ac   : > { %11207 = vmatpush1.bf16.msra.mxu1 %v11206_v48  ;;  %v8942_v48 = vld [vmem:[%s16173_s1 + $0x7a0] sm:$0xff] }
 0x2ad   : > { %11209 = vmatprep.subr.bf16.mxu1 %v11208_v49  ;;  %v8944_v49 = vld [vmem:[%s16173_s1 + $0x7b0] sm:$0xff] }
 0x2ae   : > { %v11250_v54 = vpack.c.bf16 %v8944_v49, %v8942_v48  ;;  %v9122_v48 = vld [vmem:[%s16173_s1 + $0xce0] sm:$0xff]  ;;  %v9124_v49 = vld [vmem:[%s16173_s1 + $0xcf0] sm:$0xff] }
 0x2af   : > { %v11418_v53 = vpack.c.bf16 %v9124_v49, %v9122_v48  ;;  %v9028_v48 = vld [vmem:[%s16173_s1 + $0xa10] sm:$0xff]  ;;  %v9031_v49 = vld [vmem:[%s16173_s1 + $0xa28] sm:$0xff] }
 0x2b0   : > { %11211 = vmatpush1.bf16.msra.mxu1 %v11210_v56  ;;  %v8946_v56 = vld [vmem:[%s16173_s1 + $0x7c0] sm:$0xff] }
 0x2b1   : > { %11213 = vmatprep.subr.bf16.mxu1 %v11212_v57  ;;  %v8948_v57 = vld [vmem:[%s16173_s1 + $0x7d0] sm:$0xff] }
 0x2b2   : > { %v11254_v60 = vpack.c.bf16 %v8948_v57, %v8946_v56  ;;  %v13815_v2 = vpop.f32.mrb[4].mxu0  ;;  %v9126_v56 = vld [vmem:[%s16173_s1 + $0xd00] sm:$0xff]  ;;  %v9128_v57 = vld [vmem:[%s16173_s1 + $0xd10] sm:$0xff] }
 0x2b3   : > { %v13817_v3 = vpop.f32.mrb[5].mxu0  ;;  %v11422_v59 = vpack.c.bf16 %v9128_v57, %v9126_v56  ;;  %v9035_v56 = vld [vmem:[%s16173_s1 + $0xa48] sm:$0xff]  ;;  %v9037_v57 = vld [vmem:[%s16173_s1 + $0xa58] sm:$0xff] }
 0x2b4   : > { %11215 = vmatpush1.bf16.msra.mxu1 %v11214_v62  ;;  %v8950_v62 = vld [vmem:[%s16173_s1 + $0x7e0] sm:$0xff] }
 0x2b5   : > { %11217 = vmatprep.subr.bf16.mxu1 %v11216_v63  ;;  %v8952_v63 = vld [vmem:[%s16173_s1 + $0x7f0] sm:$0xff] }
 0x2b6   : > { %v11258_v0 = vpack.c.bf16 %v8952_v63, %v8950_v62  ;;  %v9130_v62 = vld [vmem:[%s16173_s1 + $0xd20] sm:$0xff]  ;;  %v9132_v63 = vld [vmem:[%s16173_s1 + $0xd30] sm:$0xff] }
 0x2b8   : > { %11219 = vmatpush1.bf16.msra.mxu1 %v11218_v4  ;;  %v9095_v4 = vld [vmem:[%s16173_s1 + $0xc08] sm:$0xff] }
 0x2b9   : > { %11221 = vmatprep.subr.bf16.mxu1 %v11220_v5  ;;  %v9097_v5 = vld [vmem:[%s16173_s1 + $0xc18] sm:$0xff] }
 0x2ba   : > { %v11388_v8 = vpack.c.bf16 %v9097_v5, %v9095_v4  ;;  %v11426_v4 = vpack.c.bf16 %v9132_v63, %v9130_v62  ;;  %v9135_v5 = vld [vmem:[%s16173_s1 + $0xd48] sm:$0xff]  ;;  %v9041_v63 = vld [vmem:[%s16173_s1 + $0xa78] sm:$0xff] }
 0x2bb   : > { %v9039_v62 = vld [vmem:[%s16173_s1 + $0xa68] sm:$0xff] }
 0x2bc   : > { %11223 = vmatpush1.bf16.msra.mxu1 %v11222_v10  ;;  %11389 = vmatprep.subr.bf16.mxu0 %v11388_v8  ;;  %v9099_v10 = vld [vmem:[%s16173_s1 + $0xc28] sm:$0xff]  ;;  %v9136_v8 = vld [vmem:[%s16173_s1 + $0xd50] sm:$0xff] }
 0x2bd   : > { %11225 = vmatprep.subr.bf16.mxu1 %v11224_v11  ;;  %11391 = vmatpush1.bf16.msra.mxu0 %v11390_v9  ;;  %v9101_v11 = vld [vmem:[%s16173_s1 + $0xc38] sm:$0xff]  ;;  %v11428_v9 = vpack.c.bf16 %v9137_v6, %v9135_v5  ;;  %v9038_v5 = vld [vmem:[%s16173_s1 + $0xa60] sm:$0xff]  ;;  %v9040_v6 = vld [vmem:[%s16173_s1 + $0xa70] sm:$0xff] }
 0x2be   : > { %v11392_v14 = vpack.c.bf16 %v9101_v11, %v9099_v10  ;;  %v11430_v10 = vpack.c.bf16 %v9136_v8, %v9134_v7  ;;  %v9139_v11 = vld [vmem:[%s16173_s1 + $0xd68] sm:$0xff]  ;;  %v9045_v8 = vld [vmem:[%s16173_s1 + $0xa98] sm:$0xff] }
 0x2bf   : > { %v9043_v7 = vld [vmem:[%s16173_s1 + $0xa88] sm:$0xff] }
 0x2c0   : > { %11227 = vmatpush1.bf16.msra.mxu1 %v11226_v16  ;;  %11393 = vmatprep.subr.bf16.mxu0 %v11392_v14  ;;  %v9103_v16 = vld [vmem:[%s16173_s1 + $0xc48] sm:$0xff]  ;;  %v9140_v14 = vld [vmem:[%s16173_s1 + $0xd70] sm:$0xff] }
 0x2c1   : > { %11229 = vmatprep.subr.bf16.mxu1 %v11228_v17  ;;  %11395 = vmatpush1.bf16.msra.mxu0 %v11394_v15  ;;  %v9105_v17 = vld [vmem:[%s16173_s1 + $0xc58] sm:$0xff]  ;;  %v11432_v15 = vpack.c.bf16 %v9141_v12, %v9139_v11  ;;  %v9042_v11 = vld [vmem:[%s16173_s1 + $0xa80] sm:$0xff]  ;;  %v9044_v12 = vld [vmem:[%s16173_s1 + $0xa90] sm:$0xff] }
 0x2c2   : > { %v11396_v20 = vpack.c.bf16 %v9105_v17, %v9103_v16  ;;  %v11434_v16 = vpack.c.bf16 %v9140_v14, %v9138_v13  ;;  %v9143_v17 = vld [vmem:[%s16173_s1 + $0xd88] sm:$0xff]  ;;  %v9049_v14 = vld [vmem:[%s16173_s1 + $0xab8] sm:$0xff] }
 0x2c3   : > { %v9047_v13 = vld [vmem:[%s16173_s1 + $0xaa8] sm:$0xff] }
 0x2c4   : > { %11231 = vmatpush1.bf16.msra.mxu1 %v11230_v22  ;;  %11397 = vmatprep.subr.bf16.mxu0 %v11396_v20  ;;  %v9107_v22 = vld [vmem:[%s16173_s1 + $0xc68] sm:$0xff]  ;;  %v9144_v20 = vld [vmem:[%s16173_s1 + $0xd90] sm:$0xff] }
 0x2c5   : > { %11233 = vmatprep.subr.bf16.mxu1 %v11232_v23  ;;  %11399 = vmatpush1.bf16.msra.mxu0 %v11398_v21  ;;  %v9109_v23 = vld [vmem:[%s16173_s1 + $0xc78] sm:$0xff]  ;;  %v11436_v21 = vpack.c.bf16 %v9145_v18, %v9143_v17  ;;  %v9046_v17 = vld [vmem:[%s16173_s1 + $0xaa0] sm:$0xff]  ;;  %v9048_v18 = vld [vmem:[%s16173_s1 + $0xab0] sm:$0xff] }
 0x2c6   : > { %v11400_v26 = vpack.c.bf16 %v9109_v23, %v9107_v22  ;;  %v11438_v22 = vpack.c.bf16 %v9144_v20, %v9142_v19  ;;  %v9147_v23 = vld [vmem:[%s16173_s1 + $0xda8] sm:$0xff]  ;;  %v9053_v20 = vld [vmem:[%s16173_s1 + $0xad8] sm:$0xff] }
 0x2c7   : > { %v9051_v19 = vld [vmem:[%s16173_s1 + $0xac8] sm:$0xff] }
 0x2c8   : > { %11235 = vmatpush1.bf16.msra.mxu1 %v11234_v28  ;;  %11401 = vmatprep.subr.bf16.mxu0 %v11400_v26  ;;  %v9111_v28 = vld [vmem:[%s16173_s1 + $0xc88] sm:$0xff]  ;;  %v9148_v26 = vld [vmem:[%s16173_s1 + $0xdb0] sm:$0xff] }
 0x2c9   : > { %11237 = vmatprep.subr.bf16.mxu1 %v11236_v29  ;;  %11403 = vmatpush1.bf16.msra.mxu0 %v11402_v27  ;;  %v9113_v29 = vld [vmem:[%s16173_s1 + $0xc98] sm:$0xff]  ;;  %v11440_v27 = vpack.c.bf16 %v9149_v24, %v9147_v23  ;;  %v9050_v23 = vld [vmem:[%s16173_s1 + $0xac0] sm:$0xff]  ;;  %v9052_v24 = vld [vmem:[%s16173_s1 + $0xad0] sm:$0xff] }
 0x2ca   : > { %v11404_v31 = vpack.c.bf16 %v9113_v29, %v9111_v28  ;;  %v11442_v28 = vpack.c.bf16 %v9148_v26, %v9146_v25  ;;  %v9151_v29 = vld [vmem:[%s16173_s1 + $0xdc8] sm:$0xff]  ;;  %v9057_v26 = vld [vmem:[%s16173_s1 + $0xaf8] sm:$0xff] }
 0x2cb   : > { %v9055_v25 = vld [vmem:[%s16173_s1 + $0xae8] sm:$0xff] }
 0x2cc   : > { %11239 = vmatpush1.bf16.msra.mxu1 %v11238_v51  ;;  %11405 = vmatprep.subr.bf16.mxu0 %v11404_v31  ;;  %v9115_v51 = vld [vmem:[%s16173_s1 + $0xca8] sm:$0xff]  ;;  %v9152_v31 = vld [vmem:[%s16173_s1 + $0xdd0] sm:$0xff] }
 0x2cd   : > { %11241 = vmatprep.subr.bf16.mxu1 %v11240_v50  ;;  %11407 = vmatpush1.bf16.msra.mxu0 %v11406_v32  ;;  %v9117_v50 = vld [vmem:[%s16173_s1 + $0xcb8] sm:$0xff]  ;;  %v11444_v32 = vpack.c.bf16 %v9153_v30, %v9151_v29  ;;  %v9054_v29 = vld [vmem:[%s16173_s1 + $0xae0] sm:$0xff]  ;;  %v9056_v30 = vld [vmem:[%s16173_s1 + $0xaf0] sm:$0xff] }
 0x2ce   : > { %v11408_v36 = vpack.c.bf16 %v9117_v50, %v9115_v51  ;;  %v11446_v51 = vpack.c.bf16 %v9152_v31, %v9150_v42  ;;  %v9155_v50 = vld [vmem:[%s16173_s1 + $0xde8] sm:$0xff]  ;;  %v9061_v31 = vld [vmem:[%s16173_s1 + $0xb18] sm:$0xff] }
 0x2cf   : > { %v11448_v34 = vpack.c.bf16 %v9157_v33, %v9155_v50  ;;  %v9059_v42 = vld [vmem:[%s16173_s1 + $0xb08] sm:$0xff]  ;;  %v9058_v50 = vld [vmem:[%s16173_s1 + $0xb00] sm:$0xff]  ;;  %v9060_v33 = vld [vmem:[%s16173_s1 + $0xb10] sm:$0xff] }
 0x2d0   : > { %11243 = vmatpush1.bf16.msra.mxu1 %v11242_v38  ;;  %11409 = vmatprep.subr.bf16.mxu0 %v11408_v36  ;;  %v9119_v38 = vld [vmem:[%s16173_s1 + $0xcc8] sm:$0xff]  ;;  %v9154_v36 = vld [vmem:[%s16173_s1 + $0xde0] sm:$0xff] }
 0x2d1   : > { %11245 = vmatprep.subr.bf16.mxu1 %v11244_v39  ;;  %11411 = vmatpush1.bf16.msra.mxu0 %v11410_v37  ;;  %v9121_v39 = vld [vmem:[%s16173_s1 + $0xcd8] sm:$0xff]  ;;  %v9156_v37 = vld [vmem:[%s16173_s1 + $0xdf0] sm:$0xff] }
 0x2d2   : > { %v11412_v43 = vpack.c.bf16 %v9121_v39, %v9119_v38  ;;  %v11450_v38 = vpack.c.bf16 %v9156_v37, %v9154_v36  ;;  %v9027_v39 = vld [vmem:[%s16173_s1 + $0xa08] sm:$0xff]  ;;  %v9065_v36 = vld [vmem:[%s16173_s1 + $0xb38] sm:$0xff]  ;;  %v11358_v37 = vpack.c.bf16 %v9060_v33, %v9058_v50  ;;  %v9238_v33 = vld [vmem:[%s16173_s1 + $0x1040] sm:$0xff] }
 0x2d4   : > { %11247 = vmatpush1.bf16.msra.mxu1 %v11246_v46  ;;  %11413 = vmatprep.subr.bf16.mxu0 %v11412_v43  ;;  %v9123_v46 = vld [vmem:[%s16173_s1 + $0xce8] sm:$0xff] }
 0x2d5   : > { %11249 = vmatprep.subr.bf16.mxu1 %v11248_v47  ;;  %11415 = vmatpush1.bf16.msra.mxu0 %v11414_v44  ;;  %v9125_v47 = vld [vmem:[%s16173_s1 + $0xcf8] sm:$0xff] }
 0x2d6   : > { %v11416_v52 = vpack.c.bf16 %v9125_v47, %v9123_v46  ;;  %v8954_v44 = vld [vmem:[%s16174_s2 + $0x18] sm:$0xff]  ;;  %v11324_v46 = vpack.c.bf16 %v9029_v40, %v9027_v39  ;;  %v9026_v47 = vld [vmem:[%s16173_s1 + $0xa00] sm:$0xff]  ;;  %v9064_v40 = vld [vmem:[%s16173_s1 + $0xb30] sm:$0xff] }
 0x2d7   : > { %v9062_v39 = vld [vmem:[%s16173_s1 + $0xb20] sm:$0xff] }
 0x2d8   : > { %11251 = vmatpush1.bf16.msra.mxu1 %v11250_v54  ;;  %11417 = vmatprep.subr.bf16.mxu0 %v11416_v52  ;;  %v9127_v54 = vld [vmem:[%s16173_s1 + $0xd08] sm:$0xff]  ;;  %v11326_v52 = vpack.c.bf16 %v9028_v48, %v9026_v47  ;;  %v9066_v47 = vld [vmem:[%s16173_s1 + $0xb40] sm:$0xff]  ;;  %v9068_v48 = vld [vmem:[%s16173_s1 + $0xb50] sm:$0xff] }
 0x2d9   : > { %11253 = vmatprep.subr.bf16.mxu1 %v11252_v55  ;;  %11419 = vmatpush1.bf16.msra.mxu0 %v11418_v53  ;;  %v9129_v55 = vld [vmem:[%s16173_s1 + $0xd18] sm:$0xff] }
 0x2da   : > { %v11420_v58 = vpack.c.bf16 %v9129_v55, %v9127_v54  ;;  %v9030_v54 = vld [vmem:[%s16173_s1 + $0xa20] sm:$0xff]  ;;  %v9032_v55 = vld [vmem:[%s16173_s1 + $0xa30] sm:$0xff] }
 0x2dc   : > { %11255 = vmatpush1.bf16.msra.mxu1 %v11254_v60  ;;  %11421 = vmatprep.subr.bf16.mxu0 %v11420_v58  ;;  %v9131_v60 = vld [vmem:[%s16173_s1 + $0xd28] sm:$0xff]  ;;  %v11330_v58 = vpack.c.bf16 %v9032_v55, %v9030_v54  ;;  %v9072_v54 = vld [vmem:[%s16173_s1 + $0xb70] sm:$0xff] }
 0x2dd   : > { %11257 = vmatprep.subr.bf16.mxu1 %v11256_v61  ;;  %11423 = vmatpush1.bf16.msra.mxu0 %v11422_v59  ;;  %v9133_v61 = vld [vmem:[%s16173_s1 + $0xd38] sm:$0xff]  ;;  %v11332_v59 = vpack.c.bf16 %v9037_v57, %v9035_v56  ;;  %v9075_v55 = vld [vmem:[%s16173_s1 + $0xb88] sm:$0xff] }
 0x2de   : > { %v9077_v56 = vld [vmem:[%s16173_s1 + $0xb98] sm:$0xff] }
 0x2e0   : > { %11259 = vmatpush1.bf16.msra.mxu1 %v11258_v0  ;;  %v11424_v0 = vpack.c.bf16 %v9133_v61, %v9131_v60  ;;  %v9034_v60 = vld [vmem:[%s16173_s1 + $0xa40] sm:$0xff]  ;;  %v9036_v61 = vld [vmem:[%s16173_s1 + $0xa50] sm:$0xff] }
 0x2e2   : > { %11425 = vmatprep.subr.bf16.mxu0 %v11424_v0  ;;  %v11334_v0 = vpack.c.bf16 %v9036_v61, %v9034_v60  ;;  %v9076_v60 = vld [vmem:[%s16173_s1 + $0xb90] sm:$0xff]  ;;  %v9079_v61 = vld [vmem:[%s16173_s1 + $0xba8] sm:$0xff] }
 0x2e3   : > { %1365 = vmatmul.mubr.f32.vlgmr.msra.gmra.mrb[4].mxu1 %v13811_v1  ;;  %11427 = vmatpush1.bf16.msra.mxu0 %v11426_v4  ;;  %v11336_v4 = vpack.c.bf16 %v9041_v63, %v9039_v62  ;;  %v9081_v62 = vld [vmem:[%s16173_s1 + $0xbb8] sm:$0xff] }
 0x2e4   : > { %1446 = vmatprep.mubr.f32.mxu1 %v12549_v35  ;;  %11429 = vmatprep.subr.bf16.mxu0 %v11428_v9  ;;  %v11338_v9 = vpack.c.bf16 %v9040_v6, %v9038_v5  ;;  %v9080_v5 = vld [vmem:[%s16173_s1 + $0xbb0] sm:$0xff]  ;;  %v9083_v6 = vld [vmem:[%s16173_s1 + $0xbc8] sm:$0xff] }
 0x2e7   : > { %11431 = vmatpush1.bf16.msra.mxu0 %v11430_v10  ;;  %v11340_v10 = vpack.c.bf16 %v9045_v8, %v9043_v7  ;;  %v9085_v7 = vld [vmem:[%s16173_s1 + $0xbd8] sm:$0xff] }
 0x2e8   : > { %11433 = vmatprep.subr.bf16.mxu0 %v11432_v15  ;;  %v11342_v15 = vpack.c.bf16 %v9044_v12, %v9042_v11  ;;  %v9084_v11 = vld [vmem:[%s16173_s1 + $0xbd0] sm:$0xff]  ;;  %v9087_v12 = vld [vmem:[%s16173_s1 + $0xbe8] sm:$0xff] }
 0x2eb   : > { %11435 = vmatpush1.bf16.msra.mxu0 %v11434_v16  ;;  %v11344_v16 = vpack.c.bf16 %v9049_v14, %v9047_v13  ;;  %v9089_v13 = vld [vmem:[%s16173_s1 + $0xbf8] sm:$0xff] }
 0x2ec   : > { %11437 = vmatprep.subr.bf16.mxu0 %v11436_v21  ;;  %v11346_v21 = vpack.c.bf16 %v9048_v18, %v9046_v17  ;;  %v9088_v17 = vld [vmem:[%s16173_s1 + $0xbf0] sm:$0xff] }
 0x2ef   : > { %11439 = vmatpush1.bf16.msra.mxu0 %v11438_v22  ;;  %v11348_v22 = vpack.c.bf16 %v9053_v20, %v9051_v19 }
 0x2f0   : > { %11441 = vmatprep.subr.bf16.mxu0 %v11440_v27  ;;  %v11350_v27 = vpack.c.bf16 %v9052_v24, %v9050_v23  ;;  %v9230_v24 = vld [vmem:[%s16173_s1 + $0x1000] sm:$0xff] }
 0x2f3   : > { %11443 = vmatpush1.bf16.msra.mxu0 %v11442_v28  ;;  %v11352_v28 = vpack.c.bf16 %v9057_v26, %v9055_v25  ;;  %v9232_v25 = vld [vmem:[%s16173_s1 + $0x1010] sm:$0xff] }
 0x2f4   : > { %11445 = vmatprep.subr.bf16.mxu0 %v11444_v32  ;;  %v11354_v32 = vpack.c.bf16 %v9056_v30, %v9054_v29  ;;  %v11518_v26 = vpack.c.bf16 %v9232_v25, %v9230_v24  ;;  %v9234_v30 = vld [vmem:[%s16173_s1 + $0x1020] sm:$0xff] }
 0x2f5   : > { %v9270_v25 = vld [vmem:[%s16173_s1 + $0x1140] sm:$0xff] }
 0x2f7   : > { %11447 = vmatpush1.bf16.msra.mxu0 %v11446_v51  ;;  %v11356_v51 = vpack.c.bf16 %v9061_v31, %v9059_v42  ;;  %v9236_v42 = vld [vmem:[%s16173_s1 + $0x1030] sm:$0xff] }
 0x2f8   : > { %11449 = vmatprep.subr.bf16.mxu0 %v11448_v34  ;;  %v9063_v34 = vld [vmem:[%s16173_s1 + $0xb28] sm:$0xff]  ;;  %v11522_v31 = vpack.c.bf16 %v9236_v42, %v9234_v30  ;;  %v9274_v42 = vld [vmem:[%s16173_s1 + $0x1160] sm:$0xff] }
 0x2fb   : > { %11451 = vmatpush1.bf16.msra.mxu0 %v11450_v38  ;;  %v11360_v38 = vpack.c.bf16 %v9065_v36, %v9063_v34  ;;  %v9240_v34 = vld [vmem:[%s16173_s1 + $0x1050] sm:$0xff] }
 0x2fc   : > { %v11526_v36 = vpack.c.bf16 %v9240_v34, %v9238_v33  ;;  %v9278_v34 = vld [vmem:[%s16173_s1 + $0x1180] sm:$0xff] }
 0x2fe   : > { %2025 = vmatmul.mubr.f32.vlgmr.msra.gmra.mrb[6].mxu0 %v13811_v1 }
 0x2ff   : > { %2464 = vmatprep.mubr.f32.mxu0 %v12901_v45 }
 0x3b6   : > { %v1366_v41 = vpop.f32.mrb[4].mxu1 }
 0x3b7   : > { %v1368_v43 = vpop.f32.mrb[5].mxu1 }
 0x3b8   : > { %8955 = vmatprep.subr.msk.mxu1 %vm715_vm0, %v1368_v43  ;;  %v9069_v43 = vld [vmem:[%s16173_s1 + $0xb58] sm:$0xff] }
 0x3b9   : > { %8956 = vmatpush1.msk.msra.mxu1 %vm715_vm0, %v1366_v41  ;;  %v9067_v41 = vld [vmem:[%s16173_s1 + $0xb48] sm:$0xff] }
 0x3ba   : > { %8957 = vmatmul.mubr.msk.f32.vlgmr.msra.gmra.mrb[0].mxu1 %vm711_vm1, %v8954_v44  ;;  %9023 = vmatprep.subr.msk.mxu1 %vm715_vm0, %v13817_v3  ;;  %v9033_v3 = vld [vmem:[%s16173_s1 + $0xa38] sm:$0xff]  ;;  %v11362_v44 = vpack.c.bf16 %v9064_v40, %v9062_v39  ;;  %v9242_v40 = vld [vmem:[%s16173_s1 + $0x1060] sm:$0xff] }
 0x3bb   : > { %9024 = vmatpush1.msk.msra.mxu1 %vm715_vm0, %v13815_v2  ;;  %1666 = vmatprep.mubr.f32.mxu1 %v12549_v35  ;;  %v9022_v2 = vld [vmem:[%s16174_s2 + $0x20] sm:$0xff]  ;;  %v11328_v53 = vpack.c.bf16 %v9033_v3, %v9031_v49  ;;  %v9071_v49 = vld [vmem:[%s16173_s1 + $0xb68] sm:$0xff]  ;;  %v9073_v3 = vld [vmem:[%s16173_s1 + $0xb78] sm:$0xff] }
 0x3bc   : > { %11325 = vmatprep.subr.bf16.mxu1 %v11324_v46  ;;  %v11364_v46 = vpack.c.bf16 %v9069_v43, %v9067_v41  ;;  %v9244_v41 = vld [vmem:[%s16173_s1 + $0x1070] sm:$0xff] }
 0x3bd   : > { %v11530_v43 = vpack.c.bf16 %v9244_v41, %v9242_v40  ;;  %v9282_v41 = vld [vmem:[%s16173_s1 + $0x11a0] sm:$0xff] }
 0x3c2   : > { %9025 = vmatmul.mubr.msk.f32.vlgmr.msra.gmra.mrb[0].mxu1 %vm711_vm1, %v9022_v2  ;;  %v11366_v2 = vpack.c.bf16 %v9068_v48, %v9066_v47  ;;  %v9246_v48 = vld [vmem:[%s16173_s1 + $0x1080] sm:$0xff] }
 0x3c3   : > { %11327 = vmatpush1.bf16.msra.mxu1 %v11326_v52  ;;  %1804 = vmatprep.mubr.f32.mxu1 %v12901_v45  ;;  %v11368_v52 = vpack.c.bf16 %v9073_v3, %v9071_v49  ;;  %v9248_v49 = vld [vmem:[%s16173_s1 + $0x1090] sm:$0xff] }
 0x3c4   : > { %11329 = vmatprep.subr.bf16.mxu1 %v11328_v53  ;;  %v9070_v53 = vld [vmem:[%s16173_s1 + $0xb60] sm:$0xff]  ;;  %v11534_v3 = vpack.c.bf16 %v9248_v49, %v9246_v48 }
 0x3c5   : > { %v11370_v57 = vpack.c.bf16 %v9072_v54, %v9070_v53  ;;  %v9250_v54 = vld [vmem:[%s16173_s1 + $0x10a0] sm:$0xff] }
 0x3c6   : > { %v9286_v49 = vld [vmem:[%s16173_s1 + $0x11c0] sm:$0xff] }
 0x3c7   : > { %11331 = vmatpush1.bf16.msra.mxu1 %v11330_v58  ;;  %v11372_v58 = vpack.c.bf16 %v9077_v56, %v9075_v55  ;;  %v9252_v55 = vld [vmem:[%s16173_s1 + $0x10b0] sm:$0xff] }
 0x3c8   : > { %11333 = vmatprep.subr.bf16.mxu1 %v11332_v59  ;;  %v9074_v59 = vld [vmem:[%s16173_s1 + $0xb80] sm:$0xff]  ;;  %v11538_v56 = vpack.c.bf16 %v9252_v55, %v9250_v54 }
 0x3c9   : > { %v11374_v63 = vpack.c.bf16 %v9076_v60, %v9074_v59  ;;  %v9254_v60 = vld [vmem:[%s16173_s1 + $0x10c0] sm:$0xff] }
 0x3ca   : > { %v9290_v55 = vld [vmem:[%s16173_s1 + $0x11e0] sm:$0xff] }
 0x3cb   : > { %11335 = vmatpush1.bf16.msra.mxu1 %v11334_v0  ;;  %v11376_v0 = vpack.c.bf16 %v9081_v62, %v9079_v61  ;;  %v9256_v61 = vld [vmem:[%s16173_s1 + $0x10d0] sm:$0xff] }
 0x3cc   : > { %11337 = vmatprep.subr.bf16.mxu1 %v11336_v4  ;;  %v9078_v4 = vld [vmem:[%s16173_s1 + $0xba0] sm:$0xff]  ;;  %v11542_v62 = vpack.c.bf16 %v9256_v61, %v9254_v60 }
 0x3cd   : > { %v11378_v8 = vpack.c.bf16 %v9080_v5, %v9078_v4  ;;  %v9258_v5 = vld [vmem:[%s16173_s1 + $0x10e0] sm:$0xff] }
 0x3cf   : > { %11339 = vmatpush1.bf16.msra.mxu1 %v11338_v9  ;;  %v11380_v9 = vpack.c.bf16 %v9085_v7, %v9083_v6  ;;  %v9260_v6 = vld [vmem:[%s16173_s1 + $0x10f0] sm:$0xff] }
 0x3d0   : > { %11341 = vmatprep.subr.bf16.mxu1 %v11340_v10  ;;  %v9082_v10 = vld [vmem:[%s16173_s1 + $0xbc0] sm:$0xff]  ;;  %v11546_v7 = vpack.c.bf16 %v9260_v6, %v9258_v5 }
 0x3d1   : > { %v11382_v14 = vpack.c.bf16 %v9084_v11, %v9082_v10  ;;  %v14223_v19 = vpop.f32.mrb[6].mxu0  ;;  %v9262_v11 = vld [vmem:[%s16173_s1 + $0x1100] sm:$0xff] }
 0x3d2   : > { %v14225_v20 = vpop.f32.mrb[7].mxu0 }
 0x3d3   : > { %11343 = vmatpush1.bf16.msra.mxu1 %v11342_v15  ;;  %v11384_v15 = vpack.c.bf16 %v9089_v13, %v9087_v12  ;;  %v9264_v12 = vld [vmem:[%s16173_s1 + $0x1110] sm:$0xff] }
 0x3d4   : > { %11345 = vmatprep.subr.bf16.mxu1 %v11344_v16  ;;  %v9086_v16 = vld [vmem:[%s16173_s1 + $0xbe0] sm:$0xff]  ;;  %v11550_v13 = vpack.c.bf16 %v9264_v12, %v9262_v11 }
 0x3d5   : > { %v11386_v18 = vpack.c.bf16 %v9088_v17, %v9086_v16  ;;  %v9266_v17 = vld [vmem:[%s16173_s1 + $0x1120] sm:$0xff] }
 0x3d7   : > { %11347 = vmatpush1.bf16.msra.mxu1 %v11346_v21  ;;  %v9231_v21 = vld [vmem:[%s16173_s1 + $0x1008] sm:$0xff] }
 0x3d8   : > { %11349 = vmatprep.subr.bf16.mxu1 %v11348_v22  ;;  %v9233_v22 = vld [vmem:[%s16173_s1 + $0x1018] sm:$0xff] }
 0x3d9   : > { %v11516_v23 = vpack.c.bf16 %v9233_v22, %v9231_v21  ;;  %v9271_v22 = vld [vmem:[%s16173_s1 + $0x1148] sm:$0xff] }
 0x3db   : > { %11351 = vmatpush1.bf16.msra.mxu1 %v11350_v27  ;;  %11517 = vmatprep.subr.bf16.mxu0 %v11516_v23  ;;  %v9235_v27 = vld [vmem:[%s16173_s1 + $0x1028] sm:$0xff]  ;;  %v9273_v23 = vld [vmem:[%s16173_s1 + $0x1158] sm:$0xff] }
 0x3dc   : > { %11353 = vmatprep.subr.bf16.mxu1 %v11352_v28  ;;  %11519 = vmatpush1.bf16.msra.mxu0 %v11518_v26  ;;  %v9237_v28 = vld [vmem:[%s16173_s1 + $0x1038] sm:$0xff]  ;;  %v11556_v24 = vpack.c.bf16 %v9273_v23, %v9271_v22  ;;  %v9272_v26 = vld [vmem:[%s16173_s1 + $0x1150] sm:$0xff]  ;;  %v9179_v22 = vld [vmem:[%s16173_s1 + $0xe88] sm:$0xff] }
 0x3dd   : > { %v11520_v29 = vpack.c.bf16 %v9237_v28, %v9235_v27  ;;  %v11558_v27 = vpack.c.bf16 %v9272_v26, %v9270_v25  ;;  %v9275_v28 = vld [vmem:[%s16173_s1 + $0x1168] sm:$0xff]  ;;  %v9181_v23 = vld [vmem:[%s16173_s1 + $0xe98] sm:$0xff]  ;;  %v9178_v26 = vld [vmem:[%s16173_s1 + $0xe80] sm:$0xff] }
 0x3de   : > { %v11468_v25 = vpack.c.bf16 %v9181_v23, %v9179_v22  ;;  %v9218_v23 = vld [vmem:[%s16173_s1 + $0xfc0] sm:$0xff] }
 0x3df   : > { %11355 = vmatpush1.bf16.msra.mxu1 %v11354_v32  ;;  %11521 = vmatprep.subr.bf16.mxu0 %v11520_v29  ;;  %v9239_v32 = vld [vmem:[%s16173_s1 + $0x1048] sm:$0xff]  ;;  %v9277_v29 = vld [vmem:[%s16173_s1 + $0x1178] sm:$0xff] }
 0x3e0   : > { %11357 = vmatprep.subr.bf16.mxu1 %v11356_v51  ;;  %11523 = vmatpush1.bf16.msra.mxu0 %v11522_v31  ;;  %v9241_v51 = vld [vmem:[%s16173_s1 + $0x1058] sm:$0xff]  ;;  %v11560_v30 = vpack.c.bf16 %v9277_v29, %v9275_v28  ;;  %v9276_v31 = vld [vmem:[%s16173_s1 + $0x1170] sm:$0xff]  ;;  %v9183_v28 = vld [vmem:[%s16173_s1 + $0xea8] sm:$0xff] }
 0x3e1   : > { %v11524_v50 = vpack.c.bf16 %v9241_v51, %v9239_v32  ;;  %v11562_v32 = vpack.c.bf16 %v9276_v31, %v9274_v42  ;;  %v9279_v51 = vld [vmem:[%s16173_s1 + $0x1188] sm:$0xff]  ;;  %v9185_v29 = vld [vmem:[%s16173_s1 + $0xeb8] sm:$0xff]  ;;  %v9182_v31 = vld [vmem:[%s16173_s1 + $0xea0] sm:$0xff] }
 0x3e2   : > { %v11472_v42 = vpack.c.bf16 %v9185_v29, %v9183_v28  ;;  %v9222_v29 = vld [vmem:[%s16173_s1 + $0xfe0] sm:$0xff] }
 0x3e3   : > { %11359 = vmatpush1.bf16.msra.mxu1 %v11358_v37  ;;  %11525 = vmatprep.subr.bf16.mxu0 %v11524_v50  ;;  %v9243_v37 = vld [vmem:[%s16173_s1 + $0x1068] sm:$0xff]  ;;  %v9281_v50 = vld [vmem:[%s16173_s1 + $0x1198] sm:$0xff] }
 0x3e4   : > { %11361 = vmatprep.subr.bf16.mxu1 %v11360_v38  ;;  %11527 = vmatpush1.bf16.msra.mxu0 %v11526_v36  ;;  %v9245_v38 = vld [vmem:[%s16173_s1 + $0x1078] sm:$0xff]  ;;  %v11564_v33 = vpack.c.bf16 %v9281_v50, %v9279_v51  ;;  %v9280_v36 = vld [vmem:[%s16173_s1 + $0x1190] sm:$0xff]  ;;  %v9187_v51 = vld [vmem:[%s16173_s1 + $0xec8] sm:$0xff] }
 0x3e5   : > { %v11528_v39 = vpack.c.bf16 %v9245_v38, %v9243_v37  ;;  %v11566_v37 = vpack.c.bf16 %v9280_v36, %v9278_v34  ;;  %v9283_v38 = vld [vmem:[%s16173_s1 + $0x11a8] sm:$0xff]  ;;  %v9189_v50 = vld [vmem:[%s16173_s1 + $0xed8] sm:$0xff]  ;;  %v9186_v36 = vld [vmem:[%s16173_s1 + $0xec0] sm:$0xff] }
 0x3e6   : > { %v11476_v34 = vpack.c.bf16 %v9189_v50, %v9187_v51  ;;  %v566_v50 = vld [vmem:[%s16175_s3] sm:$0xff] }
 0x3e7   : > { %11363 = vmatpush1.bf16.msra.mxu1 %v11362_v44  ;;  %11529 = vmatprep.subr.bf16.mxu0 %v11528_v39  ;;  %v9247_v44 = vld [vmem:[%s16173_s1 + $0x1088] sm:$0xff]  ;;  %v9285_v39 = vld [vmem:[%s16173_s1 + $0x11b8] sm:$0xff] }
 0x3e8   : > { %11365 = vmatprep.subr.bf16.mxu1 %v11364_v46  ;;  %11531 = vmatpush1.bf16.msra.mxu0 %v11530_v43  ;;  %v9249_v46 = vld [vmem:[%s16173_s1 + $0x1098] sm:$0xff]  ;;  %v11568_v40 = vpack.c.bf16 %v9285_v39, %v9283_v38  ;;  %v9284_v43 = vld [vmem:[%s16173_s1 + $0x11b0] sm:$0xff]  ;;  %v9191_v38 = vld [vmem:[%s16173_s1 + $0xee8] sm:$0xff] }
 0x3e9   : > { %v11532_v47 = vpack.c.bf16 %v9249_v46, %v9247_v44  ;;  %v11570_v44 = vpack.c.bf16 %v9284_v43, %v9282_v41  ;;  %v9287_v46 = vld [vmem:[%s16173_s1 + $0x11c8] sm:$0xff]  ;;  %v9193_v39 = vld [vmem:[%s16173_s1 + $0xef8] sm:$0xff]  ;;  %v9190_v43 = vld [vmem:[%s16173_s1 + $0xee0] sm:$0xff] }
 0x3ea   : > { %v11480_v41 = vpack.c.bf16 %v9193_v39, %v9191_v38  ;;  %v2583_v38 = vld [vmem:[%s16176_s4 + $0x80] sm:$0xff]  ;;  %v2584_v39 = vld [vmem:[%s16176_s4 + $0x88] sm:$0xff] }
 0x3eb   : > { %11367 = vmatpush1.bf16.msra.mxu1 %v11366_v2  ;;  %11533 = vmatprep.subr.bf16.mxu0 %v11532_v47  ;;  %v9251_v2 = vld [vmem:[%s16173_s1 + $0x10a8] sm:$0xff]  ;;  %v9289_v47 = vld [vmem:[%s16173_s1 + $0x11d8] sm:$0xff] }
 0x3ec   : > { %11369 = vmatprep.subr.bf16.mxu1 %v11368_v52  ;;  %11535 = vmatpush1.bf16.msra.mxu0 %v11534_v3  ;;  %v9253_v52 = vld [vmem:[%s16173_s1 + $0x10b8] sm:$0xff]  ;;  %v11572_v48 = vpack.c.bf16 %v9289_v47, %v9287_v46  ;;  %v9288_v3 = vld [vmem:[%s16173_s1 + $0x11d0] sm:$0xff]  ;;  %v9195_v46 = vld [vmem:[%s16173_s1 + $0xf08] sm:$0xff] }
 0x3ed   : > { %v11536_v53 = vpack.c.bf16 %v9253_v52, %v9251_v2  ;;  %v11574_v2 = vpack.c.bf16 %v9288_v3, %v9286_v49  ;;  %v9291_v52 = vld [vmem:[%s16173_s1 + $0x11e8] sm:$0xff]  ;;  %v9197_v47 = vld [vmem:[%s16173_s1 + $0xf18] sm:$0xff]  ;;  %v9194_v3 = vld [vmem:[%s16173_s1 + $0xf00] sm:$0xff] }
 0x3ee   : > { %v11484_v49 = vpack.c.bf16 %v9197_v47, %v9195_v46  ;;  %v2567_v46 = vld [vmem:[%s16176_s4] sm:$0xff]  ;;  %v2568_v47 = vld [vmem:[%s16176_s4 + $0x8] sm:$0xff] }
 0x3ef   : > { %11371 = vmatpush1.bf16.msra.mxu1 %v11370_v57  ;;  %11537 = vmatprep.subr.bf16.mxu0 %v11536_v53  ;;  %v9255_v57 = vld [vmem:[%s16173_s1 + $0x10c8] sm:$0xff]  ;;  %v9293_v53 = vld [vmem:[%s16173_s1 + $0x11f8] sm:$0xff] }
 0x3f0   : > { %11373 = vmatprep.subr.bf16.mxu1 %v11372_v58  ;;  %11539 = vmatpush1.bf16.msra.mxu0 %v11538_v56  ;;  %v9257_v58 = vld [vmem:[%s16173_s1 + $0x10d8] sm:$0xff]  ;;  %v11576_v54 = vpack.c.bf16 %v9293_v53, %v9291_v52  ;;  %v9292_v56 = vld [vmem:[%s16173_s1 + $0x11f0] sm:$0xff]  ;;  %v9199_v52 = vld [vmem:[%s16173_s1 + $0xf28] sm:$0xff] }
 0x3f1   : > { %v11540_v59 = vpack.c.bf16 %v9257_v58, %v9255_v57  ;;  %v11578_v57 = vpack.c.bf16 %v9292_v56, %v9290_v55  ;;  %v9163_v58 = vld [vmem:[%s16173_s1 + $0xe08] sm:$0xff]  ;;  %v9201_v53 = vld [vmem:[%s16173_s1 + $0xf38] sm:$0xff]  ;;  %v9198_v56 = vld [vmem:[%s16173_s1 + $0xf20] sm:$0xff] }
 0x3f2   : > { %v11488_v55 = vpack.c.bf16 %v9201_v53, %v9199_v52  ;;  %v2569_v53 = vld [vmem:[%s16176_s4 + $0x10] sm:$0xff] }
 0x3f3   : > { %11375 = vmatpush1.bf16.msra.mxu1 %v11374_v63  ;;  %11541 = vmatprep.subr.bf16.mxu0 %v11540_v59  ;;  %v9259_v63 = vld [vmem:[%s16173_s1 + $0x10e8] sm:$0xff]  ;;  %v9165_v59 = vld [vmem:[%s16173_s1 + $0xe18] sm:$0xff] }
 0x3f4   : > { %11377 = vmatprep.subr.bf16.mxu1 %v11376_v0  ;;  %11543 = vmatpush1.bf16.msra.mxu0 %v11542_v62  ;;  %v9261_v0 = vld [vmem:[%s16173_s1 + $0x10f8] sm:$0xff]  ;;  %v9090_v62 = vld [vmem:[%s16174_s2 + $0x28] sm:$0xff] }
 0x3f5   : > { %v11544_v4 = vpack.c.bf16 %v9261_v0, %v9259_v63  ;;  %v11452_v63 = vpack.c.bf16 %v9165_v59, %v9163_v58  ;;  %v9164_v0 = vld [vmem:[%s16173_s1 + $0xe10] sm:$0xff]  ;;  %v9203_v58 = vld [vmem:[%s16173_s1 + $0xf48] sm:$0xff]  ;;  %v9205_v59 = vld [vmem:[%s16173_s1 + $0xf58] sm:$0xff] }
 0x3f7   : > { %11379 = vmatpush1.bf16.msra.mxu1 %v11378_v8  ;;  %11545 = vmatprep.subr.bf16.mxu0 %v11544_v4  ;;  %v9263_v8 = vld [vmem:[%s16173_s1 + $0x1108] sm:$0xff] }
 0x3f8   : > { %11381 = vmatprep.subr.bf16.mxu1 %v11380_v9  ;;  %11547 = vmatpush1.bf16.msra.mxu0 %v11546_v7  ;;  %v9265_v9 = vld [vmem:[%s16173_s1 + $0x1118] sm:$0xff]  ;;  %v9167_v4 = vld [vmem:[%s16173_s1 + $0xe28] sm:$0xff]  ;;  %v9166_v7 = vld [vmem:[%s16173_s1 + $0xe20] sm:$0xff] }
 0x3f9   : > { %v11548_v10 = vpack.c.bf16 %v9265_v9, %v9263_v8  ;;  %v9168_v8 = vld [vmem:[%s16173_s1 + $0xe30] sm:$0xff]  ;;  %v9171_v9 = vld [vmem:[%s16173_s1 + $0xe48] sm:$0xff] }
 0x3fa   : > { %v11458_v11 = vpack.c.bf16 %v9168_v8, %v9166_v7  ;;  %v9213_v7 = vld [vmem:[%s16173_s1 + $0xf98] sm:$0xff] }
 0x3fb   : > { %11383 = vmatpush1.bf16.msra.mxu1 %v11382_v14  ;;  %11549 = vmatprep.subr.bf16.mxu0 %v11548_v10  ;;  %v9267_v14 = vld [vmem:[%s16173_s1 + $0x1128] sm:$0xff]  ;;  %v9173_v10 = vld [vmem:[%s16173_s1 + $0xe58] sm:$0xff] }
 0x3fc   : > { %11385 = vmatprep.subr.bf16.mxu1 %v11384_v15  ;;  %11551 = vmatpush1.bf16.msra.mxu0 %v11550_v13  ;;  %v9269_v15 = vld [vmem:[%s16173_s1 + $0x1138] sm:$0xff]  ;;  %v11460_v12 = vpack.c.bf16 %v9173_v10, %v9171_v9  ;;  %v9170_v13 = vld [vmem:[%s16173_s1 + $0xe40] sm:$0xff] }
 0x3fd   : > { %v11552_v16 = vpack.c.bf16 %v9269_v15, %v9267_v14  ;;  %v9172_v14 = vld [vmem:[%s16173_s1 + $0xe50] sm:$0xff]  ;;  %v9175_v15 = vld [vmem:[%s16173_s1 + $0xe68] sm:$0xff]  ;;  %v9210_v10 = vld [vmem:[%s16173_s1 + $0xf80] sm:$0xff] }
 0x3ff   : > { %11387 = vmatpush1.bf16.msra.mxu1 %v11386_v18  ;;  %v9268_v18 = vld [vmem:[%s16173_s1 + $0x1130] sm:$0xff]  ;;  %11553 = vmatprep.subr.bf16.mxu0 %v11552_v16  ;;  %v9177_v16 = vld [vmem:[%s16173_s1 + $0xe78] sm:$0xff] }
 0x400   : > { %v11554_v21 = vpack.c.bf16 %v9268_v18, %v9266_v17  ;;  %v11464_v17 = vpack.c.bf16 %v9177_v16, %v9175_v15  ;;  %v9174_v18 = vld [vmem:[%s16173_s1 + $0xe60] sm:$0xff] }
 0x401   : > { %v9214_v16 = vld [vmem:[%s16173_s1 + $0xfa0] sm:$0xff] }
 0x402   : > { %1805 = vmatmul.mubr.f32.vlgmr.msra.gmra.mrb[6].mxu1 %v13811_v1  ;;  %11555 = vmatpush1.bf16.msra.mxu0 %v11554_v21  ;;  %v9176_v21 = vld [vmem:[%s16173_s1 + $0xe70] sm:$0xff] }
 0x403   : > { %1886 = vmatprep.mubr.f32.mxu1 %v12549_v35  ;;  %11557 = vmatprep.subr.bf16.mxu0 %v11556_v24  ;;  %v11466_v24 = vpack.c.bf16 %v9176_v21, %v9174_v18  ;;  %v9221_v18 = vld [vmem:[%s16173_s1 + $0xfd8] sm:$0xff] }
 0x406   : > { %11559 = vmatpush1.bf16.msra.mxu0 %v11558_v27  ;;  %v9180_v27 = vld [vmem:[%s16173_s1 + $0xe90] sm:$0xff] }
 0x407   : > { %11561 = vmatprep.subr.bf16.mxu0 %v11560_v30  ;;  %v11470_v30 = vpack.c.bf16 %v9180_v27, %v9178_v26  ;;  %v9225_v26 = vld [vmem:[%s16173_s1 + $0xff8] sm:$0xff] }
 0x40a   : > { %11563 = vmatpush1.bf16.msra.mxu0 %v11562_v32  ;;  %v9184_v32 = vld [vmem:[%s16173_s1 + $0xeb0] sm:$0xff] }
 0x40b   : > { %11565 = vmatprep.subr.bf16.mxu0 %v11564_v33  ;;  %v11474_v33 = vpack.c.bf16 %v9184_v32, %v9182_v31  ;;  %v12387_v31 = vld [vmem:[%s12882_s16] sm:$0xff]  ;;  %s16130_s16 = scalar_lea.hbm %s16228_s25, %s9749_s21 }
 0x40e   : > { %11567 = vmatpush1.bf16.msra.mxu0 %v11566_v37  ;;  %v9188_v37 = vld [vmem:[%s16173_s1 + $0xed0] sm:$0xff] }
 0x40f   : > { %11569 = vmatprep.subr.bf16.mxu0 %v11568_v40  ;;  %v11478_v40 = vpack.c.bf16 %v9188_v37, %v9186_v36  ;;  %v5685_v36 = vld [vmem:[%s16184_s12] sm:$0xff] }
 0x410   : > { %v7238_v37 = vld [vmem:[#allocation2] sm:$0x1] }
 0x412   : > { %11571 = vmatpush1.bf16.msra.mxu0 %v11570_v44  ;;  %v9192_v44 = vld [vmem:[%s16173_s1 + $0xef0] sm:$0xff] }
 0x413   : > { %11573 = vmatprep.subr.bf16.mxu0 %v11572_v48  ;;  %v11482_v48 = vpack.c.bf16 %v9192_v44, %v9190_v43  ;;  %v9226_v43 = vld [vmem:[%s16174_s2 + $0x38] sm:$0xff]  ;;  %v11580_v44 = vpack.c.bf16 %v2584_v39, %v2583_v38  ;;  %v9317_v38 = vld [vmem:[%s16176_s4 + $0x190] sm:$0xff] }
 0x414   : > { %v9318_v39 = vld [vmem:[%s16176_s4 + $0x198] sm:$0xff] }
 0x416   : > { %11575 = vmatpush1.bf16.msra.mxu0 %v11574_v2  ;;  %v9196_v2 = vld [vmem:[%s16173_s1 + $0xf10] sm:$0xff] }
 0x417   : > { %11577 = vmatprep.subr.bf16.mxu0 %v11576_v54  ;;  %v11486_v54 = vpack.c.bf16 %v9196_v2, %v9194_v3  ;;  %v9294_v3 = vld [vmem:[%s16174_s2 + $0x40] sm:$0xff]  ;;  %v11582_v2 = vpack.c.bf16 %v2568_v47, %v2567_v46  ;;  %v9301_v46 = vld [vmem:[%s16176_s4 + $0x110] sm:$0xff]  ;;  %v9302_v47 = vld [vmem:[%s16176_s4 + $0x118] sm:$0xff] }
 0x41a   : > { %11579 = vmatpush1.bf16.msra.mxu0 %v11578_v57  ;;  %v9200_v57 = vld [vmem:[%s16173_s1 + $0xf30] sm:$0xff] }
 0x41b   : > { %10383 = vmatprep.subr.mxu0 %v12549_v35 }
 0x41d   : > { %2465 = vmatmul.mubr.f32.vlgmr.msra.gmra.mrb[8].mxu0 %v13811_v1  ;;  %v9162_v1 = vld [vmem:[%s16173_s1 + $0xe00] sm:$0xff] }
 0x41e   : > { %v11454_v5 = vpack.c.bf16 %v9164_v0, %v9162_v1  ;;  %v9207_v1 = vld [vmem:[%s16173_s1 + $0xf68] sm:$0xff]  ;;  %v9209_v0 = vld [vmem:[%s16173_s1 + $0xf78] sm:$0xff]  ;;  %10385 = vmatprep.mubr.msk.f32.mxu0 %vm12551_vm4, %v12549_v35 }
 0x4d5   : > { %v1806_v60 = vpop.f32.mrb[6].mxu1 }
 0x4d6   : > { %v1808_v61 = vpop.f32.mrb[7].mxu1 }
 0x4d7   : > { %9091 = vmatprep.subr.msk.mxu1 %vm715_vm0, %v1808_v61  ;;  %v11492_v61 = vpack.c.bf16 %v9205_v59, %v9203_v58  ;;  %v2571_v59 = vld [vmem:[%s16176_s4 + $0x20] sm:$0xff] }
 0x4d8   : > { %9092 = vmatpush1.msk.msra.mxu1 %vm715_vm0, %v1806_v60  ;;  %v11490_v60 = vpack.c.bf16 %v9200_v57, %v9198_v56  ;;  %v2588_v56 = vld [vmem:[%s16176_s4 + $0xa8] sm:$0xff] }
 0x4d9   : > { %9093 = vmatmul.mubr.msk.f32.vlgmr.msra.gmra.mrb[0].mxu1 %vm711_vm1, %v9090_v62  ;;  %9159 = vmatprep.subr.msk.mxu1 %vm715_vm0, %v14225_v20  ;;  %v9169_v20 = vld [vmem:[%s16173_s1 + $0xe38] sm:$0xff]  ;;  %v9202_v62 = vld [vmem:[%s16173_s1 + $0xf40] sm:$0xff] }
 0x4da   : > { %9160 = vmatpush1.msk.msra.mxu1 %vm715_vm0, %v14223_v19  ;;  %2106 = vmatprep.mubr.f32.mxu1 %v12549_v35  ;;  %v9158_v19 = vld [vmem:[%s16174_s2 + $0x30] sm:$0xff]  ;;  %v11456_v6 = vpack.c.bf16 %v9169_v20, %v9167_v4  ;;  %v11496_v20 = vpack.c.bf16 %v9209_v0, %v9207_v1 }
 0x4db   : > { %11453 = vmatprep.subr.bf16.mxu1 %v11452_v63  ;;  %v9204_v63 = vld [vmem:[%s16173_s1 + $0xf50] sm:$0xff] }
 0x4dc   : > { %v11494_v4 = vpack.c.bf16 %v9204_v63, %v9202_v62  ;;  %v2590_v62 = vld [vmem:[%s16176_s4 + $0xb8] sm:$0xff]  ;;  %v2573_v0 = vld [vmem:[%s16176_s4 + $0x30] sm:$0xff] }
 0x4e1   : > { %9161 = vmatmul.mubr.msk.f32.vlgmr.msra.gmra.mrb[0].mxu1 %vm711_vm1, %v9158_v19  ;;  %v9206_v19 = vld [vmem:[%s16173_s1 + $0xf60] sm:$0xff] }
 0x4e2   : > { %11455 = vmatpush1.bf16.msra.mxu1 %v11454_v5  ;;  %2244 = vmatprep.mubr.f32.mxu1 %v12901_v45  ;;  %v11462_v45 = vpack.c.bf16 %v9172_v14, %v9170_v13  ;;  %v9208_v5 = vld [vmem:[%s16173_s1 + $0xf70] sm:$0xff]  ;;  %v9217_v13 = vld [vmem:[%s16173_s1 + $0xfb8] sm:$0xff] }
 0x4e3   : > { %11457 = vmatprep.subr.bf16.mxu1 %v11456_v6  ;;  %v9211_v6 = vld [vmem:[%s16173_s1 + $0xf88] sm:$0xff]  ;;  %v11498_v8 = vpack.c.bf16 %v9208_v5, %v9206_v19 }
 0x4e4   : > { %v11500_v9 = vpack.c.bf16 %v9213_v7, %v9211_v6  ;;  %v2592_v19 = vld [vmem:[%s16176_s4 + $0xc8] sm:$0xff]  ;;  %v2575_v7 = vld [vmem:[%s16176_s4 + $0x40] sm:$0xff] }
 0x4e6   : > { %11459 = vmatpush1.bf16.msra.mxu1 %v11458_v11  ;;  %v9212_v11 = vld [vmem:[%s16173_s1 + $0xf90] sm:$0xff] }
 0x4e7   : > { %11461 = vmatprep.subr.bf16.mxu1 %v11460_v12  ;;  %v9215_v12 = vld [vmem:[%s16173_s1 + $0xfa8] sm:$0xff]  ;;  %v11502_v14 = vpack.c.bf16 %v9212_v11, %v9210_v10  ;;  %v2594_v10 = vld [vmem:[%s16176_s4 + $0xd8] sm:$0xff] }
 0x4e8   : > { %v11504_v15 = vpack.c.bf16 %v9217_v13, %v9215_v12  ;;  %v2577_v13 = vld [vmem:[%s16176_s4 + $0x50] sm:$0xff] }
 0x4ea   : > { %11463 = vmatpush1.bf16.msra.mxu1 %v11462_v45  ;;  %v9216_v45 = vld [vmem:[%s16173_s1 + $0xfb0] sm:$0xff] }
 0x4eb   : > { %11465 = vmatprep.subr.bf16.mxu1 %v11464_v17  ;;  %v9219_v17 = vld [vmem:[%s16173_s1 + $0xfc8] sm:$0xff]  ;;  %v11506_v21 = vpack.c.bf16 %v9216_v45, %v9214_v16 }
 0x4ec   : > { %v11508_v22 = vpack.c.bf16 %v9221_v18, %v9219_v17  ;;  %v2596_v16 = vld [vmem:[%s16176_s4 + $0xe8] sm:$0xff]  ;;  %v2579_v18 = vld [vmem:[%s16176_s4 + $0x60] sm:$0xff] }
 0x4ee   : > { %11467 = vmatpush1.bf16.msra.mxu1 %v11466_v24  ;;  %v9220_v24 = vld [vmem:[%s16173_s1 + $0xfd0] sm:$0xff] }
 0x4ef   : > { %11469 = vmatprep.subr.bf16.mxu1 %v11468_v25  ;;  %v9223_v25 = vld [vmem:[%s16173_s1 + $0xfe8] sm:$0xff]  ;;  %v11510_v27 = vpack.c.bf16 %v9220_v24, %v9218_v23  ;;  %v2597_v23 = vld [vmem:[%s16176_s4 + $0xf0] sm:$0xff]  ;;  %v2598_v24 = vld [vmem:[%s16176_s4 + $0xf8] sm:$0xff] }
 0x4f0   : > { %v11512_v28 = vpack.c.bf16 %v9225_v26, %v9223_v25  ;;  %v2466_v32 = vpop.f32.mrb[8].mxu0  ;;  %v11608_v25 = vpack.c.bf16 %v2598_v24, %v2597_v23  ;;  %v2581_v26 = vld [vmem:[%s16176_s4 + $0x70] sm:$0xff]  ;;  %v9384_v23 = vld [vmem:[%s16176_s4 + $0x388] sm:$0xff] }
 0x4f1   : > { %v2468_v51 = vpop.f32.mrb[9].mxu0 }
 0x4f2   : > { %11471 = vmatpush1.bf16.msra.mxu1 %v11470_v30  ;;  %v9224_v30 = vld [vmem:[%s16173_s1 + $0xff0] sm:$0xff] }
 0x4f3   : > { %11473 = vmatprep.subr.bf16.mxu1 %v11472_v42  ;;  %v11514_v42 = vpack.c.bf16 %v9224_v30, %v9222_v29  ;;  %v9315_v29 = vld [vmem:[%s16176_s4 + $0x180] sm:$0xff]  ;;  %v9316_v30 = vld [vmem:[%s16176_s4 + $0x188] sm:$0xff] }
 0x4f6   : > { %11475 = vmatpush1.bf16.msra.mxu1 %v11474_v33  ;;  %v12550_v33 = vmov 0  }
 0x4f7   : > { %11477 = vmatprep.subr.bf16.mxu1 %v11476_v34  ;;  %12383 = vset.pattern.permute.xlu0 %v12550_v33  ;;  %v2561_v34 = vld [vmem:[%s16178_s6] sm:$0xff] }
 0x4f8   : > { %12384 = vset.pattern.permute.xlu1 %v12550_v33  ;;  %569 = vperm.xlu0 %12383, %v566_v50  }
 0x4fa   : > { %11479 = vmatpush1.bf16.msra.mxu1 %v11478_v40 }
 0x4fb   : > { %11481 = vmatprep.subr.bf16.mxu1 %v11480_v41 }
 0x4fc   : > { %2564 = vperm.xlu0 %12383, %v2561_v34   ;;  %v9299_v34 = vld [vmem:[%s16176_s4 + $0x100] sm:$0xff] }
 0x4fe   : > { %11483 = vmatpush1.bf16.msra.mxu1 %v11482_v48  ;;  %v2585_v48 = vld [vmem:[%s16176_s4 + $0x90] sm:$0xff] }
 0x4ff   : > { %11485 = vmatprep.subr.bf16.mxu1 %v11484_v49  ;;  %v2586_v49 = vld [vmem:[%s16176_s4 + $0x98] sm:$0xff] }
 0x500   : > { %5689 = vperm.xlu0 %12383, %v5685_v36   ;;  %v11584_v52 = vpack.c.bf16 %v2586_v49, %v2585_v48  ;;  %v9300_v36 = vld [vmem:[%s16176_s4 + $0x108] sm:$0xff]  ;;  %v9319_v49 = vld [vmem:[%s16176_s4 + $0x1a0] sm:$0xff] }
 0x502   : > { %11487 = vmatpush1.bf16.msra.mxu1 %v11486_v54  ;;  %v2570_v54 = vld [vmem:[%s16176_s4 + $0x18] sm:$0xff] }
 0x503   : > { %11489 = vmatprep.subr.bf16.mxu1 %v11488_v55  ;;  %v2587_v55 = vld [vmem:[%s16176_s4 + $0xa0] sm:$0xff]  ;;  %v11586_v57 = vpack.c.bf16 %v2570_v54, %v2569_v53  ;;  %v9304_v54 = vld [vmem:[%s16176_s4 + $0x128] sm:$0xff] }
 0x504   : > { %7241 = vperm.xlu0 %12383, %v7238_v37   ;;  %v11588_v58 = vpack.c.bf16 %v2588_v56, %v2587_v55  ;;  %v9303_v53 = vld [vmem:[%s16176_s4 + $0x120] sm:$0xff]  ;;  %v9321_v55 = vld [vmem:[%s16176_s4 + $0x1b0] sm:$0xff]  ;;  %v9322_v56 = vld [vmem:[%s16176_s4 + $0x1b8] sm:$0xff] }
 0x506   : > { %11491 = vmatpush1.bf16.msra.mxu1 %v11490_v60  ;;  %v2572_v60 = vld [vmem:[%s16176_s4 + $0x28] sm:$0xff] }
 0x507   : > { %11493 = vmatprep.subr.bf16.mxu1 %v11492_v61  ;;  %v2589_v61 = vld [vmem:[%s16176_s4 + $0xb0] sm:$0xff]  ;;  %v11590_v63 = vpack.c.bf16 %v2572_v60, %v2571_v59  ;;  %v9306_v60 = vld [vmem:[%s16176_s4 + $0x138] sm:$0xff] }
 0x508   : > { %v11592_v1 = vpack.c.bf16 %v2590_v62, %v2589_v61  ;;  %v9305_v59 = vld [vmem:[%s16176_s4 + $0x130] sm:$0xff]  ;;  %v9323_v61 = vld [vmem:[%s16176_s4 + $0x1c0] sm:$0xff]  ;;  %v9324_v62 = vld [vmem:[%s16176_s4 + $0x1c8] sm:$0xff] }
 0x50a   : > { %11495 = vmatpush1.bf16.msra.mxu1 %v11494_v4  ;;  %v2574_v4 = vld [vmem:[%s16176_s4 + $0x38] sm:$0xff] }
 0x50b   : > { %11497 = vmatprep.subr.bf16.mxu1 %v11496_v20  ;;  %v2591_v20 = vld [vmem:[%s16176_s4 + $0xc0] sm:$0xff]  ;;  %v11594_v5 = vpack.c.bf16 %v2574_v4, %v2573_v0  ;;  %v9308_v4 = vld [vmem:[%s16176_s4 + $0x148] sm:$0xff] }
 0x50c   : > { %v11596_v6 = vpack.c.bf16 %v2592_v19, %v2591_v20  ;;  %v9307_v0 = vld [vmem:[%s16176_s4 + $0x140] sm:$0xff]  ;;  %v9325_v20 = vld [vmem:[%s16176_s4 + $0x1d0] sm:$0xff]  ;;  %v9326_v19 = vld [vmem:[%s16176_s4 + $0x1d8] sm:$0xff] }
 0x50e   : > { %11499 = vmatpush1.bf16.msra.mxu1 %v11498_v8  ;;  %v2576_v8 = vld [vmem:[%s16176_s4 + $0x48] sm:$0xff] }
 0x50f   : > { %11501 = vmatprep.subr.bf16.mxu1 %v11500_v9  ;;  %v2593_v9 = vld [vmem:[%s16176_s4 + $0xd0] sm:$0xff]  ;;  %v11598_v11 = vpack.c.bf16 %v2576_v8, %v2575_v7  ;;  %v9310_v8 = vld [vmem:[%s16176_s4 + $0x158] sm:$0xff] }
 0x510   : > { %v11600_v12 = vpack.c.bf16 %v2594_v10, %v2593_v9  ;;  %v9309_v7 = vld [vmem:[%s16176_s4 + $0x150] sm:$0xff]  ;;  %v9327_v9 = vld [vmem:[%s16176_s4 + $0x1e0] sm:$0xff]  ;;  %v9328_v10 = vld [vmem:[%s16176_s4 + $0x1e8] sm:$0xff] }
 0x512   : > { %11503 = vmatpush1.bf16.msra.mxu1 %v11502_v14  ;;  %v2578_v14 = vld [vmem:[%s16176_s4 + $0x58] sm:$0xff] }
 0x513   : > { %11505 = vmatprep.subr.bf16.mxu1 %v11504_v15  ;;  %v2595_v15 = vld [vmem:[%s16176_s4 + $0xe0] sm:$0xff]  ;;  %v11602_v45 = vpack.c.bf16 %v2578_v14, %v2577_v13  ;;  %v9312_v14 = vld [vmem:[%s16176_s4 + $0x168] sm:$0xff] }
 0x514   : > { %v11604_v17 = vpack.c.bf16 %v2596_v16, %v2595_v15  ;;  %v9311_v13 = vld [vmem:[%s16176_s4 + $0x160] sm:$0xff]  ;;  %v9329_v15 = vld [vmem:[%s16176_s4 + $0x1f0] sm:$0xff]  ;;  %v9330_v16 = vld [vmem:[%s16176_s4 + $0x1f8] sm:$0xff] }
 0x516   : > { %11507 = vmatpush1.bf16.msra.mxu1 %v11506_v21  ;;  %v2580_v21 = vld [vmem:[%s16176_s4 + $0x68] sm:$0xff] }
 0x517   : > { %11509 = vmatprep.subr.bf16.mxu1 %v11508_v22  ;;  %v11606_v22 = vpack.c.bf16 %v2580_v21, %v2579_v18  ;;  %v9313_v18 = vld [vmem:[%s16176_s4 + $0x170] sm:$0xff]  ;;  %v9314_v21 = vld [vmem:[%s16176_s4 + $0x178] sm:$0xff] }
 0x518   : > { %v11642_v24 = vpack.c.bf16 %v9314_v21, %v9313_v18  ;;  %v9438_v18 = vld [vmem:[%s16176_s4 + $0x518] sm:$0xff]  ;;  %v9455_v21 = vld [vmem:[%s16176_s4 + $0x5a0] sm:$0xff] }
 0x51a   : > { %11511 = vmatpush1.bf16.msra.mxu1 %v11510_v27  ;;  %v2582_v27 = vld [vmem:[%s16176_s4 + $0x78] sm:$0xff] }
 0x51b   : > { %11513 = vmatprep.subr.bf16.mxu1 %v11512_v28  ;;  %v11610_v28 = vpack.c.bf16 %v2582_v27, %v2581_v26  ;;  %v9367_v26 = vld [vmem:[%s16176_s4 + $0x300] sm:$0xff]  ;;  %v9368_v27 = vld [vmem:[%s16176_s4 + $0x308] sm:$0xff] }
 0x51e   : > { %11515 = vmatpush1.bf16.msra.mxu1 %v11514_v42  ;;  %v11612_v42 = vpack.c.bf16 %v9316_v30, %v9315_v29  ;;  %v9386_v29 = vld [vmem:[%s16176_s4 + $0x398] sm:$0xff]  ;;  %v11678_v30 = vpack.c.bf16 %v9368_v27, %v9367_v26  ;;  %v9440_v26 = vld [vmem:[%s16176_s4 + $0x528] sm:$0xff]  ;;  %v9457_v27 = vld [vmem:[%s16176_s4 + $0x5b0] sm:$0xff] }
 0x521   : > { %2245 = vmatmul.mubr.f32.vlgmr.msra.gmra.mrb[8].mxu1 %v12387_v31 }
 0x522   : > { %2326 = vmatprep.mubr.f32.mxu1 %v12549_v35 }
 0x577   : > { %v570_v31 = vpop.permute.xlu0 %569 }
 0x5f4   : > { %v2246_v40 = vpop.f32.mrb[8].mxu1 }
 0x5f5   : > { %v2248_v41 = vpop.f32.mrb[9].mxu1 }
 0x5f6   : > { %9227 = vmatprep.subr.msk.mxu1 %vm715_vm0, %v2248_v41  ;;  %v11614_v41 = vpack.c.bf16 %v9300_v36, %v9299_v34  ;;  %v9371_v36 = vld [vmem:[%s16176_s4 + $0x320] sm:$0xff] }
 0x5f7   : > { %9228 = vmatpush1.msk.msra.mxu1 %vm715_vm0, %v2246_v40 }
 0x5f8   : > { %9229 = vmatmul.mubr.msk.f32.vlgmr.msra.gmra.mrb[0].mxu1 %vm711_vm1, %v9226_v43  ;;  %9295 = vmatprep.subr.msk.mxu1 %vm715_vm0, %v2468_v51 }
 0x5f9   : > { %9296 = vmatpush1.msk.msra.mxu1 %vm715_vm0, %v2466_v32  ;;  %2546 = vmatprep.mubr.f32.mxu1 %v12549_v35 }
 0x5fa   : > { %11581 = vmatprep.subr.bf16.mxu1 %v11580_v44  ;;  %v11616_v44 = vpack.c.bf16 %v9318_v39, %v9317_v38  ;;  %v9389_v38 = vld [vmem:[%s16176_s4 + $0x3b0] sm:$0xff]  ;;  %v9390_v39 = vld [vmem:[%s16176_s4 + $0x3b8] sm:$0xff] }
 0x600   : > { %9297 = vmatmul.mubr.msk.f32.vlgmr.msra.gmra.mrb[0].mxu1 %vm711_vm1, %v9294_v3  ;;  %v9320_v3 = vld [vmem:[%s16176_s4 + $0x1a8] sm:$0xff] }
 0x601   : > { %11583 = vmatpush3.bf16.msra.mxu1 %v11582_v2  ;;  %v11618_v2 = vpack.c.bf16 %v9302_v47, %v9301_v46  ;;  %v9374_v46 = vld [vmem:[%s16176_s4 + $0x338] sm:$0xff]  ;;  %v9391_v47 = vld [vmem:[%s16176_s4 + $0x3c0] sm:$0xff] }
 0x602   : > { %11585 = vmatprep.subr.bf16.mxu1 %v11584_v52  ;;  %v11620_v52 = vpack.c.bf16 %v9320_v3, %v9319_v49  ;;  %v9392_v49 = vld [vmem:[%s16176_s4 + $0x3c8] sm:$0xff] }
 0x605   : > { %11587 = vmatpush3.bf16.msra.mxu1 %v11586_v57  ;;  %v11622_v57 = vpack.c.bf16 %v9304_v54, %v9303_v53  ;;  %v9376_v53 = vld [vmem:[%s16176_s4 + $0x348] sm:$0xff]  ;;  %v9393_v54 = vld [vmem:[%s16176_s4 + $0x3d0] sm:$0xff] }
 0x606   : > { %11589 = vmatprep.subr.bf16.mxu1 %v11588_v58  ;;  %v11624_v58 = vpack.c.bf16 %v9322_v56, %v9321_v55  ;;  %v9394_v55 = vld [vmem:[%s16176_s4 + $0x3d8] sm:$0xff] }
 0x609   : > { %11591 = vmatpush3.bf16.msra.mxu1 %v11590_v63  ;;  %v11626_v63 = vpack.c.bf16 %v9306_v60, %v9305_v59  ;;  %v9378_v59 = vld [vmem:[%s16176_s4 + $0x358] sm:$0xff]  ;;  %v9395_v60 = vld [vmem:[%s16176_s4 + $0x3e0] sm:$0xff] }
 0x60a   : > { %11593 = vmatprep.subr.bf16.mxu1 %v11592_v1  ;;  %v11628_v1 = vpack.c.bf16 %v9324_v62, %v9323_v61  ;;  %v9396_v61 = vld [vmem:[%s16176_s4 + $0x3e8] sm:$0xff] }
 0x60d   : > { %11595 = vmatpush3.bf16.msra.mxu1 %v11594_v5  ;;  %v11630_v5 = vpack.c.bf16 %v9308_v4, %v9307_v0  ;;  %v9380_v0 = vld [vmem:[%s16176_s4 + $0x368] sm:$0xff]  ;;  %v9397_v4 = vld [vmem:[%s16176_s4 + $0x3f0] sm:$0xff] }
 0x60e   : > { %11597 = vmatprep.subr.bf16.mxu1 %v11596_v6  ;;  %v11632_v6 = vpack.c.bf16 %v9326_v19, %v9325_v20  ;;  %v9398_v20 = vld [vmem:[%s16176_s4 + $0x3f8] sm:$0xff] }
 0x611   : > { %11599 = vmatpush3.bf16.msra.mxu1 %v11598_v11  ;;  %v11634_v11 = vpack.c.bf16 %v9310_v8, %v9309_v7  ;;  %v9382_v7 = vld [vmem:[%s16176_s4 + $0x378] sm:$0xff]  ;;  %v9451_v8 = vld [vmem:[%s16176_s4 + $0x580] sm:$0xff] }
 0x612   : > { %11601 = vmatprep.subr.bf16.mxu1 %v11600_v12  ;;  %v11636_v12 = vpack.c.bf16 %v9328_v10, %v9327_v9  ;;  %v9452_v9 = vld [vmem:[%s16176_s4 + $0x588] sm:$0xff] }
 0x615   : > { %11603 = vmatpush3.bf16.msra.mxu1 %v11602_v45  ;;  %v11638_v45 = vpack.c.bf16 %v9312_v14, %v9311_v13  ;;  %v9436_v13 = vld [vmem:[%s16176_s4 + $0x508] sm:$0xff]  ;;  %v9453_v14 = vld [vmem:[%s16176_s4 + $0x590] sm:$0xff] }
 0x616   : > { %11605 = vmatprep.subr.bf16.mxu1 %v11604_v17  ;;  %v11640_v17 = vpack.c.bf16 %v9330_v16, %v9329_v15  ;;  %v9454_v15 = vld [vmem:[%s16176_s4 + $0x598] sm:$0xff] }
 0x619   : > { %11607 = vmatpush3.bf16.msra.mxu1 %v11606_v22  ;;  %v9383_v22 = vld [vmem:[%s16176_s4 + $0x380] sm:$0xff] }
 0x61a   : > { %11609 = vmatprep.subr.bf16.mxu1 %v11608_v25  ;;  %v11676_v25 = vpack.c.bf16 %v9384_v23, %v9383_v22  ;;  %v9456_v22 = vld [vmem:[%s16176_s4 + $0x5a8] sm:$0xff] }
 0x61d   : > { %11611 = vmatpush3.bf16.msra.mxu1 %v11610_v28  ;;  %v9385_v28 = vld [vmem:[%s16176_s4 + $0x390] sm:$0xff] }
 0x61e   : > { %11613 = vmatprep.subr.bf16.mxu1 %v11612_v42  ;;  %v11680_v42 = vpack.c.bf16 %v9386_v29, %v9385_v28  ;;  %v9458_v28 = vld [vmem:[%s16176_s4 + $0x5b8] sm:$0xff] }
 0x6d3   : > { %v2548_v32 = vpop.f32.mrb[0].mxu1 }
 0x6d4   : > { %v12219_v51 = vadd.f32 %v2548_v32, %v570_v31  ;;  %v2550_v50 = vpop.f32.mrb[1].mxu1  ;;  %v9370_v32 = vld [vmem:[%s16176_s4 + $0x318] sm:$0xff] }
 0x6d5   : > { %v12220_v33 = vadd.f32 %v2550_v50, %v570_v31  ;;  %v9369_v31 = vld [vmem:[%s16176_s4 + $0x310] sm:$0xff]  ;;  %v9388_v50 = vld [vmem:[%s16176_s4 + $0x3a8] sm:$0xff] }
 0x6d6   : > { %v2557_v37 = vmul.f32 0.2, %v12219_v51  ;;  %vm2555_vm2 = vcmp.ge.f32.partialorder %v12219_v51, 0.0 }
 0x6d7   : > { %vm2556_vm3 = vcmp.ge.f32.partialorder %v12220_v33, 0.0  ;;  %v2558_v40 = vmul.f32 0.2, %v12220_v33 }
 0x6d8   : > { %v14775_v48 = vsel %vm2555_vm2, %v12219_v51, %v2557_v37  ;;  %v9387_v51 = vld [vmem:[%s16176_s4 + $0x3a0] sm:$0xff]  ;;  %v9372_v37 = vld [vmem:[%s16176_s4 + $0x328] sm:$0xff] }
 0x6d9   : > { %v14767_v43 = vsel %vm2556_vm3, %v12220_v33, %v2558_v40  ;;  %v11682_v33 = vpack.c.bf16 %v9370_v32, %v9369_v31  ;;  %v11684_v34 = vpack.c.bf16 %v9388_v50, %v9387_v51  ;;  %v11686_v40 = vpack.c.bf16 %v9372_v37, %v9371_v36  ;;  %v9442_v31 = vld [vmem:[%s16176_s4 + $0x538] sm:$0xff]  ;;  %v9459_v32 = vld [vmem:[%s16176_s4 + $0x5c0] sm:$0xff]  ;;  %v9460_v51 = vld [vmem:[%s16176_s4 + $0x5c8] sm:$0xff] }
 0x6da   : > { %2663 = vmatprep.mubr.f32.mxu1 %v14767_v43  ;;  %v9444_v36 = vld [vmem:[%s16176_s4 + $0x548] sm:$0xff]  ;;  %v9461_v37 = vld [vmem:[%s16176_s4 + $0x5d0] sm:$0xff] }
 0x6db   : > { %2664 = vmatmul.mubr.f32.vlgmr.msra.gmra.mrb[10].mxu1 %v14775_v48 }
 0x6dc   : > { %11615 = vmatpush3.bf16.msra.mxu1 %v11614_v41  ;;  %2842 = vmatprep.mubr.f32.mxu1 %v14767_v43  ;;  %v11688_v41 = vpack.c.bf16 %v9390_v39, %v9389_v38  ;;  %v9462_v38 = vld [vmem:[%s16176_s4 + $0x5d8] sm:$0xff] }
 0x6dd   : > { %11617 = vmatprep.subr.bf16.mxu1 %v11616_v44  ;;  %v9373_v44 = vld [vmem:[%s16176_s4 + $0x330] sm:$0xff] }
 0x6de   : > { %v11690_v3 = vpack.c.bf16 %v9374_v46, %v9373_v44  ;;  %v9446_v44 = vld [vmem:[%s16176_s4 + $0x558] sm:$0xff]  ;;  %v9463_v46 = vld [vmem:[%s16176_s4 + $0x5e0] sm:$0xff] }
 0x6e0   : > { %11619 = vmatpush3.bf16.msra.mxu1 %v11618_v2  ;;  %v11692_v2 = vpack.c.bf16 %v9392_v49, %v9391_v47  ;;  %v9464_v47 = vld [vmem:[%s16176_s4 + $0x5e8] sm:$0xff] }
 0x6e1   : > { %11621 = vmatprep.subr.bf16.mxu1 %v11620_v52  ;;  %v9375_v52 = vld [vmem:[%s16176_s4 + $0x340] sm:$0xff] }
 0x6e2   : > { %v11694_v56 = vpack.c.bf16 %v9376_v53, %v9375_v52  ;;  %v9448_v52 = vld [vmem:[%s16176_s4 + $0x568] sm:$0xff]  ;;  %v9465_v53 = vld [vmem:[%s16176_s4 + $0x5f0] sm:$0xff] }
 0x6e4   : > { %11623 = vmatpush3.bf16.msra.mxu1 %v11622_v57  ;;  %v11696_v57 = vpack.c.bf16 %v9394_v55, %v9393_v54  ;;  %v9466_v54 = vld [vmem:[%s16176_s4 + $0x5f8] sm:$0xff] }
 0x6e5   : > { %11625 = vmatprep.subr.bf16.mxu1 %v11624_v58  ;;  %v9377_v58 = vld [vmem:[%s16176_s4 + $0x350] sm:$0xff] }
 0x6e6   : > { %v11698_v62 = vpack.c.bf16 %v9378_v59, %v9377_v58  ;;  %v9450_v58 = vld [vmem:[%s16176_s4 + $0x578] sm:$0xff]  ;;  %v9519_v59 = vld [vmem:[%s16176_s4 + $0x780] sm:$0xff] }
 0x6e8   : > { %11627 = vmatpush3.bf16.msra.mxu1 %v11626_v63  ;;  %v11700_v63 = vpack.c.bf16 %v9396_v61, %v9395_v60  ;;  %v9520_v60 = vld [vmem:[%s16176_s4 + $0x788] sm:$0xff] }
 0x6e9   : > { %11629 = vmatprep.subr.bf16.mxu1 %v11628_v1  ;;  %v9379_v1 = vld [vmem:[%s16176_s4 + $0x360] sm:$0xff] }
 0x6ea   : > { %v11702_v19 = vpack.c.bf16 %v9380_v0, %v9379_v1  ;;  %v9504_v1 = vld [vmem:[%s16176_s4 + $0x708] sm:$0xff]  ;;  %v9521_v0 = vld [vmem:[%s16176_s4 + $0x790] sm:$0xff] }
 0x6ec   : > { %11631 = vmatpush3.bf16.msra.mxu1 %v11630_v5  ;;  %v11704_v5 = vpack.c.bf16 %v9398_v20, %v9397_v4  ;;  %v9522_v4 = vld [vmem:[%s16176_s4 + $0x798] sm:$0xff] }
 0x6ed   : > { %11633 = vmatprep.subr.bf16.mxu1 %v11632_v6  ;;  %v9381_v6 = vld [vmem:[%s16176_s4 + $0x370] sm:$0xff] }
 0x6ee   : > { %v11706_v10 = vpack.c.bf16 %v9382_v7, %v9381_v6  ;;  %v9506_v6 = vld [vmem:[%s16176_s4 + $0x718] sm:$0xff]  ;;  %v9523_v7 = vld [vmem:[%s16176_s4 + $0x7a0] sm:$0xff] }
 0x6f0   : > { %11635 = vmatpush3.bf16.msra.mxu1 %v11634_v11  ;;  %v11740_v11 = vpack.c.bf16 %v9452_v9, %v9451_v8  ;;  %v9524_v8 = vld [vmem:[%s16176_s4 + $0x7a8] sm:$0xff] }
 0x6f1   : > { %11637 = vmatprep.subr.bf16.mxu1 %v11636_v12  ;;  %v9435_v12 = vld [vmem:[%s16176_s4 + $0x500] sm:$0xff] }
 0x6f2   : > { %v11742_v16 = vpack.c.bf16 %v9436_v13, %v9435_v12  ;;  %v9508_v12 = vld [vmem:[%s16176_s4 + $0x728] sm:$0xff]  ;;  %v9525_v13 = vld [vmem:[%s16176_s4 + $0x7b0] sm:$0xff] }
 0x6f4   : > { %11639 = vmatpush3.bf16.msra.mxu1 %v11638_v45  ;;  %v11744_v45 = vpack.c.bf16 %v9454_v15, %v9453_v14  ;;  %v9526_v14 = vld [vmem:[%s16176_s4 + $0x7b8] sm:$0xff] }
 0x6f5   : > { %11641 = vmatprep.subr.bf16.mxu1 %v11640_v17  ;;  %v9437_v17 = vld [vmem:[%s16176_s4 + $0x510] sm:$0xff] }
 0x6f6   : > { %v11746_v23 = vpack.c.bf16 %v9438_v18, %v9437_v17  ;;  %v9510_v17 = vld [vmem:[%s16176_s4 + $0x738] sm:$0xff]  ;;  %v9527_v18 = vld [vmem:[%s16176_s4 + $0x7c0] sm:$0xff] }
 0x6f8   : > { %11643 = vmatpush3.bf16.msra.mxu1 %v11642_v24  ;;  %v11748_v24 = vpack.c.bf16 %v9456_v22, %v9455_v21  ;;  %v9528_v21 = vld [vmem:[%s16176_s4 + $0x7c8] sm:$0xff] }
 0x6f9   : > { %11677 = vmatprep.subr.bf16.mxu1 %v11676_v25  ;;  %v9439_v25 = vld [vmem:[%s16176_s4 + $0x520] sm:$0xff] }
 0x6fa   : > { %v11750_v29 = vpack.c.bf16 %v9440_v26, %v9439_v25  ;;  %v9512_v25 = vld [vmem:[%s16176_s4 + $0x748] sm:$0xff]  ;;  %v9529_v26 = vld [vmem:[%s16176_s4 + $0x7d0] sm:$0xff] }
 0x6fb   : > { %2843 = vmatmul.mubr.f32.vlgmr.msra.gmra.mrb[12].mxu1 %v14775_v48 }
 0x6fc   : > { %11679 = vmatpush3.bf16.msra.mxu1 %v11678_v30  ;;  %3200 = vmatprep.mubr.f32.mxu1 %v14767_v43  ;;  %v11752_v30 = vpack.c.bf16 %v9458_v28, %v9457_v27  ;;  %v9530_v27 = vld [vmem:[%s16176_s4 + $0x7d8] sm:$0xff] }
 0x6fd   : > { %11681 = vmatprep.subr.bf16.mxu1 %v11680_v42  ;;  %v9441_v42 = vld [vmem:[%s16176_s4 + $0x530] sm:$0xff] }
 0x6fe   : > { %v11754_v50 = vpack.c.bf16 %v9442_v31, %v9441_v42  ;;  %v9514_v42 = vld [vmem:[%s16176_s4 + $0x758] sm:$0xff]  ;;  %v9531_v31 = vld [vmem:[%s16176_s4 + $0x7e0] sm:$0xff] }
 0x700   : > { %11683 = vmatpush3.bf16.msra.mxu1 %v11682_v33  ;;  %v11756_v33 = vpack.c.bf16 %v9460_v51, %v9459_v32  ;;  %v9532_v32 = vld [vmem:[%s16176_s4 + $0x7e8] sm:$0xff] }
 0x701   : > { %11685 = vmatprep.subr.bf16.mxu1 %v11684_v34  ;;  %v9443_v34 = vld [vmem:[%s16176_s4 + $0x540] sm:$0xff] }
 0x702   : > { %v11758_v39 = vpack.c.bf16 %v9444_v36, %v9443_v34  ;;  %v9516_v34 = vld [vmem:[%s16176_s4 + $0x768] sm:$0xff]  ;;  %v9533_v36 = vld [vmem:[%s16176_s4 + $0x7f0] sm:$0xff] }
 0x704   : > { %11687 = vmatpush3.bf16.msra.mxu1 %v11686_v40  ;;  %v11760_v40 = vpack.c.bf16 %v9462_v38, %v9461_v37  ;;  %v9534_v37 = vld [vmem:[%s16176_s4 + $0x7f8] sm:$0xff] }
 0x705   : > { %11689 = vmatprep.subr.bf16.mxu1 %v11688_v41  ;;  %v9445_v41 = vld [vmem:[%s16176_s4 + $0x550] sm:$0xff] }
 0x706   : > { %v11762_v49 = vpack.c.bf16 %v9446_v44, %v9445_v41  ;;  %v9518_v41 = vld [vmem:[%s16176_s4 + $0x778] sm:$0xff] }
 0x708   : > { %11691 = vmatpush3.bf16.msra.mxu1 %v11690_v3  ;;  %v11764_v3 = vpack.c.bf16 %v9464_v47, %v9463_v46 }
 0x709   : > { %11693 = vmatprep.subr.bf16.mxu1 %v11692_v2  ;;  %v9447_v2 = vld [vmem:[%s16176_s4 + $0x560] sm:$0xff] }
 0x70a   : > { %v11766_v55 = vpack.c.bf16 %v9448_v52, %v9447_v2  ;;  %v9349_v2 = vld [vmem:[%s16176_s4 + $0x280] sm:$0xff]  ;;  %v9350_v52 = vld [vmem:[%s16176_s4 + $0x288] sm:$0xff] }
 0x70c   : > { %11695 = vmatpush3.bf16.msra.mxu1 %v11694_v56  ;;  %v11768_v56 = vpack.c.bf16 %v9466_v54, %v9465_v53  ;;  %v9333_v53 = vld [vmem:[%s16176_s4 + $0x200] sm:$0xff]  ;;  %v9334_v54 = vld [vmem:[%s16176_s4 + $0x208] sm:$0xff] }
 0x70d   : > { %11697 = vmatprep.subr.bf16.mxu1 %v11696_v57  ;;  %v9449_v57 = vld [vmem:[%s16176_s4 + $0x570] sm:$0xff] }
 0x70e   : > { %v11770_v61 = vpack.c.bf16 %v9450_v58, %v9449_v57  ;;  %v9352_v57 = vld [vmem:[%s16176_s4 + $0x298] sm:$0xff] }
 0x710   : > { %11699 = vmatpush3.bf16.msra.mxu1 %v11698_v62  ;;  %v11804_v62 = vpack.c.bf16 %v9520_v60, %v9519_v59  ;;  %v11644_v59 = vpack.c.bf16 %v9350_v52, %v9349_v2  ;;  %v9417_v52 = vld [vmem:[%s16176_s4 + $0x480] sm:$0xff] }
 0x711   : > { %11701 = vmatprep.subr.bf16.mxu1 %v11700_v63  ;;  %v9503_v63 = vld [vmem:[%s16176_s4 + $0x700] sm:$0xff] }
 0x712   : > { %v11806_v20 = vpack.c.bf16 %v9504_v1, %v9503_v63  ;;  %v9335_v1 = vld [vmem:[%s16176_s4 + $0x210] sm:$0xff] }
 0x714   : > { %11703 = vmatpush3.bf16.msra.mxu1 %v11702_v19  ;;  %v11808_v19 = vpack.c.bf16 %v9522_v4, %v9521_v0  ;;  %v9336_v0 = vld [vmem:[%s16176_s4 + $0x218] sm:$0xff]  ;;  %v9353_v4 = vld [vmem:[%s16176_s4 + $0x2a0] sm:$0xff] }
 0x715   : > { %11705 = vmatprep.subr.bf16.mxu1 %v11704_v5  ;;  %v9505_v5 = vld [vmem:[%s16176_s4 + $0x710] sm:$0xff] }
 0x716   : > { %v11810_v9 = vpack.c.bf16 %v9506_v6, %v9505_v5  ;;  %v9337_v6 = vld [vmem:[%s16176_s4 + $0x220] sm:$0xff] }
 0x718   : > { %11707 = vmatpush3.bf16.msra.mxu1 %v11706_v10  ;;  %v11812_v10 = vpack.c.bf16 %v9524_v8, %v9523_v7  ;;  %v9338_v7 = vld [vmem:[%s16176_s4 + $0x228] sm:$0xff]  ;;  %v9355_v8 = vld [vmem:[%s16176_s4 + $0x2b0] sm:$0xff] }
 0x719   : > { %11741 = vmatprep.subr.bf16.mxu1 %v11740_v11  ;;  %v9507_v11 = vld [vmem:[%s16176_s4 + $0x720] sm:$0xff] }
 0x71a   : > { %v11814_v15 = vpack.c.bf16 %v9508_v12, %v9507_v11  ;;  %v9339_v12 = vld [vmem:[%s16176_s4 + $0x230] sm:$0xff] }
 0x71b   : > { %3201 = vmatmul.mubr.f32.vlgmr.msra.gmra.mrb[14].mxu1 %v14775_v48 }
 0x71c   : > { %11743 = vmatpush3.bf16.msra.mxu1 %v11742_v16  ;;  %3558 = vmatprep.mubr.f32.mxu1 %v14767_v43  ;;  %v11816_v16 = vpack.c.bf16 %v9526_v14, %v9525_v13  ;;  %v9340_v13 = vld [vmem:[%s16176_s4 + $0x238] sm:$0xff]  ;;  %v9357_v14 = vld [vmem:[%s16176_s4 + $0x2c0] sm:$0xff] }
 0x71d   : > { %11745 = vmatprep.subr.bf16.mxu1 %v11744_v45  ;;  %v9509_v45 = vld [vmem:[%s16176_s4 + $0x730] sm:$0xff] }
 0x71e   : > { %v11818_v22 = vpack.c.bf16 %v9510_v17, %v9509_v45  ;;  %v9341_v17 = vld [vmem:[%s16176_s4 + $0x240] sm:$0xff] }
 0x720   : > { %11747 = vmatpush3.bf16.msra.mxu1 %v11746_v23  ;;  %v11820_v23 = vpack.c.bf16 %v9528_v21, %v9527_v18  ;;  %v9342_v18 = vld [vmem:[%s16176_s4 + $0x248] sm:$0xff]  ;;  %v9359_v21 = vld [vmem:[%s16176_s4 + $0x2d0] sm:$0xff] }
 0x721   : > { %11749 = vmatprep.subr.bf16.mxu1 %v11748_v24  ;;  %v9511_v24 = vld [vmem:[%s16176_s4 + $0x740] sm:$0xff] }
 0x722   : > { %v11822_v28 = vpack.c.bf16 %v9512_v25, %v9511_v24  ;;  %v9343_v25 = vld [vmem:[%s16176_s4 + $0x250] sm:$0xff] }
 0x724   : > { %11751 = vmatpush3.bf16.msra.mxu1 %v11750_v29  ;;  %v11824_v29 = vpack.c.bf16 %v9530_v27, %v9529_v26  ;;  %v9344_v26 = vld [vmem:[%s16176_s4 + $0x258] sm:$0xff]  ;;  %v9361_v27 = vld [vmem:[%s16176_s4 + $0x2e0] sm:$0xff] }
 0x725   : > { %11753 = vmatprep.subr.bf16.mxu1 %v11752_v30  ;;  %v9513_v30 = vld [vmem:[%s16176_s4 + $0x750] sm:$0xff] }
 0x726   : > { %v11826_v51 = vpack.c.bf16 %v9514_v42, %v9513_v30  ;;  %v9345_v42 = vld [vmem:[%s16176_s4 + $0x260] sm:$0xff] }
 0x728   : > { %11755 = vmatpush3.bf16.msra.mxu1 %v11754_v50  ;;  %v11828_v50 = vpack.c.bf16 %v9532_v32, %v9531_v31  ;;  %v9346_v31 = vld [vmem:[%s16176_s4 + $0x268] sm:$0xff]  ;;  %v9363_v32 = vld [vmem:[%s16176_s4 + $0x2f0] sm:$0xff] }
 0x729   : > { %11757 = vmatprep.subr.bf16.mxu1 %v11756_v33  ;;  %v9515_v33 = vld [vmem:[%s16176_s4 + $0x760] sm:$0xff] }
 0x72a   : > { %v11830_v38 = vpack.c.bf16 %v9516_v34, %v9515_v33  ;;  %v9347_v34 = vld [vmem:[%s16176_s4 + $0x270] sm:$0xff] }
 0x72c   : > { %11759 = vmatpush3.bf16.msra.mxu1 %v11758_v39  ;;  %v11832_v39 = vpack.c.bf16 %v9534_v37, %v9533_v36  ;;  %v9348_v36 = vld [vmem:[%s16176_s4 + $0x278] sm:$0xff] }
 0x72d   : > { %11761 = vmatprep.subr.bf16.mxu1 %v11760_v40  ;;  %v9517_v40 = vld [vmem:[%s16176_s4 + $0x770] sm:$0xff]  ;;  %v11674_v37 = vpack.c.bf16 %v9348_v36, %v9347_v34 }
 0x72e   : > { %v11834_v44 = vpack.c.bf16 %v9518_v41, %v9517_v40  ;;  %v9415_v36 = vld [vmem:[%s16176_s4 + $0x470] sm:$0xff] }
 0x730   : > { %11763 = vmatpush3.bf16.msra.mxu1 %v11762_v49 }
 0x731   : > { %11765 = vmatprep.subr.bf16.mxu1 %v11764_v3  ;;  %v2669_v3 = vld [vmem:[%s16177_s5] sm:$0xff] }
 0x734   : > { %11767 = vmatpush3.bf16.msra.mxu1 %v11766_v55 }
 0x735   : > { %11769 = vmatprep.subr.bf16.mxu1 %v11768_v56  ;;  %v9351_v56 = vld [vmem:[%s16176_s4 + $0x290] sm:$0xff] }
 0x736   : > { %v11648_v63 = vpack.c.bf16 %v9352_v57, %v9351_v56  ;;  %v9365_v56 = vld [vmem:[%s16177_s5 + $0x10] sm:$0xff] }
 0x738   : > { %11771 = vmatpush3.bf16.msra.mxu1 %v11770_v61  ;;  %v9331_v61 = vld [vmem:[%s16177_s5 + $0x8] sm:$0xff] }
 0x739   : > { %11805 = vmatprep.subr.bf16.mxu1 %v11804_v62  ;;  %v11646_v62 = vpack.c.bf16 %v9334_v54, %v9333_v53  ;;  %v9418_v53 = vld [vmem:[%s16176_s4 + $0x488] sm:$0xff] }
 0x73a   : > { %v11708_v57 = vpack.c.bf16 %v9418_v53, %v9417_v52  ;;  %v9469_v52 = vld [vmem:[%s16176_s4 + $0x600] sm:$0xff]  ;;  %v9470_v53 = vld [vmem:[%s16176_s4 + $0x608] sm:$0xff] }
 0x73b   : > { %3559 = vmatmul.mubr.f32.vlgmr.msra.gmra.mrb[16].mxu1 %v14775_v48 }
 0x73c   : > { %11807 = vmatpush3.bf16.msra.mxu1 %v11806_v20  ;;  %3916 = vmatprep.mubr.f32.mxu1 %v14767_v43  ;;  %v9354_v20 = vld [vmem:[%s16176_s4 + $0x2a8] sm:$0xff] }
 0x73d   : > { %11809 = vmatprep.subr.bf16.mxu1 %v11808_v19  ;;  %v11650_v19 = vpack.c.bf16 %v9336_v0, %v9335_v1  ;;  %v11652_v5 = vpack.c.bf16 %v9354_v20, %v9353_v4  ;;  %v9403_v0 = vld [vmem:[%s16176_s4 + $0x410] sm:$0xff]  ;;  %v9404_v4 = vld [vmem:[%s16176_s4 + $0x418] sm:$0xff]  ;;  %v9421_v20 = vld [vmem:[%s16176_s4 + $0x4a0] sm:$0xff] }
 0x740   : > { %11811 = vmatpush3.bf16.msra.mxu1 %v11810_v9  ;;  %v9356_v9 = vld [vmem:[%s16176_s4 + $0x2b8] sm:$0xff] }
 0x741   : > { %11813 = vmatprep.subr.bf16.mxu1 %v11812_v10  ;;  %v11654_v10 = vpack.c.bf16 %v9338_v7, %v9337_v6  ;;  %v11656_v11 = vpack.c.bf16 %v9356_v9, %v9355_v8  ;;  %v9405_v7 = vld [vmem:[%s16176_s4 + $0x420] sm:$0xff]  ;;  %v9406_v8 = vld [vmem:[%s16176_s4 + $0x428] sm:$0xff]  ;;  %v9423_v9 = vld [vmem:[%s16176_s4 + $0x4b0] sm:$0xff] }
 0x744   : > { %11815 = vmatpush3.bf16.msra.mxu1 %v11814_v15  ;;  %v9358_v15 = vld [vmem:[%s16176_s4 + $0x2c8] sm:$0xff] }
 0x745   : > { %11817 = vmatprep.subr.bf16.mxu1 %v11816_v16  ;;  %v11658_v16 = vpack.c.bf16 %v9340_v13, %v9339_v12  ;;  %v11660_v45 = vpack.c.bf16 %v9358_v15, %v9357_v14  ;;  %v9407_v13 = vld [vmem:[%s16176_s4 + $0x430] sm:$0xff]  ;;  %v9408_v14 = vld [vmem:[%s16176_s4 + $0x438] sm:$0xff]  ;;  %v9425_v15 = vld [vmem:[%s16176_s4 + $0x4c0] sm:$0xff] }
 0x748   : > { %11819 = vmatpush3.bf16.msra.mxu1 %v11818_v22  ;;  %v9360_v22 = vld [vmem:[%s16176_s4 + $0x2d8] sm:$0xff] }
 0x749   : > { %11821 = vmatprep.subr.bf16.mxu1 %v11820_v23  ;;  %v11662_v23 = vpack.c.bf16 %v9342_v18, %v9341_v17  ;;  %v11664_v24 = vpack.c.bf16 %v9360_v22, %v9359_v21  ;;  %v9409_v18 = vld [vmem:[%s16176_s4 + $0x440] sm:$0xff]  ;;  %v9410_v21 = vld [vmem:[%s16176_s4 + $0x448] sm:$0xff]  ;;  %v9427_v22 = vld [vmem:[%s16176_s4 + $0x4d0] sm:$0xff] }
 0x74c   : > { %11823 = vmatpush3.bf16.msra.mxu1 %v11822_v28  ;;  %v9362_v28 = vld [vmem:[%s16176_s4 + $0x2e8] sm:$0xff] }
 0x74d   : > { %11825 = vmatprep.subr.bf16.mxu1 %v11824_v29  ;;  %v11666_v29 = vpack.c.bf16 %v9344_v26, %v9343_v25  ;;  %v11668_v30 = vpack.c.bf16 %v9362_v28, %v9361_v27  ;;  %v9411_v26 = vld [vmem:[%s16176_s4 + $0x450] sm:$0xff]  ;;  %v9412_v27 = vld [vmem:[%s16176_s4 + $0x458] sm:$0xff]  ;;  %v9429_v28 = vld [vmem:[%s16176_s4 + $0x4e0] sm:$0xff] }
 0x750   : > { %11827 = vmatpush3.bf16.msra.mxu1 %v11826_v51  ;;  %v9364_v51 = vld [vmem:[%s16176_s4 + $0x2f8] sm:$0xff] }
 0x751   : > { %11829 = vmatprep.subr.bf16.mxu1 %v11828_v50  ;;  %v11670_v50 = vpack.c.bf16 %v9346_v31, %v9345_v42  ;;  %v11672_v33 = vpack.c.bf16 %v9364_v51, %v9363_v32  ;;  %v9413_v31 = vld [vmem:[%s16176_s4 + $0x460] sm:$0xff]  ;;  %v9414_v32 = vld [vmem:[%s16176_s4 + $0x468] sm:$0xff]  ;;  %v9431_v51 = vld [vmem:[%s16176_s4 + $0x4f0] sm:$0xff] }
 0x754   : > { %11831 = vmatpush3.bf16.msra.mxu1 %v11830_v38 }
 0x755   : > { %11833 = vmatprep.subr.bf16.mxu1 %v11832_v39 }
 0x758   : > { %11835 = vmatpush3.bf16.msra.mxu1 %v11834_v44 }
 0x75b   : > { %3917 = vmatmul.mubr.f32.vlgmr.msra.gmra.mrb[18].mxu1 %v14775_v48 }
 0x75c   : > { %10444 = vmatprep.mubr.msk.f32.mxu1 %vm12551_vm4, %v12549_v35 }
 0x7ae   : > { %v9785_v46 = vpop.f32.mrb[10].mxu1 }
 0x7af   : > { %v9786_v47 = vpop.f32.mrb[11].mxu1 }
 0x7b0   : > { %v9787_v49 = vadd.f32 %v9786_v47, %v9785_v46 }
 0x7b2   : > { %10384 = vmatpush3.msra.mxu0 %v9787_v49 }
 0x7b3   : > { %10386 = vmatmul.mubr.msk.f32.vlgmr.msra.gmra.mrb[10].mxu0 %vm2670_vm5, %v2669_v3  ;;  %10388 = vmatprep.subr.mxu0 %v12549_v35 }
 0x7b4   : > { %10390 = vmatprep.mubr.msk.f32.mxu0 %vm12551_vm4, %v12549_v35 }
 0x7ce   : > { %v9822_v55 = vpop.f32.mrb[12].mxu1 }
 0x7cf   : > { %v9823_v58 = vpop.f32.mrb[13].mxu1 }
 0x7d0   : > { %v9824_v60 = vadd.f32 %v9823_v58, %v9822_v55  ;;  %v9401_v58 = vld [vmem:[%s16176_s4 + $0x400] sm:$0xff] }
 0x7d2   : > { %10389 = vmatpush3.msra.mxu0 %v9824_v60  ;;  %v9419_v60 = vld [vmem:[%s16176_s4 + $0x490] sm:$0xff] }
 0x7d3   : > { %10391 = vmatmul.mubr.msk.f32.vlgmr.msra.gmra.mrb[10].mxu0 %vm2670_vm5, %v9331_v61  ;;  %11645 = vmatprep.subr.bf16.mxu0 %v11644_v59  ;;  %v9402_v59 = vld [vmem:[%s16176_s4 + $0x408] sm:$0xff]  ;;  %v9420_v61 = vld [vmem:[%s16176_s4 + $0x498] sm:$0xff] }
 0x7d4   : > { %11647 = vmatpush3.bf16.msra.mxu0 %v11646_v62  ;;  %3021 = vmatprep.mubr.f32.mxu0 %v14767_v43  ;;  %v9399_v62 = vld [vmem:[%s16177_s5 + $0x18] sm:$0xff]  ;;  %v11712_v1 = vpack.c.bf16 %v9420_v61, %v9419_v60  ;;  %v9489_v60 = vld [vmem:[%s16176_s4 + $0x6a0] sm:$0xff]  ;;  %v9490_v61 = vld [vmem:[%s16176_s4 + $0x6a8] sm:$0xff] }
 0x7d5   : > { %11649 = vmatprep.subr.bf16.mxu0 %v11648_v63  ;;  %v11710_v63 = vpack.c.bf16 %v9402_v59, %v9401_v58  ;;  %v9471_v58 = vld [vmem:[%s16176_s4 + $0x610] sm:$0xff]  ;;  %v9472_v59 = vld [vmem:[%s16176_s4 + $0x618] sm:$0xff] }
 0x7d8   : > { %11651 = vmatpush3.bf16.msra.mxu0 %v11650_v19  ;;  %v9422_v19 = vld [vmem:[%s16176_s4 + $0x4a8] sm:$0xff] }
 0x7d9   : > { %11653 = vmatprep.subr.bf16.mxu0 %v11652_v5  ;;  %v11714_v5 = vpack.c.bf16 %v9404_v4, %v9403_v0  ;;  %v11716_v6 = vpack.c.bf16 %v9422_v19, %v9421_v20  ;;  %v9474_v0 = vld [vmem:[%s16176_s4 + $0x628] sm:$0xff]  ;;  %v9491_v4 = vld [vmem:[%s16176_s4 + $0x6b0] sm:$0xff]  ;;  %v9492_v20 = vld [vmem:[%s16176_s4 + $0x6b8] sm:$0xff] }
 0x7dc   : > { %11655 = vmatpush3.bf16.msra.mxu0 %v11654_v10  ;;  %v9424_v10 = vld [vmem:[%s16176_s4 + $0x4b8] sm:$0xff] }
 0x7dd   : > { %11657 = vmatprep.subr.bf16.mxu0 %v11656_v11  ;;  %v11718_v11 = vpack.c.bf16 %v9406_v8, %v9405_v7  ;;  %v11720_v12 = vpack.c.bf16 %v9424_v10, %v9423_v9  ;;  %v9476_v7 = vld [vmem:[%s16176_s4 + $0x638] sm:$0xff]  ;;  %v9493_v8 = vld [vmem:[%s16176_s4 + $0x6c0] sm:$0xff]  ;;  %v9494_v9 = vld [vmem:[%s16176_s4 + $0x6c8] sm:$0xff] }
 0x7e0   : > { %11659 = vmatpush3.bf16.msra.mxu0 %v11658_v16  ;;  %v9426_v16 = vld [vmem:[%s16176_s4 + $0x4c8] sm:$0xff] }
 0x7e1   : > { %11661 = vmatprep.subr.bf16.mxu0 %v11660_v45  ;;  %v11722_v45 = vpack.c.bf16 %v9408_v14, %v9407_v13  ;;  %v11724_v17 = vpack.c.bf16 %v9426_v16, %v9425_v15  ;;  %v9478_v13 = vld [vmem:[%s16176_s4 + $0x648] sm:$0xff]  ;;  %v9495_v14 = vld [vmem:[%s16176_s4 + $0x6d0] sm:$0xff]  ;;  %v9496_v15 = vld [vmem:[%s16176_s4 + $0x6d8] sm:$0xff] }
 0x7e4   : > { %11663 = vmatpush3.bf16.msra.mxu0 %v11662_v23  ;;  %v9428_v23 = vld [vmem:[%s16176_s4 + $0x4d8] sm:$0xff] }
 0x7e5   : > { %11665 = vmatprep.subr.bf16.mxu0 %v11664_v24  ;;  %v11726_v24 = vpack.c.bf16 %v9410_v21, %v9409_v18  ;;  %v11728_v25 = vpack.c.bf16 %v9428_v23, %v9427_v22  ;;  %v9480_v18 = vld [vmem:[%s16176_s4 + $0x658] sm:$0xff]  ;;  %v9497_v21 = vld [vmem:[%s16176_s4 + $0x6e0] sm:$0xff]  ;;  %v9498_v22 = vld [vmem:[%s16176_s4 + $0x6e8] sm:$0xff] }
 0x7e8   : > { %11667 = vmatpush3.bf16.msra.mxu0 %v11666_v29  ;;  %v9430_v29 = vld [vmem:[%s16176_s4 + $0x4e8] sm:$0xff] }
 0x7e9   : > { %11669 = vmatprep.subr.bf16.mxu0 %v11668_v30  ;;  %v11730_v30 = vpack.c.bf16 %v9412_v27, %v9411_v26  ;;  %v11732_v42 = vpack.c.bf16 %v9430_v29, %v9429_v28  ;;  %v9482_v26 = vld [vmem:[%s16176_s4 + $0x668] sm:$0xff]  ;;  %v9499_v27 = vld [vmem:[%s16176_s4 + $0x6f0] sm:$0xff]  ;;  %v9500_v28 = vld [vmem:[%s16176_s4 + $0x6f8] sm:$0xff] }
 0x7ec   : > { %11671 = vmatpush3.bf16.msra.mxu0 %v11670_v50  ;;  %v9432_v50 = vld [vmem:[%s16176_s4 + $0x4f8] sm:$0xff] }
 0x7ed   : > { %11673 = vmatprep.subr.bf16.mxu0 %v11672_v33  ;;  %v11734_v33 = vpack.c.bf16 %v9414_v32, %v9413_v31  ;;  %v11736_v34 = vpack.c.bf16 %v9432_v50, %v9431_v51  ;;  %v9484_v31 = vld [vmem:[%s16176_s4 + $0x678] sm:$0xff]  ;;  %v9553_v50 = vld [vmem:[%s16176_s4 + $0x880] sm:$0xff] }
 0x7ee   : > { %v9896_v38 = vpop.f32.mrb[14].mxu1 }
 0x7ef   : > { %v9897_v39 = vpop.f32.mrb[15].mxu1 }
 0x7f0   : > { %v9898_v40 = vadd.f32 %v9897_v39, %v9896_v38  ;;  %11675 = vmatpush3.bf16.msra.mxu0 %v11674_v37  ;;  %v9416_v37 = vld [vmem:[%s16176_s4 + $0x478] sm:$0xff] }
 0x7f1   : > { %10393 = vmatprep.subr.mxu0 %v12549_v35  ;;  %v11738_v38 = vpack.c.bf16 %v9416_v37, %v9415_v36  ;;  %v9501_v37 = vld [vmem:[%s16177_s5 + $0x30] sm:$0xff] }
 0x7f3   : > { %3022 = vmatmul.mubr.f32.vlgmr.msra.gmra.mrb[12].mxu0 %v14775_v48 }
 0x7f4   : > { %10395 = vmatprep.mubr.msk.f32.mxu0 %vm12551_vm4, %v12549_v35 }
 0x80e   : > { %v9970_v41 = vpop.f32.mrb[16].mxu1 }
 0x80f   : > { %v9971_v44 = vpop.f32.mrb[17].mxu1 }
 0x810   : > { %v15263_v46 = vadd.f32 %v9971_v44, %v9970_v41  ;;  %v9486_v41 = vld [vmem:[%s16176_s4 + $0x688] sm:$0xff] }
 0x82e   : > { %v10044_v47 = vpop.f32.mrb[18].mxu1 }
 0x82f   : > { %v10045_v49 = vpop.f32.mrb[19].mxu1 }
 0x830   : > { %v15265_v3 = vadd.f32 %v10045_v49, %v10044_v47  ;;  %v9433_v49 = vld [vmem:[%s16177_s5 + $0x20] sm:$0xff] }
 0x8c6   : > { %v9859_v2 = vpop.f32.mrb[12].mxu0 }
 0x8c7   : > { %v9860_v54 = vpop.f32.mrb[13].mxu0 }
 0x8c8   : > { %v9861_v55 = vadd.f32 %v9860_v54, %v9859_v2  ;;  %v9487_v54 = vld [vmem:[%s16176_s4 + $0x690] sm:$0xff] }
 0x8ca   : > { %10394 = vmatpush3.msra.mxu0 %v9861_v55  ;;  %v9467_v55 = vld [vmem:[%s16177_s5 + $0x28] sm:$0xff] }
 0x8cb   : > { %10396 = vmatmul.mubr.msk.f32.vlgmr.msra.gmra.mrb[10].mxu0 %vm2670_vm5, %v9365_v56  ;;  %10398 = vmatprep.subr.mxu0 %v12549_v35  ;;  %v11774_v56 = vpack.c.bf16 %v9470_v53, %v9469_v52  ;;  %v9540_v52 = vld [vmem:[%s16176_s4 + $0x818] sm:$0xff]  ;;  %v9557_v53 = vld [vmem:[%s16176_s4 + $0x8a0] sm:$0xff] }
 0x8cc   : > { %10399 = vmatpush3.msra.mxu0 %v9898_v40  ;;  %10400 = vmatprep.mubr.msk.f32.mxu0 %vm12551_vm4, %v12549_v35  ;;  %v9485_v40 = vld [vmem:[%s16176_s4 + $0x680] sm:$0xff] }
 0x8cd   : > { %11709 = vmatprep.subr.bf16.mxu0 %v11708_v57  ;;  %v11772_v2 = vpack.c.bf16 %v9486_v41, %v9485_v40  ;;  %v9538_v40 = vld [vmem:[%s16176_s4 + $0x808] sm:$0xff]  ;;  %v9555_v41 = vld [vmem:[%s16176_s4 + $0x890] sm:$0xff] }
 0x8d3   : > { %10401 = vmatmul.mubr.msk.f32.vlgmr.msra.gmra.mrb[10].mxu0 %vm2670_vm5, %v9399_v62  ;;  %v11778_v62 = vpack.c.bf16 %v9472_v59, %v9471_v58  ;;  %v9559_v58 = vld [vmem:[%s16176_s4 + $0x8b0] sm:$0xff]  ;;  %v9560_v59 = vld [vmem:[%s16176_s4 + $0x8b8] sm:$0xff] }
 0x8d4   : > { %11711 = vmatpush3.bf16.msra.mxu0 %v11710_v63  ;;  %3379 = vmatprep.mubr.f32.mxu0 %v14767_v43  ;;  %v11780_v63 = vpack.c.bf16 %v9490_v61, %v9489_v60  ;;  %v11848_v60 = vpack.c.bf16 %v9560_v59, %v9559_v58  ;;  %v9543_v61 = vld [vmem:[%s16176_s4 + $0x830] sm:$0xff] }
 0x8d5   : > { %11713 = vmatprep.subr.bf16.mxu0 %v11712_v1  ;;  %v9473_v1 = vld [vmem:[%s16176_s4 + $0x620] sm:$0xff]  ;;  %v4856_v58 = vld [vmem:[#allocation3 + $0x108] sm:$0xff] }
 0x8d6   : > { %v11782_v19 = vpack.c.bf16 %v9474_v0, %v9473_v1  ;;  %v9562_v1 = vld [vmem:[%s16176_s4 + $0x8c8] sm:$0xff] }
 0x8d8   : > { %11715 = vmatpush3.bf16.msra.mxu0 %v11714_v5  ;;  %v11784_v5 = vpack.c.bf16 %v9492_v20, %v9491_v4  ;;  %v9545_v20 = vld [vmem:[%s16176_s4 + $0x840] sm:$0xff] }
 0x8d9   : > { %11717 = vmatprep.subr.bf16.mxu0 %v11716_v6  ;;  %v9475_v6 = vld [vmem:[%s16176_s4 + $0x630] sm:$0xff] }
 0x8da   : > { %v11786_v10 = vpack.c.bf16 %v9476_v7, %v9475_v6  ;;  %v9564_v6 = vld [vmem:[%s16176_s4 + $0x8d8] sm:$0xff] }
 0x8dc   : > { %11719 = vmatpush3.bf16.msra.mxu0 %v11718_v11  ;;  %v11788_v11 = vpack.c.bf16 %v9494_v9, %v9493_v8  ;;  %v9547_v9 = vld [vmem:[%s16176_s4 + $0x850] sm:$0xff] }
 0x8dd   : > { %11721 = vmatprep.subr.bf16.mxu0 %v11720_v12  ;;  %v9477_v12 = vld [vmem:[%s16176_s4 + $0x640] sm:$0xff] }
 0x8de   : > { %v11790_v16 = vpack.c.bf16 %v9478_v13, %v9477_v12  ;;  %v9566_v12 = vld [vmem:[%s16176_s4 + $0x8e8] sm:$0xff] }
 0x8e0   : > { %11723 = vmatpush3.bf16.msra.mxu0 %v11722_v45  ;;  %v11792_v45 = vpack.c.bf16 %v9496_v15, %v9495_v14  ;;  %v9549_v15 = vld [vmem:[%s16176_s4 + $0x860] sm:$0xff] }
 0x8e1   : > { %11725 = vmatprep.subr.bf16.mxu0 %v11724_v17  ;;  %v9479_v17 = vld [vmem:[%s16176_s4 + $0x650] sm:$0xff] }
 0x8e2   : > { %v11794_v23 = vpack.c.bf16 %v9480_v18, %v9479_v17  ;;  %v9568_v17 = vld [vmem:[%s16176_s4 + $0x8f8] sm:$0xff] }
 0x8e4   : > { %11727 = vmatpush3.bf16.msra.mxu0 %v11726_v24  ;;  %v11796_v24 = vpack.c.bf16 %v9498_v22, %v9497_v21  ;;  %v9551_v22 = vld [vmem:[%s16176_s4 + $0x870] sm:$0xff] }
 0x8e5   : > { %11729 = vmatprep.subr.bf16.mxu0 %v11728_v25  ;;  %v9481_v25 = vld [vmem:[%s16176_s4 + $0x660] sm:$0xff] }
 0x8e6   : > { %v11798_v29 = vpack.c.bf16 %v9482_v26, %v9481_v25  ;;  %v12552_v25 = vmov 0.0|0.0   ;;  %v4192_v26 = vld [vmem:[#allocation3] sm:$0xff] }
 0x8e7   : > { %11868 = vmatprep.subr.bf16.mxu1 %v12552_v25 }
 0x8e8   : > { %11731 = vmatpush3.bf16.msra.mxu0 %v11730_v30  ;;  %v11800_v30 = vpack.c.bf16 %v9500_v28, %v9499_v27  ;;  %v4193_v27 = vld [vmem:[#allocation3 + $0x8] sm:$0xff] }
 0x8e9   : > { %11733 = vmatprep.subr.bf16.mxu0 %v11732_v42  ;;  %v9483_v42 = vld [vmem:[%s16176_s4 + $0x670] sm:$0xff]  ;;  %v11869_v28 = vpack.c.bf16 %v4193_v27, %v4192_v26  ;;  %v5353_v26 = vld [vmem:[#allocation3 + $0x1d8] sm:$0xff] }
 0x8ea   : > { %v11802_v32 = vpack.c.bf16 %v9484_v31, %v9483_v42  ;;  %v4196_v31 = vld [vmem:[#allocation3 + $0x20] sm:$0xff] }
 0x8eb   : > { %11870 = vmatpush3.bf16.msra.mxu1 %v11869_v28  ;;  %v5354_v28 = vld [vmem:[#allocation3 + $0x1e0] sm:$0xff] }
 0x8ec   : > { %11735 = vmatpush3.bf16.msra.mxu0 %v11734_v33  ;;  %v9554_v33 = vld [vmem:[%s16176_s4 + $0x888] sm:$0xff]  ;;  %11871 = vmatprep.subr.bf16.mxu1 %v12552_v25 }
 0x8ed   : > { %11737 = vmatprep.subr.bf16.mxu0 %v11736_v34 }
 0x8f0   : > { %11739 = vmatpush3.bf16.msra.mxu0 %v11738_v38  ;;  %v11836_v38 = vpack.c.bf16 %v9554_v33, %v9553_v50  ;;  %v4526_v50 = vld [vmem:[#allocation3 + $0x88] sm:$0xff] }
 0x8f1   : > { %10403 = vmatprep.subr.mxu0 %v12549_v35 }
 0x8f3   : > { %3380 = vmatmul.mubr.f32.vlgmr.msra.gmra.mrb[14].mxu0 %v14775_v48 }
 0x8f4   : > { %10405 = vmatprep.mubr.msk.f32.mxu0 %vm12551_vm4, %v12549_v35 }
 0x9c6   : > { %v9933_v39 = vpop.f32.mrb[14].mxu0 }
 0x9c7   : > { %v9934_v44 = vpop.f32.mrb[15].mxu0 }
 0x9c8   : > { %v9935_v47 = vadd.f32 %v9934_v44, %v9933_v39  ;;  %v9537_v39 = vld [vmem:[%s16176_s4 + $0x800] sm:$0xff]  ;;  %v9535_v44 = vld [vmem:[%s16177_s5 + $0x38] sm:$0xff] }
 0x9ca   : > { %10404 = vmatpush3.msra.mxu0 %v9935_v47  ;;  %v11838_v47 = vpack.c.bf16 %v9538_v40, %v9537_v39  ;;  %v4527_v39 = vld [vmem:[#allocation3 + $0x90] sm:$0xff]  ;;  %v4528_v40 = vld [vmem:[#allocation3 + $0x98] sm:$0xff] }
 0x9cb   : > { %10406 = vmatmul.mubr.msk.f32.vlgmr.msra.gmra.mrb[10].mxu0 %vm2670_vm5, %v9433_v49  ;;  %10408 = vmatprep.subr.mxu0 %v12549_v35 }
 0x9cc   : > { %10409 = vmatpush3.msra.mxu0 %v15263_v46  ;;  %10410 = vmatprep.mubr.msk.f32.mxu0 %vm12551_vm4, %v12549_v35  ;;  %v9488_v46 = vld [vmem:[%s16176_s4 + $0x698] sm:$0xff] }
 0x9cd   : > { %11773 = vmatprep.subr.bf16.mxu0 %v11772_v2  ;;  %v11776_v57 = vpack.c.bf16 %v9488_v46, %v9487_v54  ;;  %v9539_v2 = vld [vmem:[%s16176_s4 + $0x810] sm:$0xff]  ;;  %v9558_v54 = vld [vmem:[%s16176_s4 + $0x8a8] sm:$0xff] }
 0x9ce   : > { %v11842_v46 = vpack.c.bf16 %v9540_v52, %v9539_v2  ;;  %v4532_v2 = vld [vmem:[#allocation3 + $0xb8] sm:$0xff] }
 0x9d3   : > { %10411 = vmatmul.mubr.msk.f32.vlgmr.msra.gmra.mrb[10].mxu0 %vm2670_vm5, %v9467_v55  ;;  %v11844_v55 = vpack.c.bf16 %v9558_v54, %v9557_v53  ;;  %v4198_v53 = vld [vmem:[#allocation3 + $0x30] sm:$0xff]  ;;  %v4199_v54 = vld [vmem:[#allocation3 + $0x38] sm:$0xff] }
 0x9d4   : > { %11775 = vmatpush3.bf16.msra.mxu0 %v11774_v56  ;;  %3737 = vmatprep.mubr.f32.mxu0 %v14767_v43  ;;  %v9541_v56 = vld [vmem:[%s16176_s4 + $0x820] sm:$0xff] }
 0x9d5   : > { %11777 = vmatprep.subr.bf16.mxu0 %v11776_v57  ;;  %v9542_v57 = vld [vmem:[%s16176_s4 + $0x828] sm:$0xff] }
 0x9d8   : > { %11779 = vmatpush3.bf16.msra.mxu0 %v11778_v62  ;;  %v9544_v62 = vld [vmem:[%s16176_s4 + $0x838] sm:$0xff] }
 0x9d9   : > { %11781 = vmatprep.subr.bf16.mxu0 %v11780_v63  ;;  %v9561_v63 = vld [vmem:[%s16176_s4 + $0x8c0] sm:$0xff]  ;;  %v11850_v0 = vpack.c.bf16 %v9544_v62, %v9543_v61  ;;  %v4857_v62 = vld [vmem:[#allocation3 + $0x110] sm:$0xff] }
 0x9da   : > { %v11852_v4 = vpack.c.bf16 %v9562_v1, %v9561_v63  ;;  %v4858_v63 = vld [vmem:[#allocation3 + $0x118] sm:$0xff] }
 0x9dc   : > { %11783 = vmatpush3.bf16.msra.mxu0 %v11782_v19  ;;  %v9546_v19 = vld [vmem:[%s16176_s4 + $0x848] sm:$0xff] }
 0x9dd   : > { %11785 = vmatprep.subr.bf16.mxu0 %v11784_v5  ;;  %v9563_v5 = vld [vmem:[%s16176_s4 + $0x8d0] sm:$0xff]  ;;  %v11854_v7 = vpack.c.bf16 %v9546_v19, %v9545_v20 }
 0x9de   : > { %v11856_v8 = vpack.c.bf16 %v9564_v6, %v9563_v5  ;;  %v4860_v20 = vld [vmem:[#allocation3 + $0x128] sm:$0xff]  ;;  %v4861_v5 = vld [vmem:[#allocation3 + $0x130] sm:$0xff]  ;;  %v4862_v6 = vld [vmem:[#allocation3 + $0x138] sm:$0xff] }
 0x9e0   : > { %11787 = vmatpush3.bf16.msra.mxu0 %v11786_v10  ;;  %v9548_v10 = vld [vmem:[%s16176_s4 + $0x858] sm:$0xff] }
 0x9e1   : > { %11789 = vmatprep.subr.bf16.mxu0 %v11788_v11  ;;  %v9565_v11 = vld [vmem:[%s16176_s4 + $0x8e0] sm:$0xff]  ;;  %v11858_v13 = vpack.c.bf16 %v9548_v10, %v9547_v9  ;;  %v5021_v9 = vld [vmem:[#allocation3 + $0x148] sm:$0xff] }
 0x9e2   : > { %v11860_v14 = vpack.c.bf16 %v9566_v12, %v9565_v11  ;;  %v5022_v11 = vld [vmem:[#allocation3 + $0x150] sm:$0xff]  ;;  %v5023_v12 = vld [vmem:[#allocation3 + $0x158] sm:$0xff] }
 0x9e4   : > { %11791 = vmatpush3.bf16.msra.mxu0 %v11790_v16  ;;  %v9550_v16 = vld [vmem:[%s16176_s4 + $0x868] sm:$0xff] }
 0x9e5   : > { %11793 = vmatprep.subr.bf16.mxu0 %v11792_v45  ;;  %v9567_v45 = vld [vmem:[%s16176_s4 + $0x8f0] sm:$0xff]  ;;  %v11862_v18 = vpack.c.bf16 %v9550_v16, %v9549_v15 }
 0x9e6   : > { %v11864_v21 = vpack.c.bf16 %v9568_v17, %v9567_v45  ;;  %v5025_v15 = vld [vmem:[#allocation3 + $0x168] sm:$0xff]  ;;  %v5026_v45 = vld [vmem:[#allocation3 + $0x170] sm:$0xff]  ;;  %v5027_v17 = vld [vmem:[#allocation3 + $0x178] sm:$0xff] }
 0x9e8   : > { %11795 = vmatpush3.bf16.msra.mxu0 %v11794_v23  ;;  %v9552_v23 = vld [vmem:[%s16176_s4 + $0x878] sm:$0xff] }
 0x9e9   : > { %11797 = vmatprep.subr.bf16.mxu0 %v11796_v24  ;;  %v11866_v24 = vpack.c.bf16 %v9552_v23, %v9551_v22  ;;  %v5351_v22 = vld [vmem:[#allocation3 + $0x1c8] sm:$0xff] }
 0x9ec   : > { %11799 = vmatpush3.bf16.msra.mxu0 %v11798_v29  ;;  %v4194_v29 = vld [vmem:[#allocation3 + $0x10] sm:$0xff] }
 0x9ed   : > { %11801 = vmatprep.subr.bf16.mxu0 %v11800_v30  ;;  %v4195_v30 = vld [vmem:[#allocation3 + $0x18] sm:$0xff] }
 0x9ee   : > { %v11872_v42 = vpack.c.bf16 %v4195_v30, %v4194_v29  ;;  %v5355_v29 = vld [vmem:[#allocation3 + $0x1e8] sm:$0xff] }
 0x9ef   : > { %v11959_v30 = vpack.c.bf16 %v5355_v29, %v5354_v28  ;;  %v5189_v29 = vld [vmem:[#allocation3 + $0x1a0] sm:$0xff] }
 0x9f0   : > { %11803 = vmatpush3.bf16.msra.mxu0 %v11802_v32  ;;  %11873 = vmatpush3.bf16.msra.mxu1 %v11872_v42  ;;  %v5356_v42 = vld [vmem:[#allocation3 + $0x1f0] sm:$0xff] }
 0x9f1   : > { %10413 = vmatprep.subr.mxu0 %v12549_v35  ;;  %11874 = vmatprep.subr.bf16.mxu1 %v12552_v25 }
 0x9f3   : > { %3738 = vmatmul.mubr.f32.vlgmr.msra.gmra.mrb[16].mxu0 %v14775_v48 }
 0x9f4   : > { %10415 = vmatprep.mubr.msk.f32.mxu0 %vm12551_vm4, %v12549_v35 }
 0xac6   : > { %v10007_v51 = vpop.f32.mrb[16].mxu0 }
 0xac7   : > { %v10008_v34 = vpop.f32.mrb[17].mxu0 }
 0xac8   : > { %v10009_v36 = vadd.f32 %v10008_v34, %v10007_v51  ;;  %v4525_v51 = vld [vmem:[#allocation3 + $0x80] sm:$0xff] }
 0xaca   : > { %10414 = vmatpush3.msra.mxu0 %v10009_v36 }
 0xacb   : > { %10416 = vmatmul.mubr.msk.f32.vlgmr.msra.gmra.mrb[10].mxu0 %vm2670_vm5, %v9501_v37  ;;  %10418 = vmatprep.subr.mxu0 %v12549_v35  ;;  %v9569_v37 = vld [vmem:[%s16177_s5 + $0x40] sm:$0xff] }
 0xacc   : > { %10419 = vmatpush3.msra.mxu0 %v15265_v3  ;;  %10420 = vmatprep.mubr.msk.f32.mxu0 %vm12551_vm4, %v12549_v35  ;;  %v9556_v3 = vld [vmem:[%s16176_s4 + $0x898] sm:$0xff] }
 0xacd   : > { %11837 = vmatprep.subr.bf16.mxu0 %v11836_v38  ;;  %v11840_v49 = vpack.c.bf16 %v9556_v3, %v9555_v41  ;;  %v11893_v38 = vpack.c.bf16 %v4526_v50, %v4525_v51  ;;  %v11896_v41 = vpack.c.bf16 %v4528_v40, %v4527_v39  ;;  %v4529_v3 = vld [vmem:[#allocation3 + $0xa0] sm:$0xff]  ;;  %v4361_v50 = vld [vmem:[#allocation3 + $0x48] sm:$0xff]  ;;  %v4362_v40 = vld [vmem:[#allocation3 + $0x50] sm:$0xff] }
 0xace   : > { %v4360_v51 = vld [vmem:[#allocation3 + $0x40] sm:$0xff] }
 0xad3   : > { %10421 = vmatmul.mubr.msk.f32.vlgmr.msra.gmra.mrb[10].mxu0 %vm2670_vm5, %v9535_v44  ;;  %v4530_v44 = vld [vmem:[#allocation3 + $0xa8] sm:$0xff] }
 0xad4   : > { %11839 = vmatpush3.bf16.msra.mxu0 %v11838_v47  ;;  %4095 = vmatprep.mubr.f32.mxu0 %v14767_v43  ;;  %v11846_v43 = vpack.c.bf16 %v9542_v57, %v9541_v56  ;;  %v11899_v47 = vpack.c.bf16 %v4530_v44, %v4529_v3  ;;  %v4855_v57 = vld [vmem:[#allocation3 + $0x100] sm:$0xff] }
 0xad5   : > { %11841 = vmatprep.subr.bf16.mxu0 %v11840_v49  ;;  %v4531_v49 = vld [vmem:[#allocation3 + $0xb0] sm:$0xff]  ;;  %v11917_v61 = vpack.c.bf16 %v4856_v58, %v4855_v57  ;;  %v4364_v44 = vld [vmem:[#allocation3 + $0x60] sm:$0xff] }
 0xad6   : > { %v11902_v52 = vpack.c.bf16 %v4532_v2, %v4531_v49  ;;  %v4366_v2 = vld [vmem:[#allocation3 + $0x70] sm:$0xff] }
 0xad8   : > { %11843 = vmatpush3.bf16.msra.mxu0 %v11842_v46  ;;  %v11878_v46 = vpack.c.bf16 %v4199_v54, %v4198_v53 }
 0xad9   : > { %11845 = vmatprep.subr.bf16.mxu0 %v11844_v55  ;;  %v2565_v55 = vpop.permute.xlu0 %2564 }
 0xadc   : > { %11847 = vmatpush3.bf16.msra.mxu0 %v11846_v43 }
 0xadd   : > { %11849 = vmatprep.subr.bf16.mxu0 %v11848_v60 }
 0xae0   : > { %11851 = vmatpush3.bf16.msra.mxu0 %v11850_v0  ;;  %v11920_v0 = vpack.c.bf16 %v4858_v63, %v4857_v62  ;;  %v9580_v62 = vld [vmem:[%s16180_s8 + $0x20] sm:$0xff] }
 0xae1   : > { %11853 = vmatprep.subr.bf16.mxu0 %v11852_v4  ;;  %v4859_v4 = vld [vmem:[#allocation3 + $0x120] sm:$0xff] }
 0xae2   : > { %v11923_v19 = vpack.c.bf16 %v4860_v20, %v4859_v4  ;;  %v4690_v63 = vld [vmem:[#allocation3 + $0xc0] sm:$0xff] }
 0xae3   : > { %v9581_v4 = vld [vmem:[%s16180_s8 + $0x28] sm:$0xff] }
 0xae4   : > { %11855 = vmatpush3.bf16.msra.mxu0 %v11854_v7  ;;  %v11926_v7 = vpack.c.bf16 %v4862_v6, %v4861_v5  ;;  %v4693_v5 = vld [vmem:[#allocation3 + $0xd8] sm:$0xff] }
 0xae5   : > { %11857 = vmatprep.subr.bf16.mxu0 %v11856_v8  ;;  %v5020_v8 = vld [vmem:[#allocation3 + $0x140] sm:$0xff] }
 0xae6   : > { %v11929_v10 = vpack.c.bf16 %v5021_v9, %v5020_v8  ;;  %v4695_v8 = vld [vmem:[#allocation3 + $0xe8] sm:$0xff] }
 0xae8   : > { %11859 = vmatpush3.bf16.msra.mxu0 %v11858_v13  ;;  %v11932_v13 = vpack.c.bf16 %v5023_v12, %v5022_v11  ;;  %v4697_v11 = vld [vmem:[#allocation3 + $0xf8] sm:$0xff] }
 0xae9   : > { %11861 = vmatprep.subr.bf16.mxu0 %v11860_v14  ;;  %v5024_v14 = vld [vmem:[#allocation3 + $0x160] sm:$0xff] }
 0xaea   : > { %v11935_v16 = vpack.c.bf16 %v5025_v15, %v5024_v14  ;;  %v9586_v15 = vld [vmem:[%s16180_s8 + $0x38] sm:$0xff] }
 0xaec   : > { %11863 = vmatpush3.bf16.msra.mxu0 %v11862_v18  ;;  %v11938_v18 = vpack.c.bf16 %v5027_v17, %v5026_v45  ;;  %v9590_v45 = vld [vmem:[%s16180_s8 + $0x40] sm:$0xff]  ;;  %v9591_v17 = vld [vmem:[%s16180_s8 + $0x48] sm:$0xff] }
 0xaed   : > { %11865 = vmatprep.subr.bf16.mxu0 %v11864_v21  ;;  %v5350_v21 = vld [vmem:[#allocation3 + $0x1c0] sm:$0xff] }
 0xaee   : > { %v11953_v23 = vpack.c.bf16 %v5351_v22, %v5350_v21  ;;  %v5185_v21 = vld [vmem:[#allocation3 + $0x180] sm:$0xff]  ;;  %v5186_v22 = vld [vmem:[#allocation3 + $0x188] sm:$0xff] }
 0xaf0   : > { %11867 = vmatpush3.bf16.msra.mxu0 %v11866_v24  ;;  %v5352_v24 = vld [vmem:[#allocation3 + $0x1d0] sm:$0xff] }
 0xaf1   : > { %10423 = vmatprep.subr.mxu0 %v12549_v35  ;;  %v11956_v27 = vpack.c.bf16 %v5353_v26, %v5352_v24  ;;  %v11941_v24 = vpack.c.bf16 %v5186_v22, %v5185_v21  ;;  %v5187_v26 = vld [vmem:[#allocation3 + $0x190] sm:$0xff]  ;;  %v9642_v21 = vld [vmem:[%s16182_s10 + $0xc0] sm:$0xff]  ;;  %v9643_v22 = vld [vmem:[%s16182_s10 + $0xc8] sm:$0xff] }
 0xaf3   : > { %4096 = vmatmul.mubr.f32.vlgmr.msra.gmra.mrb[18].mxu0 %v14775_v48  ;;  %v4197_v48 = vld [vmem:[#allocation3 + $0x28] sm:$0xff] }
 0xaf4   : > { %10425 = vmatprep.mubr.msk.f32.mxu0 %vm12551_vm4, %v12549_v35  ;;  %v11875_v32 = vpack.c.bf16 %v4197_v48, %v4196_v31  ;;  %v5357_v31 = vld [vmem:[#allocation3 + $0x1f8] sm:$0xff] }
 0xaf5   : > { %v11962_v48 = vpack.c.bf16 %v5357_v31, %v5356_v42  ;;  %v5191_v31 = vld [vmem:[#allocation3 + $0x1b0] sm:$0xff] }
 0xaf6   : > { %11876 = vmatpush3.bf16.msra.mxu1 %v11875_v32  ;;  %v4274_v32 = vld [vmem:[%s16180_s8] sm:$0xff] }
 0xaf7   : > { %11877 = vmatprep.subr.bf16.mxu1 %v12552_v25 }
 0xafa   : > { %11879 = vmatpush3.bf16.msra.mxu1 %v11878_v46 }
 0xbc6   : > { %v10081_v33 = vpop.f32.mrb[18].mxu0 }
 0xbc7   : > { %v10082_v34 = vpop.f32.mrb[19].mxu0 }
 0xbc8   : > { %v10083_v36 = vadd.f32 %v10082_v34, %v10081_v33 }
 0xbca   : > { %10424 = vmatpush3.msra.mxu0 %v10083_v36  ;;  %v4275_v36 = vld [vmem:[%s16180_s8 + $0x8] sm:$0xff] }
 0xbcb   : > { %10426 = vmatmul.mubr.msk.f32.vlgmr.msra.gmra.mrb[10].mxu0 %vm2670_vm5, %v9569_v37  ;;  %11892 = vmatprep.subr.bf16.mxu0 %v12552_v25  ;;  %v11881_v37 = vpack.c.bf16 %v4361_v50, %v4360_v51  ;;  %v9600_v51 = vld [vmem:[%s16180_s8 + $0x60] sm:$0xff] }
 0xbcc   : > { %11894 = vmatpush3.bf16.msra.mxu0 %v11893_v38  ;;  %10492 = vmatprep.mubr.msk.f32.mxu0 %vm12551_vm4, %v12549_v35 }
 0xbcd   : > { %11895 = vmatprep.subr.bf16.mxu0 %v12552_v25 }
 0xbd0   : > { %11897 = vmatpush3.bf16.msra.mxu0 %v11896_v41  ;;  %v4363_v41 = vld [vmem:[#allocation3 + $0x58] sm:$0xff] }
 0xbd1   : > { %11898 = vmatprep.subr.bf16.mxu0 %v12552_v25  ;;  %v11884_v3 = vpack.c.bf16 %v4363_v41, %v4362_v40  ;;  %v5517_v41 = vld [vmem:[#allocation3 + $0x210] sm:$0xff] }
 0xbd4   : > { %11900 = vmatpush3.bf16.msra.mxu0 %v11899_v47  ;;  %v4365_v47 = vld [vmem:[#allocation3 + $0x68] sm:$0xff] }
 0xbd5   : > { %11901 = vmatprep.subr.bf16.mxu0 %v12552_v25  ;;  %v11887_v49 = vpack.c.bf16 %v4365_v47, %v4364_v44  ;;  %v5519_v47 = vld [vmem:[#allocation3 + $0x220] sm:$0xff] }
 0xbd8   : > { %11903 = vmatpush3.bf16.msra.mxu0 %v11902_v52  ;;  %v4367_v52 = vld [vmem:[#allocation3 + $0x78] sm:$0xff] }
 0xbd9   : > { %11916 = vmatprep.subr.bf16.mxu0 %v12552_v25  ;;  %v11890_v53 = vpack.c.bf16 %v4367_v52, %v4366_v2  ;;  %v5521_v52 = vld [vmem:[#allocation3 + $0x230] sm:$0xff] }
 0xc9e   : > { %v4172_v56 = vpop.f32.mrb[10].mxu0 }
 0xc9f   : > { %v12221_v59 = vadd.f32 %v4172_v56, %v2565_v55  ;;  %v10427_v43 = vpop.f32.mrb[11].mxu0 }
 0xca1   : > { %vm4177_vm6 = vcmp.ge.f32.partialorder %v12221_v59, 0.0  ;;  %v4178_v60 = vmul.f32 0.2, %v12221_v59 }
 0xca3   : > { %v15620_v1 = vsel %vm4177_vm6, %v12221_v59, %v4178_v60  ;;  %v9575_v59 = vld [vmem:[%s16180_s8 + $0x10] sm:$0xff]  ;;  %v9576_v60 = vld [vmem:[%s16180_s8 + $0x18] sm:$0xff] }
 0xca4   : > { %10445 = vmatmul.mubr.msk.f32.vlgmr.msra.gmra.mrb[20].mxu1 %vm4200_vm7, %v15620_v1  ;;  %10493 = vmatmul.mubr.msk.f32.vlgmr.msra.gmra.mrb[20].mxu0 %vm4200_vm7, %v15620_v1 }
 0xca5   : > { %11918 = vmatpush3.bf16.msra.mxu0 %v11917_v61  ;;  %10540 = vmatprep.mubr.msk.f32.mxu0 %vm12551_vm4, %v12549_v35 }
 0xca6   : > { %11919 = vmatprep.subr.bf16.mxu0 %v12552_v25  ;;  %10449 = vmatprep.mubr.msk.f32.mxu1 %vm2670_vm5, %v4274_v32 }
 0xca9   : > { %11921 = vmatpush3.bf16.msra.mxu0 %v11920_v0  ;;  %v4691_v0 = vld [vmem:[#allocation3 + $0xc8] sm:$0xff] }
 0xcaa   : > { %11922 = vmatprep.subr.bf16.mxu0 %v12552_v25  ;;  %v11905_v20 = vpack.c.bf16 %v4691_v0, %v4690_v63  ;;  %v9619_v63 = vld [vmem:[%s16182_s10 + $0x48] sm:$0xff]  ;;  %v9620_v0 = vld [vmem:[%s16182_s10 + $0x50] sm:$0xff] }
 0xcad   : > { %11924 = vmatpush3.bf16.msra.mxu0 %v11923_v19  ;;  %v4692_v19 = vld [vmem:[#allocation3 + $0xd0] sm:$0xff] }
 0xcae   : > { %11925 = vmatprep.subr.bf16.mxu0 %v12552_v25  ;;  %v11908_v6 = vpack.c.bf16 %v4693_v5, %v4692_v19  ;;  %v9611_v5 = vld [vmem:[%s16180_s8 + $0x88] sm:$0xff] }
 0xcb1   : > { %11927 = vmatpush3.bf16.msra.mxu0 %v11926_v7  ;;  %v4694_v7 = vld [vmem:[#allocation3 + $0xe0] sm:$0xff] }
 0xcb2   : > { %11928 = vmatprep.subr.bf16.mxu0 %v12552_v25  ;;  %v11911_v9 = vpack.c.bf16 %v4695_v8, %v4694_v7  ;;  %v9622_v8 = vld [vmem:[%s16182_s10 + $0x60] sm:$0xff] }
 0xcb4   : > { %10541 = vmatmul.mubr.msk.f32.vlgmr.msra.gmra.mrb[22].mxu0 %vm4200_vm7, %v15620_v1 }
 0xcb5   : > { %11930 = vmatpush3.bf16.msra.mxu0 %v11929_v10  ;;  %10564 = vmatprep.mubr.msk.f32.mxu0 %vm12551_vm4, %v12549_v35  ;;  %v4696_v10 = vld [vmem:[#allocation3 + $0xf0] sm:$0xff] }
 0xcb6   : > { %11931 = vmatprep.subr.bf16.mxu0 %v12552_v25  ;;  %v11914_v12 = vpack.c.bf16 %v4697_v11, %v4696_v10  ;;  %v5701_v11 = vld [vmem:[%s16182_s10 + $0x20] sm:$0xff] }
 0xcb9   : > { %11933 = vmatpush3.bf16.msra.mxu0 %v11932_v13  ;;  %v9585_v13 = vld [vmem:[%s16180_s8 + $0x30] sm:$0xff] }
 0xcba   : > { %11934 = vmatprep.subr.bf16.mxu0 %v12552_v25 }
 0xcbd   : > { %11936 = vmatpush3.bf16.msra.mxu0 %v11935_v16 }
 0xcbe   : > { %11937 = vmatprep.subr.bf16.mxu0 %v12552_v25 }
 0xcc1   : > { %11939 = vmatpush3.bf16.msra.mxu0 %v11938_v18  ;;  %v9595_v18 = vld [vmem:[%s16180_s8 + $0x50] sm:$0xff] }
 0xcc2   : > { %11952 = vmatprep.subr.bf16.mxu0 %v12552_v25 }
 0xcc4   : > { %10565 = vmatmul.mubr.msk.f32.vlgmr.msra.gmra.mrb[24].mxu0 %vm4200_vm7, %v15620_v1 }
 0xcc5   : > { %11954 = vmatpush3.bf16.msra.mxu0 %v11953_v23  ;;  %10612 = vmatprep.mubr.msk.f32.mxu0 %vm12551_vm4, %v12549_v35  ;;  %v9596_v23 = vld [vmem:[%s16180_s8 + $0x58] sm:$0xff] }
 0xcc6   : > { %11955 = vmatprep.subr.bf16.mxu0 %v12552_v25 }
 0xcc9   : > { %11957 = vmatpush3.bf16.msra.mxu0 %v11956_v27  ;;  %v5188_v27 = vld [vmem:[#allocation3 + $0x198] sm:$0xff] }
 0xcca   : > { %11958 = vmatprep.subr.bf16.mxu0 %v12552_v25  ;;  %v11944_v28 = vpack.c.bf16 %v5188_v27, %v5187_v26 }
 0xccd   : > { %11960 = vmatpush3.bf16.msra.mxu0 %v11959_v30  ;;  %v5190_v30 = vld [vmem:[#allocation3 + $0x1a8] sm:$0xff] }
 0xcce   : > { %11961 = vmatprep.subr.bf16.mxu0 %v12552_v25  ;;  %v11947_v42 = vpack.c.bf16 %v5190_v30, %v5189_v29 }
 0xcd1   : > { %11963 = vmatpush3.bf16.msra.mxu0 %v11962_v48  ;;  %v5192_v48 = vld [vmem:[#allocation3 + $0x1b8] sm:$0xff] }
 0xcd2   : > { %v11950_v32 = vpack.c.bf16 %v5192_v48, %v5191_v31  ;;  %v9644_v31 = vld [vmem:[%s16182_s10 + $0xd0] sm:$0xff]  ;;  %v9645_v48 = vld [vmem:[%s16182_s10 + $0xd8] sm:$0xff] }
 0xcd4   : > { %10613 = vmatmul.mubr.msk.f32.vlgmr.msra.gmra.mrb[26].mxu0 %vm4200_vm7, %v15620_v1 }
 0xd77   : > { %v4270_v33 = vpop.f32.mrb[20].mxu1  ;;  %v4599_v34 = vpop.f32.mrb[20].mxu0 }
 0xd78   : > { %v10446_v38 = vpop.f32.mrb[21].mxu1  ;;  %10447 = vmatprep.subr.mxu1 %v4270_v33  ;;  %v10494_v39 = vpop.f32.mrb[21].mxu0 }
 0xd79   : > { %10448 = vmatpush3.msra.mxu1 %v4270_v33  ;;  %v9601_v33 = vld [vmem:[%s16180_s8 + $0x68] sm:$0xff]  ;;  %v9606_v39 = vld [vmem:[%s16180_s8 + $0x78] sm:$0xff] }
 0xd7a   : > { %11880 = vmatprep.subr.bf16.mxu1 %v12552_v25  ;;  %10450 = vmatmul.mubr.msk.f32.vlgmr.msra.gmra.mrb[22].mxu1 %vm2670_vm5, %v4275_v36  ;;  %v9605_v36 = vld [vmem:[%s16180_s8 + $0x70] sm:$0xff] }
 0xd7b   : > { %11882 = vmatpush3.bf16.msra.mxu1 %v11881_v37  ;;  %10468 = vmatprep.mubr.msk.f32.mxu1 %vm12551_vm4, %v12549_v35  ;;  %v5515_v37 = vld [vmem:[#allocation3 + $0x200] sm:$0xff]  ;;  %v5516_v38 = vld [vmem:[#allocation3 + $0x208] sm:$0xff] }
 0xd7c   : > { %11883 = vmatprep.subr.bf16.mxu1 %v12552_v25  ;;  %v11965_v40 = vpack.c.bf16 %v5516_v38, %v5515_v37  ;;  %v9648_v38 = vld [vmem:[%s16182_s10 + $0xf0] sm:$0xff] }
 0xd7f   : > { %11885 = vmatpush3.bf16.msra.mxu1 %v11884_v3  ;;  %v5518_v3 = vld [vmem:[#allocation3 + $0x218] sm:$0xff] }
 0xd80   : > { %11886 = vmatprep.subr.bf16.mxu1 %v12552_v25  ;;  %v11968_v44 = vpack.c.bf16 %v5518_v3, %v5517_v41  ;;  %v9666_v41 = vld [vmem:[%s16182_s10 + $0x140] sm:$0xff]  ;;  %v9667_v3 = vld [vmem:[%s16182_s10 + $0x148] sm:$0xff] }
 0xd83   : > { %11888 = vmatpush3.bf16.msra.mxu1 %v11887_v49  ;;  %v5520_v49 = vld [vmem:[#allocation3 + $0x228] sm:$0xff] }
 0xd84   : > { %11889 = vmatprep.subr.bf16.mxu1 %v12552_v25  ;;  %v11971_v2 = vpack.c.bf16 %v5520_v49, %v5519_v47  ;;  %v9668_v47 = vld [vmem:[%s16182_s10 + $0x150] sm:$0xff]  ;;  %v9669_v49 = vld [vmem:[%s16182_s10 + $0x158] sm:$0xff] }
 0xd87   : > { %v4929_v54 = vpop.f32.mrb[22].mxu0  ;;  %11891 = vmatpush3.bf16.msra.mxu1 %v11890_v53  ;;  %v5522_v53 = vld [vmem:[#allocation3 + $0x238] sm:$0xff] }
 0xd88   : > { %v10542_v46 = vpop.f32.mrb[23].mxu0 }
 0xd89   : > { %v9610_v46 = vld [vmem:[%s16180_s8 + $0x80] sm:$0xff] }
 0xd8a   : > { %10469 = vmatmul.mubr.msk.f32.vlgmr.msra.gmra.mrb[24].mxu1 %vm4200_vm7, %v15620_v1 }
 0xd8b   : > { %10473 = vmatprep.mubr.msk.f32.mxu1 %vm2670_vm5, %v9575_v59  ;;  %v5699_v59 = vld [vmem:[%s16182_s10 + $0x10] sm:$0xff] }
 0xd97   : > { %v5094_v55 = vpop.f32.mrb[24].mxu0 }
 0xd98   : > { %v10566_v56 = vpop.f32.mrb[25].mxu0 }
 0xd99   : > { %v5697_v56 = vld [vmem:[%s16182_s10] sm:$0xff] }
 0xda7   : > { %v15665_v57 = vpop.f32.mrb[26].mxu0 }
 0xda8   : > { %v10614_v58 = vpop.f32.mrb[27].mxu0 }
 0xe5d   : > { %v4434_v43 = vpop.f32.mrb[24].mxu1 }
 0xe5e   : > { %v10470_v61 = vpop.f32.mrb[25].mxu1  ;;  %10471 = vmatprep.subr.mxu1 %v4434_v43 }
 0xe5f   : > { %10472 = vmatpush3.msra.mxu1 %v4434_v43  ;;  %v5700_v43 = vld [vmem:[%s16182_s10 + $0x18] sm:$0xff]  ;;  %v5686_v61 = vld [vmem:[%s16184_s12 + $0x8] sm:$0xff] }
 0xe60   : > { %10474 = vmatmul.mubr.msk.f32.vlgmr.msra.gmra.mrb[22].mxu1 %vm2670_vm5, %v9576_v60  ;;  %10495 = vmatprep.subr.mxu1 %v4599_v34  ;;  %v11980_v60 = vpack.c.bf16 %v5700_v43, %v5699_v59  ;;  %v9680_v59 = vld [vmem:[%s16182_s10 + $0x190] sm:$0xff]  ;;  %v9681_v43 = vld [vmem:[%s16182_s10 + $0x198] sm:$0xff] }
 0xe61   : > { %10496 = vmatpush3.msra.mxu1 %v4599_v34  ;;  %10497 = vmatprep.mubr.msk.f32.mxu1 %vm2670_vm5, %v9580_v62  ;;  %v9618_v62 = vld [vmem:[%s16182_s10 + $0x40] sm:$0xff] }
 0xe62   : > { %11904 = vmatprep.subr.bf16.mxu1 %v12552_v25 }
 0xe68   : > { %10498 = vmatmul.mubr.msk.f32.vlgmr.msra.gmra.mrb[22].mxu1 %vm2670_vm5, %v9581_v4  ;;  %v9621_v4 = vld [vmem:[%s16182_s10 + $0x58] sm:$0xff] }
 0xe69   : > { %11906 = vmatpush3.bf16.msra.mxu1 %v11905_v20  ;;  %10516 = vmatprep.mubr.msk.f32.mxu1 %vm12551_vm4, %v12549_v35  ;;  %v11996_v20 = vpack.c.bf16 %v9619_v63, %v9618_v62  ;;  %v12000_v7 = vpack.c.bf16 %v9621_v4, %v9620_v0  ;;  %v9683_v62 = vld [vmem:[%s16182_s10 + $0x1a8] sm:$0xff]  ;;  %v9684_v0 = vld [vmem:[%s16182_s10 + $0x1b0] sm:$0xff]  ;;  %v9685_v4 = vld [vmem:[%s16182_s10 + $0x1b8] sm:$0xff] }
 0xe6a   : > { %11907 = vmatprep.subr.bf16.mxu1 %v12552_v25 }
 0xe6d   : > { %11909 = vmatpush3.bf16.msra.mxu1 %v11908_v6 }
 0xe6e   : > { %11910 = vmatprep.subr.bf16.mxu1 %v12552_v25 }
 0xe71   : > { %11912 = vmatpush3.bf16.msra.mxu1 %v11911_v9  ;;  %v9623_v9 = vld [vmem:[%s16182_s10 + $0x68] sm:$0xff] }
 0xe72   : > { %11913 = vmatprep.subr.bf16.mxu1 %v12552_v25  ;;  %v12004_v10 = vpack.c.bf16 %v9623_v9, %v9622_v8  ;;  %v9705_v8 = vld [vmem:[%s16182_s10 + $0x218] sm:$0xff] }
 0xe75   : > { %11915 = vmatpush3.bf16.msra.mxu1 %v11914_v12  ;;  %v5702_v12 = vld [vmem:[%s16182_s10 + $0x28] sm:$0xff] }
 0xe78   : > { %10517 = vmatmul.mubr.msk.f32.vlgmr.msra.gmra.mrb[26].mxu1 %vm4200_vm7, %v15620_v1 }
 0xe79   : > { %10521 = vmatprep.mubr.msk.f32.mxu1 %vm2670_vm5, %v9585_v13  ;;  %v11984_v13 = vpack.c.bf16 %v5702_v12, %v5701_v11  ;;  %v9707_v11 = vld [vmem:[%s16182_s10 + $0x228] sm:$0xff] }
 0xf4b   : > { %v4764_v14 = vpop.f32.mrb[26].mxu1 }
 0xf4c   : > { %v10518_v16 = vpop.f32.mrb[27].mxu1  ;;  %10519 = vmatprep.subr.mxu1 %v4764_v14 }
 0xf4d   : > { %10520 = vmatpush3.msra.mxu1 %v4764_v14  ;;  %v9624_v14 = vld [vmem:[%s16182_s10 + $0x70] sm:$0xff] }
 0xf4e   : > { %10522 = vmatmul.mubr.msk.f32.vlgmr.msra.gmra.mrb[22].mxu1 %vm2670_vm5, %v9586_v15  ;;  %10543 = vmatprep.subr.mxu1 %v4929_v54  ;;  %v9625_v15 = vld [vmem:[%s16182_s10 + $0x78] sm:$0xff] }
 0xf4f   : > { %10544 = vmatpush3.msra.mxu1 %v4929_v54  ;;  %10545 = vmatprep.mubr.msk.f32.mxu1 %vm2670_vm5, %v9590_v45  ;;  %v11974_v54 = vpack.c.bf16 %v5522_v53, %v5521_v52  ;;  %v12008_v16 = vpack.c.bf16 %v9625_v15, %v9624_v14  ;;  %v5703_v45 = vld [vmem:[%s16182_s10 + $0x30] sm:$0xff]  ;;  %v9670_v52 = vld [vmem:[%s16182_s10 + $0x160] sm:$0xff]  ;;  %v9671_v53 = vld [vmem:[%s16182_s10 + $0x168] sm:$0xff] }
 0xf50   : > { %10567 = vmatprep.subr.mxu1 %v5094_v55  ;;  %v9709_v14 = vld [vmem:[%s16182_s10 + $0x238] sm:$0xff] }
 0xf56   : > { %10546 = vmatmul.mubr.msk.f32.vlgmr.msra.gmra.mrb[22].mxu1 %vm2670_vm5, %v9591_v17  ;;  %v5704_v17 = vld [vmem:[%s16182_s10 + $0x38] sm:$0xff] }
 0xf57   : > { %10568 = vmatpush3.msra.mxu1 %v5094_v55  ;;  %10569 = vmatprep.mubr.msk.f32.mxu1 %vm2670_vm5, %v9595_v18  ;;  %v4180_v55 = vld [vmem:[%s16181_s9] sm:$0xff]  ;;  %v11988_v18 = vpack.c.bf16 %v5704_v17, %v5703_v45 }
 0xf58   : > { %11940 = vmatprep.subr.bf16.mxu1 %v12552_v25  ;;  %4184 = vperm.xlu1 %12384, %v4180_v55   ;;  %v9673_v55 = vld [vmem:[%s16182_s10 + $0x178] sm:$0xff] }
 0xf5e   : > { %10570 = vmatmul.mubr.msk.f32.vlgmr.msra.gmra.mrb[22].mxu1 %vm2670_vm5, %v9596_v23  ;;  %v12036_v23 = vpack.c.bf16 %v9643_v22, %v9642_v21 }
 0xf5f   : > { %11942 = vmatpush3.bf16.msra.mxu1 %v11941_v24  ;;  %10588 = vmatprep.mubr.msk.f32.mxu1 %vm12551_vm4, %v12549_v35 }
 0xf60   : > { %11943 = vmatprep.subr.bf16.mxu1 %v12552_v25 }
 0xf63   : > { %11945 = vmatpush3.bf16.msra.mxu1 %v11944_v28 }
 0xf64   : > { %11946 = vmatprep.subr.bf16.mxu1 %v12552_v25 }
 0xf67   : > { %11948 = vmatpush3.bf16.msra.mxu1 %v11947_v42 }
 0xf68   : > { %11949 = vmatprep.subr.bf16.mxu1 %v12552_v25 }
 0xf6b   : > { %11951 = vmatpush3.bf16.msra.mxu1 %v11950_v32 }
 0xf6e   : > { %10589 = vmatmul.mubr.msk.f32.vlgmr.msra.gmra.mrb[28].mxu1 %vm4200_vm7, %v15620_v1 }
 0xf6f   : > { %10593 = vmatprep.mubr.msk.f32.mxu1 %vm2670_vm5, %v9600_v51 }
 0xfd7   : > { %v4185_v24 = vpop.permute.xlu1 %4184 }
0x1041   : > { %v5259_v50 = vpop.f32.mrb[28].mxu1 }
0x1042   : > { %v10590_v34 = vpop.f32.mrb[29].mxu1  ;;  %10591 = vmatprep.subr.mxu1 %v5259_v50 }
0x1043   : > { %10592 = vmatpush3.msra.mxu1 %v5259_v50  ;;  %v12040_v50 = vpack.c.bf16 %v9645_v48, %v9644_v31  ;;  %v9646_v34 = vld [vmem:[%s16182_s10 + $0xe0] sm:$0xff] }
0x1044   : > { %10594 = vmatmul.mubr.msk.f32.vlgmr.msra.gmra.mrb[22].mxu1 %vm2670_vm5, %v9601_v33  ;;  %10615 = vmatprep.subr.mxu1 %v15665_v57  ;;  %v5958_v31 = vld [vmem:[#allocation6 + $0x18] sm:$0xff] }
0x1045   : > { %10616 = vmatpush3.msra.mxu1 %v15665_v57  ;;  %10617 = vmatprep.mubr.msk.f32.mxu1 %vm2670_vm5, %v9605_v36  ;;  %v4181_v57 = vld [vmem:[%s16181_s9 + $0x8] sm:$0xff] }
0x1046   : > { %11964 = vmatprep.subr.bf16.mxu1 %v12552_v25  ;;  %4189 = vperm.xlu1 %12384, %v4181_v57   ;;  %v9647_v36 = vld [vmem:[%s16182_s10 + $0xe8] sm:$0xff]  ;;  %v9678_v57 = vld [vmem:[%s16182_s10 + $0x180] sm:$0xff] }
0x1047   : > { %v12044_v37 = vpack.c.bf16 %v9647_v36, %v9646_v34 }
0x104a   : > { %5694 = vperm.xlu1 %12384, %v5686_v61   ;;  %v9682_v61 = vld [vmem:[%s16182_s10 + $0x1a0] sm:$0xff] }
0x104b   : > { %v12104_v63 = vpack.c.bf16 %v9683_v62, %v9682_v61  ;;  %v9656_v62 = vld [vmem:[%s16182_s10 + $0x110] sm:$0xff] }
0x104c   : > { %10618 = vmatmul.mubr.msk.f32.vlgmr.msra.gmra.mrb[22].mxu1 %vm2670_vm5, %v9606_v39  ;;  %v9649_v39 = vld [vmem:[%s16182_s10 + $0xf8] sm:$0xff] }
0x104d   : > { %11966 = vmatpush3.bf16.msra.mxu1 %v11965_v40  ;;  %10636 = vmatprep.mubr.msk.f32.mxu1 %vm12551_vm4, %v12549_v35  ;;  %v12048_v40 = vpack.c.bf16 %v9649_v39, %v9648_v38  ;;  %v9636_v39 = vld [vmem:[%s16182_s10 + $0xb0] sm:$0xff] }
0x104e   : > { %11967 = vmatprep.subr.bf16.mxu1 %v12552_v25 }
0x1051   : > { %11969 = vmatpush3.bf16.msra.mxu1 %v11968_v44  ;;  %v12076_v44 = vpack.c.bf16 %v9667_v3, %v9666_v41 }
0x1052   : > { %11970 = vmatprep.subr.bf16.mxu1 %v12552_v25 }
0x1055   : > { %11972 = vmatpush3.bf16.msra.mxu1 %v11971_v2  ;;  %v12080_v2 = vpack.c.bf16 %v9669_v49, %v9668_v47 }
0x1056   : > { %11973 = vmatprep.subr.bf16.mxu1 %v12552_v25 }
0x1059   : > { %11975 = vmatpush3.bf16.msra.mxu1 %v11974_v54  ;;  %v12084_v54 = vpack.c.bf16 %v9671_v53, %v9670_v52 }
0x105c   : > { %10637 = vmatmul.mubr.msk.f32.vlgmr.msra.gmra.mrb[30].mxu1 %vm4200_vm7, %v15620_v1  ;;  %v5698_v1 = vld [vmem:[%s16182_s10 + $0x8] sm:$0xff] }
0x105d   : > { %10641 = vmatprep.mubr.msk.f32.mxu1 %vm2670_vm5, %v9610_v46  ;;  %v11976_v58 = vpack.c.bf16 %v5698_v1, %v5697_v56  ;;  %v9672_v46 = vld [vmem:[%s16182_s10 + $0x170] sm:$0xff]  ;;  %v9679_v1 = vld [vmem:[%s16182_s10 + $0x188] sm:$0xff] }
0x105e   : > { %v12088_v56 = vpack.c.bf16 %v9673_v55, %v9672_v46  ;;  %v6127_v55 = vld [vmem:[#allocation6 + $0x20] sm:$0xff] }
0x105f   : > { %11977 = vmatprep.subr.bf16.mxu0 %v11976_v58 }
0x1060   : > { %11979 = vmatpush3.bf16.msra.mxu0 %v11976_v58  ;;  %v12096_v58 = vpack.c.bf16 %v9679_v1, %v9678_v57 }
0x1061   : > { %11981 = vmatprep.subr.bf16.mxu0 %v11980_v60 }
0x1064   : > { %11983 = vmatpush3.bf16.msra.mxu0 %v11980_v60  ;;  %v12100_v60 = vpack.c.bf16 %v9681_v43, %v9680_v59  ;;  %v9655_v59 = vld [vmem:[%s16182_s10 + $0x108] sm:$0xff] }
0x1065   : > { %11985 = vmatprep.subr.bf16.mxu0 %v11984_v13  ;;  %v6128_v43 = vld [vmem:[#allocation6 + $0x28] sm:$0xff] }
0x1068   : > { %11987 = vmatpush3.bf16.msra.mxu0 %v11984_v13  ;;  %v9708_v13 = vld [vmem:[%s16182_s10 + $0x230] sm:$0xff] }
0x1069   : > { %11989 = vmatprep.subr.bf16.mxu0 %v11988_v18  ;;  %v12148_v15 = vpack.c.bf16 %v9709_v14, %v9708_v13  ;;  %v6468_v13 = vld [vmem:[#allocation6 + $0x48] sm:$0xff]  ;;  %v6637_v14 = vld [vmem:[#allocation6 + $0x50] sm:$0xff] }
0x106c   : > { %11991 = vmatpush3.bf16.msra.mxu0 %v11988_v18 }
0x10c5   : > { %v4190_v26 = vpop.permute.xlu1 %4189 }
0x112f   : > { %v5589_v19 = vpop.f32.mrb[30].mxu1 }
0x1130   : > { %v10638_v6 = vpop.f32.mrb[31].mxu1  ;;  %10639 = vmatprep.subr.mxu1 %v5589_v19 }
0x1131   : > { %10640 = vmatpush3.msra.mxu1 %v5589_v19  ;;  %v9702_v19 = vld [vmem:[%s16182_s10 + $0x200] sm:$0xff] }
0x1132   : > { %10642 = vmatmul.mubr.msk.f32.vlgmr.msra.gmra.mrb[22].mxu1 %vm2670_vm5, %v9611_v5  ;;  %11997 = vmatprep.subr.bf16.mxu1 %v11996_v20  ;;  %v9703_v5 = vld [vmem:[%s16182_s10 + $0x208] sm:$0xff] }
0x1133   : > { %11999 = vmatpush3.bf16.msra.mxu1 %v11996_v20  ;;  %v12108_v20 = vpack.c.bf16 %v9685_v4, %v9684_v0  ;;  %v12136_v6 = vpack.c.bf16 %v9703_v5, %v9702_v19  ;;  %v6298_v0 = vld [vmem:[#allocation6 + $0x38] sm:$0xff]  ;;  %v9659_v19 = vld [vmem:[%s16182_s10 + $0x128] sm:$0xff] }
0x1134   : > { %12001 = vmatprep.subr.bf16.mxu1 %v12000_v7 }
0x1137   : > { %12003 = vmatpush3.bf16.msra.mxu1 %v12000_v7  ;;  %v9704_v7 = vld [vmem:[%s16182_s10 + $0x210] sm:$0xff] }
0x1138   : > { %12005 = vmatprep.subr.bf16.mxu1 %v12004_v10  ;;  %v12140_v9 = vpack.c.bf16 %v9705_v8, %v9704_v7  ;;  %v9661_v7 = vld [vmem:[%s16182_s10 + $0x138] sm:$0xff] }
0x113b   : > { %12007 = vmatpush3.bf16.msra.mxu1 %v12004_v10  ;;  %v9706_v10 = vld [vmem:[%s16182_s10 + $0x220] sm:$0xff] }
0x113c   : > { %12009 = vmatprep.subr.bf16.mxu1 %v12008_v16  ;;  %v12144_v12 = vpack.c.bf16 %v9707_v11, %v9706_v10 }
0x113f   : > { %12011 = vmatpush3.bf16.msra.mxu1 %v12008_v16  ;;  %v5786_v16 = vld [vmem:[#allocation6] sm:$0xff] }
0x1140   : > { %12037 = vmatprep.subr.bf16.mxu1 %v12036_v23 }
0x1205   : > { %v10643_v27 = vpop.f32.mrb[22].mxu1 }
0x1206   : > { %v12222_v28 = vadd.f32 %v10643_v27, %v4190_v26  ;;  %v5668_v29 = vpop.f32.mrb[23].mxu1  ;;  %v9631_v26 = vld [vmem:[%s16182_s10 + $0x88] sm:$0xff] }
0x1207   : > { %v12223_v30 = vadd.f32 %v5668_v29, %v4185_v24  ;;  %v9630_v24 = vld [vmem:[%s16182_s10 + $0x80] sm:$0xff]  ;;  %v5787_v27 = vld [vmem:[#allocation6 + $0x8] sm:$0xff] }
0x1208   : > { %v5682_v42 = vmul.f32 0.2, %v12222_v28  ;;  %vm5680_vm8 = vcmp.ge.f32.partialorder %v12222_v28, 0.0  ;;  %v12016_v29 = vpack.c.bf16 %v9631_v26, %v9630_v24  ;;  %v9694_v26 = vld [vmem:[%s16182_s10 + $0x1e0] sm:$0xff] }
0x1209   : > { %vm5679_vm9 = vcmp.ge.f32.partialorder %v12223_v30, 0.0  ;;  %v5681_v32 = vmul.f32 0.2, %v12223_v30 }
0x120a   : > { %v15828_v33 = vsel %vm5680_vm8, %v12222_v28, %v5682_v42  ;;  %v5957_v28 = vld [vmem:[#allocation6 + $0x10] sm:$0xff] }
0x120b   : > { %v15826_v51 = vsel %vm5679_vm9, %v12223_v30, %v5681_v32  ;;  %v9632_v30 = vld [vmem:[%s16182_s10 + $0x90] sm:$0xff]  ;;  %v9633_v42 = vld [vmem:[%s16182_s10 + $0x98] sm:$0xff]  ;;  %v9634_v32 = vld [vmem:[%s16182_s10 + $0xa0] sm:$0xff] }
0x120c   : > { %10660 = vmatprep.mubr.msk.f32.mxu0 %vm4200_vm7, %v15826_v51  ;;  %10686 = vmatprep.mubr.msk.f32.mxu1 %vm4200_vm7, %v15826_v51  ;;  %v12020_v48 = vpack.c.bf16 %v9633_v42, %v9632_v30  ;;  %v9697_v30 = vld [vmem:[%s16182_s10 + $0x1f8] sm:$0xff] }
0x120d   : > { %10661 = vmatmul.mubr.msk.f32.vlgmr.msra.gmra.mrb[28].mxu0 %vm4200_vm7, %v15828_v33  ;;  %10687 = vmatmul.mubr.msk.f32.vlgmr.msra.gmra.mrb[32].mxu1 %vm4200_vm7, %v15828_v33 }
0x120e   : > { %12039 = vmatpush3.bf16.msra.mxu1 %v12036_v23  ;;  %10738 = vmatprep.mubr.msk.f32.mxu1 %vm4200_vm7, %v15826_v51 }
0x120f   : > { %12041 = vmatprep.subr.bf16.mxu1 %v12040_v50  ;;  %10667 = vmatprep.mubr.msk.f32.mxu0 %vm5788_vm10, %v5786_v16  ;;  %v9691_v16 = vld [vmem:[%s16182_s10 + $0x1c8] sm:$0xff] }
0x1212   : > { %12043 = vmatpush3.bf16.msra.mxu1 %v12040_v50  ;;  %v9635_v50 = vld [vmem:[%s16182_s10 + $0xa8] sm:$0xff] }
0x1213   : > { %12045 = vmatprep.subr.bf16.mxu1 %v12044_v37  ;;  %v12024_v38 = vpack.c.bf16 %v9635_v50, %v9634_v32  ;;  %v6978_v50 = vld [vmem:[#allocation6 + $0x78] sm:$0xff] }
0x1216   : > { %12047 = vmatpush3.bf16.msra.mxu1 %v12044_v37 }
0x1217   : > { %12049 = vmatprep.subr.bf16.mxu1 %v12048_v40 }
0x121a   : > { %12051 = vmatpush3.bf16.msra.mxu1 %v12048_v40  ;;  %v9637_v40 = vld [vmem:[%s16182_s10 + $0xb8] sm:$0xff] }
0x121b   : > { %12077 = vmatprep.subr.bf16.mxu1 %v12076_v44  ;;  %v12028_v41 = vpack.c.bf16 %v9637_v40, %v9636_v39  ;;  %v7407_v39 = vld [vmem:[#allocation8 + $0x10] sm:$0xff]  ;;  %v7408_v40 = vld [vmem:[#allocation8 + $0x18] sm:$0xff] }
0x121d   : > { %10739 = vmatmul.mubr.msk.f32.vlgmr.msra.gmra.mrb[34].mxu1 %vm4200_vm7, %v15828_v33 }
0x121e   : > { %12079 = vmatpush3.bf16.msra.mxu1 %v12076_v44  ;;  %10790 = vmatprep.mubr.msk.f32.mxu1 %vm4200_vm7, %v15826_v51 }
0x121f   : > { %12081 = vmatprep.subr.bf16.mxu1 %v12080_v2 }
0x1222   : > { %12083 = vmatpush3.bf16.msra.mxu1 %v12080_v2 }
0x1223   : > { %12085 = vmatprep.subr.bf16.mxu1 %v12084_v54 }
0x1226   : > { %12087 = vmatpush3.bf16.msra.mxu1 %v12084_v54 }
0x1227   : > { %12089 = vmatprep.subr.bf16.mxu1 %v12088_v56 }
0x122a   : > { %12091 = vmatpush3.bf16.msra.mxu1 %v12088_v56 }
0x122b   : > { %12097 = vmatprep.subr.bf16.mxu1 %v12096_v58 }
0x122d   : > { %10791 = vmatmul.mubr.msk.f32.vlgmr.msra.gmra.mrb[36].mxu1 %vm4200_vm7, %v15828_v33 }
0x122e   : > { %12099 = vmatpush3.bf16.msra.mxu1 %v12096_v58  ;;  %10816 = vmatprep.mubr.msk.f32.mxu1 %vm4200_vm7, %v15826_v51  ;;  %v9654_v58 = vld [vmem:[%s16182_s10 + $0x100] sm:$0xff] }
0x122f   : > { %12101 = vmatprep.subr.bf16.mxu1 %v12100_v60  ;;  %v12056_v61 = vpack.c.bf16 %v9655_v59, %v9654_v58  ;;  %v7715_v58 = vld [vmem:[#allocation8 + $0x30] sm:$0xff]  ;;  %v7716_v59 = vld [vmem:[#allocation8 + $0x38] sm:$0xff] }
0x1232   : > { %12103 = vmatpush3.bf16.msra.mxu1 %v12100_v60  ;;  %v6297_v60 = vld [vmem:[#allocation6 + $0x30] sm:$0xff] }
0x1233   : > { %12105 = vmatprep.subr.bf16.mxu1 %v12104_v63 }
0x1236   : > { %12107 = vmatpush3.bf16.msra.mxu1 %v12104_v63  ;;  %v9657_v63 = vld [vmem:[%s16182_s10 + $0x118] sm:$0xff] }
0x1237   : > { %12109 = vmatprep.subr.bf16.mxu1 %v12108_v20  ;;  %v12060_v4 = vpack.c.bf16 %v9657_v63, %v9656_v62  ;;  %v8023_v63 = vld [vmem:[#allocation8 + $0x50] sm:$0xff] }
0x123a   : > { %12111 = vmatpush3.bf16.msra.mxu1 %v12108_v20  ;;  %v9658_v20 = vld [vmem:[%s16182_s10 + $0x120] sm:$0xff] }
0x123b   : > { %12137 = vmatprep.subr.bf16.mxu1 %v12136_v6  ;;  %v12064_v5 = vpack.c.bf16 %v9659_v19, %v9658_v20  ;;  %v8177_v20 = vld [vmem:[#allocation8 + $0x60] sm:$0xff]  ;;  %v8178_v19 = vld [vmem:[#allocation8 + $0x68] sm:$0xff] }
0x123d   : > { %10817 = vmatmul.mubr.msk.f32.vlgmr.msra.gmra.mrb[38].mxu1 %vm4200_vm7, %v15828_v33 }
0x123e   : > { %12139 = vmatpush3.bf16.msra.mxu1 %v12136_v6  ;;  %10868 = vmatprep.mubr.msk.f32.mxu1 %vm4200_vm7, %v15826_v51  ;;  %v9660_v6 = vld [vmem:[%s16182_s10 + $0x130] sm:$0xff] }
0x123f   : > { %12141 = vmatprep.subr.bf16.mxu1 %v12140_v9  ;;  %v12068_v8 = vpack.c.bf16 %v9661_v7, %v9660_v6  ;;  %v8331_v6 = vld [vmem:[#allocation8 + $0x70] sm:$0xff]  ;;  %v8332_v7 = vld [vmem:[#allocation8 + $0x78] sm:$0xff] }
0x1242   : > { %12143 = vmatpush3.bf16.msra.mxu1 %v12140_v9  ;;  %v6467_v9 = vld [vmem:[#allocation6 + $0x40] sm:$0xff] }
0x1243   : > { %12145 = vmatprep.subr.bf16.mxu1 %v12144_v12 }
0x1246   : > { %12147 = vmatpush3.bf16.msra.mxu1 %v12144_v12 }
0x1247   : > { %12149 = vmatprep.subr.bf16.mxu1 %v12148_v15 }
0x124a   : > { %12151 = vmatpush3.bf16.msra.mxu1 %v12148_v15  ;;  %v9690_v15 = vld [vmem:[%s16182_s10 + $0x1c0] sm:$0xff] }
0x124d   : > { %10869 = vmatmul.mubr.msk.f32.vlgmr.msra.gmra.mrb[40].mxu1 %vm4200_vm7, %v15828_v33 }
0x12e0   : > { %v10662_v45 = vpop.f32.mrb[28].mxu0  ;;  %v10688_v17 = vpop.f32.mrb[32].mxu1 }
0x12e1   : > { %v5777_v18 = vpop.f32.mrb[29].mxu0  ;;  %v5947_v21 = vpop.f32.mrb[33].mxu1 }
0x12e2   : > { %v11992_v22 = vpack.c.bf16 %v10662_v45, %v5777_v18  ;;  %v12012_v23 = vpack.c.bf16 %v10688_v17, %v5947_v21  ;;  %v6638_v45 = vld [vmem:[#allocation6 + $0x58] sm:$0xff]  ;;  %v6807_v17 = vld [vmem:[#allocation6 + $0x60] sm:$0xff]  ;;  %v12116_v18 = vpack.c.bf16 %v9691_v16, %v9690_v15  ;;  %v9692_v21 = vld [vmem:[%s16182_s10 + $0x1d0] sm:$0xff] }
0x12e3   : > { %v7331_v16 = vld [vmem:[%s16225_s20] sm:$0x1] }
0x12e4   : > { %11993 = vmatprep.subr.bf16.mxu0 %v11992_v22 }
0x12e5   : > { %11995 = vmatpush3.bf16.msra.mxu0 %v11992_v22  ;;  %v9693_v22 = vld [vmem:[%s16182_s10 + $0x1d8] sm:$0xff] }
0x12e6   : > { %12013 = vmatprep.subr.bf16.mxu0 %v12012_v23  ;;  %v12120_v24 = vpack.c.bf16 %v9693_v22, %v9692_v21 }
0x12e8   : > { %10668 = vmatmul.mubr.msk.f32.vlgmr.msra.gmra.mrb[30].mxu0 %vm5788_vm10, %v5787_v27  ;;  %v9695_v27 = vld [vmem:[%s16182_s10 + $0x1e8] sm:$0xff] }
0x12e9   : > { %12015 = vmatpush3.bf16.msra.mxu0 %v12012_v23  ;;  %10693 = vmatprep.mubr.msk.f32.mxu0 %vm5788_vm10, %v5957_v28  ;;  %v6808_v23 = vld [vmem:[#allocation6 + $0x68] sm:$0xff]  ;;  %v12124_v28 = vpack.c.bf16 %v9695_v27, %v9694_v26 }
0x12ea   : > { %12017 = vmatprep.subr.bf16.mxu0 %v12016_v29 }
0x12f0   : > { %v10740_v34 = vpop.f32.mrb[34].mxu1  ;;  %10694 = vmatmul.mubr.msk.f32.vlgmr.msra.gmra.mrb[30].mxu0 %vm5788_vm10, %v5958_v31 }
0x12f1   : > { %12019 = vmatpush3.bf16.msra.mxu0 %v12016_v29  ;;  %v6287_v36 = vpop.f32.mrb[35].mxu1  ;;  %10712 = vmatprep.mubr.msk.f32.mxu0 %vm4200_vm7, %v15826_v51  ;;  %v9696_v29 = vld [vmem:[%s16182_s10 + $0x1f0] sm:$0xff] }
0x12f2   : > { %v12052_v37 = vpack.c.bf16 %v10740_v34, %v6287_v36  ;;  %12021 = vmatprep.subr.bf16.mxu0 %v12020_v48  ;;  %v12128_v42 = vpack.c.bf16 %v9697_v30, %v9696_v29  ;;  %v7147_v34 = vld [vmem:[#allocation6 + $0x80] sm:$0xff]  ;;  %v7248_v36 = vld [vmem:[#allocation8] sm:$0xff] }
0x12f5   : > { %12023 = vmatpush3.bf16.msra.mxu0 %v12020_v48 }
0x12f6   : > { %12025 = vmatprep.subr.bf16.mxu0 %v12024_v38 }
0x12f9   : > { %12027 = vmatpush3.bf16.msra.mxu0 %v12024_v38 }
0x12fa   : > { %12029 = vmatprep.subr.bf16.mxu0 %v12028_v41 }
0x12fd   : > { %12031 = vmatpush3.bf16.msra.mxu0 %v12028_v41  ;;  %v12163_v41 = vpack.c.bf16 %v7408_v40, %v7407_v39 }
0x1300   : > { %10713 = vmatmul.mubr.msk.f32.vlgmr.msra.gmra.mrb[32].mxu0 %vm4200_vm7, %v15828_v33  ;;  %v10792_v3 = vpop.f32.mrb[36].mxu1 }
0x1301   : > { %v6627_v44 = vpop.f32.mrb[37].mxu1  ;;  %10719 = vmatprep.mubr.msk.f32.mxu0 %vm5788_vm10, %v6127_v55 }
0x1302   : > { %v12092_v47 = vpack.c.bf16 %v10792_v3, %v6627_v44  ;;  %v5695_v3 = vpop.permute.xlu1 %5694 }
0x1310   : > { %v10818_v49 = vpop.f32.mrb[38].mxu1 }
0x1311   : > { %v6797_v2 = vpop.f32.mrb[39].mxu1 }
0x1312   : > { %v12112_v52 = vpack.c.bf16 %v10818_v49, %v6797_v2 }
0x1320   : > { %v10870_v53 = vpop.f32.mrb[40].mxu1 }
0x1321   : > { %v7137_v54 = vpop.f32.mrb[41].mxu1 }
0x1322   : > { %v15970_v46 = vpack.c.bf16 %v10870_v53, %v7137_v54  ;;  %v7561_v54 = vld [vmem:[#allocation8 + $0x20] sm:$0xff] }
0x13d3   : > { %v10714_v56 = vpop.f32.mrb[32].mxu0 }
0x13d4   : > { %v6117_v57 = vpop.f32.mrb[33].mxu0 }
0x13d5   : > { %v12032_v1 = vpack.c.bf16 %v10714_v56, %v6117_v57 }
0x13d7   : > { %12033 = vmatprep.subr.bf16.mxu0 %v12032_v1 }
0x13d8   : > { %12035 = vmatpush3.bf16.msra.mxu0 %v12032_v1 }
0x13d9   : > { %12053 = vmatprep.subr.bf16.mxu0 %v12052_v37 }
0x13db   : > { %10720 = vmatmul.mubr.msk.f32.vlgmr.msra.gmra.mrb[30].mxu0 %vm5788_vm10, %v6128_v43  ;;  %v12177_v43 = vpack.c.bf16 %v7716_v59, %v7715_v58 }
0x13dc   : > { %12055 = vmatpush3.bf16.msra.mxu0 %v12052_v37  ;;  %10745 = vmatprep.mubr.msk.f32.mxu0 %vm5788_vm10, %v6297_v60  ;;  %v7249_v37 = vld [vmem:[#allocation8 + $0x8] sm:$0xff]  ;;  %v7869_v60 = vld [vmem:[#allocation8 + $0x40] sm:$0xff] }
0x13dd   : > { %12057 = vmatprep.subr.bf16.mxu0 %v12056_v61  ;;  %v12156_v38 = vpack.c.bf16 %v7249_v37, %v7248_v36  ;;  %v9727_v36 = vld [vmem:[%s16225_s20 + $0x3] sm:$0x1] }
0x13df   : > { %12157 = vmatprep.subr.bf16.mxu1 %v12156_v38 }
0x13e0   : > { %12159 = vmatpush3.bf16.msra.mxu1 %v12156_v38 }
0x13e1   : > { %12164 = vmatprep.subr.bf16.mxu1 %v12163_v41 }
0x13e3   : > { %10746 = vmatmul.mubr.msk.f32.vlgmr.msra.gmra.mrb[30].mxu0 %vm5788_vm10, %v6298_v0  ;;  %v8024_v0 = vld [vmem:[#allocation8 + $0x58] sm:$0xff] }
0x13e4   : > { %12059 = vmatpush3.bf16.msra.mxu0 %v12056_v61  ;;  %10764 = vmatprep.mubr.msk.f32.mxu0 %vm4200_vm7, %v15826_v51  ;;  %v7870_v61 = vld [vmem:[#allocation8 + $0x48] sm:$0xff] }
0x13e5   : > { %12061 = vmatprep.subr.bf16.mxu0 %v12060_v4  ;;  %v12184_v62 = vpack.c.bf16 %v7870_v61, %v7869_v60 }
0x13e8   : > { %12063 = vmatpush3.bf16.msra.mxu0 %v12060_v4  ;;  %v12191_v4 = vpack.c.bf16 %v8024_v0, %v8023_v63 }
0x13e9   : > { %12065 = vmatprep.subr.bf16.mxu0 %v12064_v5 }
0x13ec   : > { %12067 = vmatpush3.bf16.msra.mxu0 %v12064_v5  ;;  %v12198_v5 = vpack.c.bf16 %v8178_v19, %v8177_v20 }
0x13ed   : > { %12069 = vmatprep.subr.bf16.mxu0 %v12068_v8 }
0x13f0   : > { %12071 = vmatpush3.bf16.msra.mxu0 %v12068_v8  ;;  %v12205_v8 = vpack.c.bf16 %v8332_v7, %v8331_v6 }
0x13f3   : > { %10765 = vmatmul.mubr.msk.f32.vlgmr.msra.gmra.mrb[34].mxu0 %vm4200_vm7, %v15828_v33 }
0x13f4   : > { %10771 = vmatprep.mubr.msk.f32.mxu0 %vm5788_vm10, %v6467_v9  ;;  %v8485_v9 = vld [vmem:[#allocation8 + $0x80] sm:$0xff] }
0x14c6   : > { %v10766_v10 = vpop.f32.mrb[34].mxu0 }
0x14c7   : > { %v6457_v11 = vpop.f32.mrb[35].mxu0 }
0x14c8   : > { %v12072_v12 = vpack.c.bf16 %v10766_v10, %v6457_v11  ;;  %v8486_v10 = vld [vmem:[#allocation8 + $0x88] sm:$0xff] }
0x14c9   : > { %v12212_v11 = vpack.c.bf16 %v8486_v10, %v8485_v9 }
0x14ca   : > { %12073 = vmatprep.subr.bf16.mxu0 %v12072_v12 }
0x14cb   : > { %12075 = vmatpush3.bf16.msra.mxu0 %v12072_v12 }
0x14cc   : > { %12093 = vmatprep.subr.bf16.mxu0 %v12092_v47 }
0x14ce   : > { %10772 = vmatmul.mubr.msk.f32.vlgmr.msra.gmra.mrb[30].mxu0 %vm5788_vm10, %v6468_v13 }
0x14cf   : > { %12095 = vmatpush3.bf16.msra.mxu0 %v12092_v47  ;;  %10797 = vmatprep.mubr.msk.f32.mxu0 %vm5788_vm10, %v6637_v14  ;;  %v5690_v47 = vpop.permute.xlu0 %5689 }
0x14d0   : > { %12113 = vmatprep.subr.bf16.mxu0 %v12112_v52 }
0x14d6   : > { %10798 = vmatmul.mubr.msk.f32.vlgmr.msra.gmra.mrb[30].mxu0 %vm5788_vm10, %v6638_v45 }
0x14d7   : > { %12115 = vmatpush3.bf16.msra.mxu0 %v12112_v52  ;;  %10823 = vmatprep.mubr.msk.f32.mxu0 %vm5788_vm10, %v6807_v17 }
0x14d8   : > { %12117 = vmatprep.subr.bf16.mxu0 %v12116_v18 }
0x14de   : > { %10824 = vmatmul.mubr.msk.f32.vlgmr.msra.gmra.mrb[30].mxu0 %vm5788_vm10, %v6808_v23 }
0x14df   : > { %12119 = vmatpush3.bf16.msra.mxu0 %v12116_v18  ;;  %10842 = vmatprep.mubr.msk.f32.mxu0 %vm4200_vm7, %v15826_v51  ;;  %v6977_v51 = vld [vmem:[#allocation6 + $0x70] sm:$0xff] }
0x14e0   : > { %12121 = vmatprep.subr.bf16.mxu0 %v12120_v24 }
0x14e3   : > { %12123 = vmatpush3.bf16.msra.mxu0 %v12120_v24  ;;  %v9719_v24 = vld [vmem:[%s16225_s20 + $0x1] sm:$0x1] }
0x14e4   : > { %12125 = vmatprep.subr.bf16.mxu0 %v12124_v28 }
0x14e7   : > { %12127 = vmatpush3.bf16.msra.mxu0 %v12124_v28 }
0x14e8   : > { %12129 = vmatprep.subr.bf16.mxu0 %v12128_v42 }
0x14eb   : > { %12131 = vmatpush3.bf16.msra.mxu0 %v12128_v42 }
0x14ee   : > { %10843 = vmatmul.mubr.msk.f32.vlgmr.msra.gmra.mrb[36].mxu0 %vm4200_vm7, %v15828_v33  ;;  %v7148_v33 = vld [vmem:[#allocation6 + $0x88] sm:$0xff] }
0x14ef   : > { %10849 = vmatprep.mubr.msk.f32.mxu0 %vm5788_vm10, %v6977_v51  ;;  %v9723_v51 = vld [vmem:[%s16225_s20 + $0x2] sm:$0x1] }
0x15c1   : > { %v10844_v31 = vpop.f32.mrb[36].mxu0 }
0x15c2   : > { %v6967_v48 = vpop.f32.mrb[37].mxu0 }
0x15c3   : > { %v12132_v32 = vpack.c.bf16 %v10844_v31, %v6967_v48 }
0x15c5   : > { %12133 = vmatprep.subr.bf16.mxu0 %v12132_v32 }
0x15c6   : > { %12135 = vmatpush3.bf16.msra.mxu0 %v12132_v32 }
0x15c7   : > { %12153 = vmatprep.subr.bf16.mxu0 %v15970_v46 }
0x15c9   : > { %10850 = vmatmul.mubr.msk.f32.vlgmr.msra.gmra.mrb[30].mxu0 %vm5788_vm10, %v6978_v50 }
0x15ca   : > { %12155 = vmatpush3.bf16.msra.mxu0 %v15970_v46  ;;  %10875 = vmatprep.mubr.msk.f32.mxu0 %vm5788_vm10, %v7147_v34  ;;  %v7562_v46 = vld [vmem:[#allocation8 + $0x28] sm:$0xff] }
0x15cb   : > { %12160 = vmatprep.subr.bf16.mxu0 %v12552_v25  ;;  %v12170_v57 = vpack.c.bf16 %v7562_v46, %v7561_v54  ;;  %v7242_v54 = vpop.permute.xlu0 %7241 }
0x15d1   : > { %10876 = vmatmul.mubr.msk.f32.vlgmr.msra.gmra.mrb[30].mxu0 %vm5788_vm10, %v7148_v33 }
0x15d2   : > { %10889 = vmatprep.mubr.msk.f32.mxu0 %vm12551_vm4, %v12549_v35 }
0x16a4   : > { %v10877_v44 = vpop.f32.mrb[30].mxu0 }
0x16a5   : > { %v12224_v49 = vadd.f32 %v10877_v44, %v5695_v3  ;;  %v7221_v2 = vpop.f32.mrb[31].mxu0  ;;  %v9731_v3 = vld [vmem:[%s16225_s20 + $0x4] sm:$0x1]  ;;  %v9735_v44 = vld [vmem:[%s16225_s20 + $0x5] sm:$0x1] }
0x16a6   : > { %v12225_v52 = vadd.f32 %v7221_v2, %v5690_v47  ;;  %v9739_v47 = vld [vmem:[%s16225_s20 + $0x6] sm:$0x1]  ;;  %v9747_v2 = vld [vmem:[%s16225_s20 + $0x8] sm:$0x1] }
0x16a7   : > { %v7235_v53 = vmul.f32 0.2, %v12224_v49  ;;  %vm7233_vm11 = vcmp.ge.f32.partialorder %v12224_v49, 0.0 }
0x16a8   : > { %vm7232_vm12 = vcmp.ge.f32.partialorder %v12225_v52, 0.0  ;;  %v7234_v55 = vmul.f32 0.2, %v12225_v52 }
0x16a9   : > { %v7237_v1 = vsel %vm7233_vm11, %v12224_v49, %v7235_v53  ;;  %v9743_v49 = vld [vmem:[%s16225_s20 + $0x7] sm:$0x1] }
0x16aa   : > { %v7236_v56 = vsel %vm7232_vm12, %v12225_v52, %v7234_v55  ;;  %v7244_v52 = vlaneseq }
0x16ab   : > { %10882 = vmatprep.mubr.msk.f32.mxu1 %vm5788_vm10, %v7236_v56 }
0x16ac   : > { %10883 = vmatmul.mubr.msk.f32.vlgmr.msra.gmra.mrb[42].mxu1 %vm5788_vm10, %v7237_v1  ;;  %v7245_v53 = vshrl.u32 %v7244_v52, 7 }
0x16ad   : > { %12166 = vmatpush3.bf16.msra.mxu1 %v12163_v41  ;;  %10896 = vmatprep.mubr.msk.f32.mxu1 %vm5788_vm10, %v7236_v56 }
0x16ae   : > { %12171 = vmatprep.subr.bf16.mxu1 %v12170_v57 }
0x16b0   : > { %10897 = vmatmul.mubr.msk.f32.vlgmr.msra.gmra.mrb[44].mxu1 %vm5788_vm10, %v7237_v1 }
0x16b1   : > { %12173 = vmatpush3.bf16.msra.mxu1 %v12170_v57  ;;  %10910 = vmatprep.mubr.msk.f32.mxu1 %vm5788_vm10, %v7236_v56 }
0x16b2   : > { %12178 = vmatprep.subr.bf16.mxu1 %v12177_v43 }
0x16b4   : > { %10911 = vmatmul.mubr.msk.f32.vlgmr.msra.gmra.mrb[46].mxu1 %vm5788_vm10, %v7237_v1 }
0x16b5   : > { %12180 = vmatpush3.bf16.msra.mxu1 %v12177_v43  ;;  %10924 = vmatprep.mubr.msk.f32.mxu1 %vm5788_vm10, %v7236_v56 }
0x16b6   : > { %12185 = vmatprep.subr.bf16.mxu1 %v12184_v62 }
0x16b8   : > { %10925 = vmatmul.mubr.msk.f32.vlgmr.msra.gmra.mrb[48].mxu1 %vm5788_vm10, %v7237_v1 }
0x16b9   : > { %12187 = vmatpush3.bf16.msra.mxu1 %v12184_v62  ;;  %10938 = vmatprep.mubr.msk.f32.mxu1 %vm5788_vm10, %v7236_v56 }
0x16ba   : > { %12192 = vmatprep.subr.bf16.mxu1 %v12191_v4 }
0x16bc   : > { %10939 = vmatmul.mubr.msk.f32.vlgmr.msra.gmra.mrb[50].mxu1 %vm5788_vm10, %v7237_v1 }
0x16bd   : > { %12194 = vmatpush3.bf16.msra.mxu1 %v12191_v4  ;;  %10952 = vmatprep.mubr.msk.f32.mxu1 %vm5788_vm10, %v7236_v56 }
0x16be   : > { %12199 = vmatprep.subr.bf16.mxu1 %v12198_v5 }
0x16c0   : > { %10953 = vmatmul.mubr.msk.f32.vlgmr.msra.gmra.mrb[52].mxu1 %vm5788_vm10, %v7237_v1 }
0x16c1   : > { %12201 = vmatpush3.bf16.msra.mxu1 %v12198_v5  ;;  %10966 = vmatprep.mubr.msk.f32.mxu1 %vm5788_vm10, %v7236_v56 }
0x16c2   : > { %12206 = vmatprep.subr.bf16.mxu1 %v12205_v8 }
0x16c4   : > { %10967 = vmatmul.mubr.msk.f32.vlgmr.msra.gmra.mrb[54].mxu1 %vm5788_vm10, %v7237_v1 }
0x16c5   : > { %12208 = vmatpush3.bf16.msra.mxu1 %v12205_v8  ;;  %10980 = vmatprep.mubr.msk.f32.mxu1 %vm5788_vm10, %v7236_v56 }
0x16c6   : > { %12213 = vmatprep.subr.bf16.mxu1 %v12212_v11 }
0x16c8   : > { %10981 = vmatmul.mubr.msk.f32.vlgmr.msra.gmra.mrb[56].mxu1 %vm5788_vm10, %v7237_v1 }
0x16c9   : > { %12215 = vmatpush3.bf16.msra.mxu1 %v12212_v11  ;;  %10994 = vmatprep.mubr.msk.f32.mxu1 %vm5788_vm10, %v7236_v56 }
0x16cc   : > { %10995 = vmatmul.mubr.msk.f32.vlgmr.msra.gmra.mrb[58].mxu1 %vm5788_vm10, %v7237_v1 }
0x177f   : > { %v10884_v12 = vpop.f32.mrb[42].mxu1 }
0x1780   : > { %v7322_v13 = vpop.f32.mrb[43].mxu1 }
0x1781   : > { %v12161_v14 = vpack.c.bf16 %v10884_v12, %v7322_v13 }
0x1783   : > { %12162 = vmatpush3.bf16.msra.mxu0 %v12161_v14  ;;  %v10898_v15 = vpop.f32.mrb[44].mxu1 }
0x1784   : > { %v7475_v45 = vpop.f32.mrb[45].mxu1  ;;  %12167 = vmatprep.subr.bf16.mxu0 %v12552_v25 }
0x1785   : > { %v12168_v17 = vpack.c.bf16 %v10898_v15, %v7475_v45 }
0x1786   : > { %10890 = vmatmul.mubr.msk.f32.vlgmr.msra.gmra.mrb[38].mxu0 %vm5788_vm10, %v7331_v16 }
0x1787   : > { %12169 = vmatpush3.bf16.msra.mxu0 %v12168_v17  ;;  %v10912_v18 = vpop.f32.mrb[46].mxu1  ;;  %10903 = vmatprep.mubr.msk.f32.mxu0 %vm12551_vm4, %v12549_v35 }
0x1788   : > { %v7629_v21 = vpop.f32.mrb[47].mxu1  ;;  %12174 = vmatprep.subr.bf16.mxu0 %v12552_v25 }
0x1789   : > { %v12175_v22 = vpack.c.bf16 %v10912_v18, %v7629_v21 }
0x178b   : > { %v10926_v23 = vpop.f32.mrb[48].mxu1 }
0x178c   : > { %v7783_v26 = vpop.f32.mrb[49].mxu1 }
0x178d   : > { %v12182_v27 = vpack.c.bf16 %v10926_v23, %v7783_v26 }
0x178e   : > { %10904 = vmatmul.mubr.msk.f32.vlgmr.msra.gmra.mrb[38].mxu0 %vm5788_vm10, %v9719_v24 }
0x178f   : > { %12176 = vmatpush3.bf16.msra.mxu0 %v12175_v22  ;;  %v10940_v28 = vpop.f32.mrb[50].mxu1  ;;  %10917 = vmatprep.mubr.msk.f32.mxu0 %vm12551_vm4, %v12549_v35 }
0x1790   : > { %v7937_v29 = vpop.f32.mrb[51].mxu1  ;;  %12181 = vmatprep.subr.bf16.mxu0 %v12552_v25 }
0x1791   : > { %v12189_v30 = vpack.c.bf16 %v10940_v28, %v7937_v29 }
0x1793   : > { %v10954_v42 = vpop.f32.mrb[52].mxu1 }
0x1794   : > { %v8091_v31 = vpop.f32.mrb[53].mxu1 }
0x1795   : > { %v12196_v48 = vpack.c.bf16 %v10954_v42, %v8091_v31 }
0x1796   : > { %10918 = vmatmul.mubr.msk.f32.vlgmr.msra.gmra.mrb[38].mxu0 %vm5788_vm10, %v9723_v51 }
0x1797   : > { %12183 = vmatpush3.bf16.msra.mxu0 %v12182_v27  ;;  %v10968_v32 = vpop.f32.mrb[54].mxu1  ;;  %10931 = vmatprep.mubr.msk.f32.mxu0 %vm12551_vm4, %v12549_v35 }
0x1798   : > { %v8245_v50 = vpop.f32.mrb[55].mxu1  ;;  %12188 = vmatprep.subr.bf16.mxu0 %v12552_v25 }
0x1799   : > { %v12203_v34 = vpack.c.bf16 %v10968_v32, %v8245_v50 }
0x179b   : > { %v10982_v33 = vpop.f32.mrb[56].mxu1 }
0x179c   : > { %v8399_v37 = vpop.f32.mrb[57].mxu1 }
0x179d   : > { %v12210_v38 = vpack.c.bf16 %v10982_v33, %v8399_v37 }
0x179e   : > { %10932 = vmatmul.mubr.msk.f32.vlgmr.msra.gmra.mrb[38].mxu0 %vm5788_vm10, %v9727_v36 }
0x179f   : > { %12190 = vmatpush3.bf16.msra.mxu0 %v12189_v30  ;;  %v10996_v39 = vpop.f32.mrb[58].mxu1  ;;  %10945 = vmatprep.mubr.msk.f32.mxu0 %vm12551_vm4, %v12549_v35 }
0x17a0   : > { %v8553_v40 = vpop.f32.mrb[59].mxu1  ;;  %12195 = vmatprep.subr.bf16.mxu0 %v12552_v25 }
0x17a1   : > { %v12217_v41 = vpack.c.bf16 %v10996_v39, %v8553_v40 }
0x17a6   : > { %10946 = vmatmul.mubr.msk.f32.vlgmr.msra.gmra.mrb[38].mxu0 %vm5788_vm10, %v9731_v3 }
0x17a7   : > { %12197 = vmatpush3.bf16.msra.mxu0 %v12196_v48  ;;  %10959 = vmatprep.mubr.msk.f32.mxu0 %vm12551_vm4, %v12549_v35 }
0x17a8   : > { %12202 = vmatprep.subr.bf16.mxu0 %v12552_v25 }
0x17ae   : > { %10960 = vmatmul.mubr.msk.f32.vlgmr.msra.gmra.mrb[38].mxu0 %vm5788_vm10, %v9735_v44 }
0x17af   : > { %12204 = vmatpush3.bf16.msra.mxu0 %v12203_v34  ;;  %10973 = vmatprep.mubr.msk.f32.mxu0 %vm12551_vm4, %v12549_v35 }
0x17b0   : > { %12209 = vmatprep.subr.bf16.mxu0 %v12552_v25 }
0x17b6   : > { %10974 = vmatmul.mubr.msk.f32.vlgmr.msra.gmra.mrb[38].mxu0 %vm5788_vm10, %v9739_v47 }
0x17b7   : > { %12211 = vmatpush3.bf16.msra.mxu0 %v12210_v38  ;;  %10987 = vmatprep.mubr.msk.f32.mxu0 %vm12551_vm4, %v12549_v35 }
0x17b8   : > { %12216 = vmatprep.subr.bf16.mxu0 %v12552_v25  ;;  %v7246_v25 = vsub.s32 0, %v7245_v53 }
0x17ba   : > { %v7247_v46 = vrot.slane %v7242_v54, %v7246_v25 }
0x17be   : > { %10988 = vmatmul.mubr.msk.f32.vlgmr.msra.gmra.mrb[38].mxu0 %vm5788_vm10, %v9743_v49 }
0x17bf   : > { %12218 = vmatpush3.bf16.msra.mxu0 %v12217_v41  ;;  %11001 = vmatprep.mubr.msk.f32.mxu0 %vm12551_vm4, %v12549_v35 }
0x17c6   : > { %11002 = vmatmul.mubr.msk.f32.vlgmr.msra.gmra.mrb[38].mxu0 %vm5788_vm10, %v9747_v2 }
0x1899   : > { %v8633_v55 = vpop.f32.mrb[38].mxu0 }
0x189a   : > { %v12226_v56 = vadd.f32 %v8633_v55, %v7247_v46  ;;  %v11003_v35 = vpop.f32.mrb[39].mxu0 }
0x189c   : > { %8639 = vst.msk [vmem:[%s559_s29] sm:$0x1] %vm8638_vm13, %v12226_v56 }
0x189d   : > { %12485 = shalt.err (!%p12482_p9)
}
0x189e   : > { %s12486_s18 = scalar_lea.hbm %s16130_s16, 16  ;;  %s12490_s21 = scalar_lea.hbm %s16229_s0, 32 }
0x189f   : > { %p12487_p2 = scmp.ne.s32.totalorder %s16130_s16, %s12486_s18  ;;  %p12491_p5 = scmp.lt.u32.totalorder %s16130_s16, %s16229_s0 }
0x18a0   : > { %p12492_p10 = scmp.lt.u32.totalorder %s12490_s21, %s12486_s18  ;;  %p12494_p4 = scmp.lt.u32.totalorder %s12486_s18, %s16130_s16 }
0x18a1   : > { %p12488_p0 = pnand %p12487_p2, %p16230_p7 }
0x18a2   : > { %p12493_p12 = por %p12492_p10, %p12491_p5 }
0x18a3   : > { %p12489_p3 = pneg %p12488_p0 }
0x18a4   : > { %p12495_p8 = por %p12494_p4, %p12493_p12 }
0x18a6   : > { %p12496_p11 = pnand %p12495_p8, %p12489_p3 }
0x18a8   : > { %12499 = shalt.err (!%p12496_p11)
}
0x18a9   : > { %12319 = dma.vmem_to_hbm [thread:$0]  (%p16230_p7), %s16132_s14, 16, %s16130_s16, %s8641_s19  }
0x18aa PF: > { %s16231_s22 = sld [smem:[#allocation16_spill]]  ;;  %s16232_s25 = sld [smem:[#allocation13_spill]] }
0x18ab   : > { %s16233_s15 = sld [smem:[#allocation20_spill]] }
0x18b0   : > { %p12341_p13 = scmp.ge.s32.totalorder %s16231_s22, 2  ;;  %s8665_s28 = sand.u32 1, %s16232_s25  }
0x18b1   : > { %p16234_p1 = scmp.ne.s32.totalorder %s16233_s15, 0  ;;  %s8666_s24 = scalar_lea.sflag [#allocation5], %s8665_s28 }
0x18b3   : > { %p12332_p6 = pnand %p12341_p13, %p16234_p1 }
0x18b5   : > { %12525 = dma.done.wait (!%p12332_p6), %s8666_s24, 16  }
0x18b6   : > { %12527 = vsyncadd (!%p12332_p6), %s8666_s24, 4294967280  ;;  %s16235_s26 = sld [smem:[#allocation17_spill]]  ;;  %s16236_s23 = sld [smem:[#allocation14_spill]] }
0x18b7   : > { %s16237_s24 = sld [smem:[#allocation15_spill]]  ;;  %s16238_s25 = sld [smem:[#allocation18_spill]] }
0x18bc   : > { %p30_p9 = scmp.ge.s32.totalorder %s16235_s26, 4  }
0x18be   :  { %32 = sbr.rel (!%p30_p9) target bundleno = 9 (0x9), region = 212 }
0x18c5   :  { %8670 = vsyncpa [#allocation4], 1 }
0x18c6   :  { %8672 = vsyncpa [#allocation4 + $0x1], 1 }
0x18c7   :  { %8673 = vsyncpa [#allocation7], 1 }
0x18c8   :  { %8674 = vsyncpa [#allocation5], 1 }
0x18c9   :  { %8676 = vsyncpa [#allocation5 + $0x1], 1 }

</bundles_post_ra>
